<compile_context>
chip_gen: v7x
topology: tpu7x:2x2x1
jax: 0.10.0
libtpu: 0.0.40
codegen_flags: <defaults>
</compile_context>

<pallas_src>
import math

import jax
import jax.numpy as jnp
from jax import lax
from jax.experimental import pallas as pl
from jax.experimental.pallas import tpu as pltpu


def _sigmoid(x):
    # Exact sigmoid as a single EUP tanh + cheap VPU mul/add (no approximate
    # reciprocal whose error compounds through the recurrence).
    return 0.5 * jnp.tanh(0.5 * x) + 0.5


def _make_bilstm_kernel(hidden, t_chunk):
    H = hidden
    unroll = True if t_chunk <= 8 else 4

    def kernel(gxf_ref, gxb_ref, mf_ref, mb_ref, invlen_ref, whh_ref,
               yf_ref, yb_ref, avgf_ref, avgb_ref,
               hf, cf, accf, hb, cb, accb):
        ci = pl.program_id(0)

        @pl.when(ci == 0)
        def _init():
            for r in (hf, cf, accf, hb, cb, accb):
                r[...] = jnp.zeros_like(r)

        # Hoisted out of the step loop.
        # TODO(synk): hold W_hh stationary in the MXU across the chunk via
        # pltpu.matmul_push_rhs/matmul_acc_lhs/matmul_pop; kept as jnp.dot for
        # portability / lowering safety.
        whh_f = whh_ref[0]          # [H, 4H] bf16
        whh_b = whh_ref[1]

        def cell(gx, m, h, c, whh):
            gates = gx.astype(jnp.float32) + jnp.dot(
                h.astype(jnp.bfloat16), whh, preferred_element_type=jnp.float32)
            i_g = _sigmoid(gates[:, 0:H])
            f_g = _sigmoid(gates[:, H:2 * H])
            g_g = jnp.tanh(gates[:, 2 * H:3 * H])
            o_g = _sigmoid(gates[:, 3 * H:4 * H])
            c_new = f_g * c + i_g * g_g
            h_new = o_g * jnp.tanh(c_new)
            # Zero padded steps: outputs become 0 AND state resets so the
            # backward chain effectively starts at t = len-1 (packed semantics).
            return h_new * m, c_new * m

        def step(s, carry):
            lf = s                      # forward walks the chunk ascending
            lb = t_chunk - 1 - s        # backward walks its chunk descending
            # The two direction chains are independent; interleaving them lets
            # one chain's MXU work overlap the other's EUP/VPU work.
            h_new, c_new = cell(gxf_ref[lf], mf_ref[lf], hf[...], cf[...], whh_f)
            hf[...] = h_new
            cf[...] = c_new
            accf[...] += h_new                      # masked running sum (mean)
            yf_ref[lf] = h_new.astype(yf_ref.dtype)

            h_new, c_new = cell(gxb_ref[lb], mb_ref[lb], hb[...], cb[...], whh_b)
            hb[...] = h_new
            cb[...] = c_new
            accb[...] += h_new
            yb_ref[lb] = h_new.astype(yb_ref.dtype)
            return carry

        lax.fori_loop(0, t_chunk, step, 0, unroll=unroll)

        @pl.when(ci == pl.num_programs(0) - 1)
        def _finalize():
            inv = invlen_ref[...]
            avgf_ref[...] = accf[...] * inv
            avgb_ref[...] = accb[...] * inv

    return kernel


def _bilstm_layer_call(gx_f, gx_b, mask, inv_len, whh_bf16, *, t_chunk):
    """One bidirectional LSTM layer (recurrence only).

    gx_f, gx_b: [T, Bp, 4H] bf16   precomputed x @ W_ih + b per direction
    mask:       [T, Bp, 1]  f32    1.0 where t < len else 0.0
    inv_len:    [Bp, 1]     f32    1 / max(len, 1)
    whh_bf16:   [2, H, 4H]  bf16   recurrent weights
    returns     y_f, y_b [T, Bp, H] bf16 (per-step outputs per direction)
                avg_f, avg_b [Bp, H] f32 (length-masked means per direction)
    """
    T, Bp, G = gx_f.shape
    H = G // 4
    n_chunks = T // t_chunk

    grid_spec = pltpu.PrefetchScalarGridSpec(
        num_scalar_prefetch=0,
        grid=(n_chunks,),
        in_specs=[
            pl.BlockSpec((t_chunk, Bp, G), lambda i: (i, 0, 0)),                 # gx fwd
            pl.BlockSpec((t_chunk, Bp, G), lambda i: (n_chunks - 1 - i, 0, 0)),  # gx bwd
            pl.BlockSpec((t_chunk, Bp, 1), lambda i: (i, 0, 0)),                 # mask fwd
            pl.BlockSpec((t_chunk, Bp, 1), lambda i: (n_chunks - 1 - i, 0, 0)),  # mask bwd
            pl.BlockSpec((Bp, 1), lambda i: (0, 0)),                             # 1/len
            pl.BlockSpec((2, H, G), lambda i: (0, 0, 0)),                        # W_hh
        ],
        out_specs=[
            pl.BlockSpec((t_chunk, Bp, H), lambda i: (i, 0, 0)),                 # y fwd
            pl.BlockSpec((t_chunk, Bp, H), lambda i: (n_chunks - 1 - i, 0, 0)),  # y bwd
            pl.BlockSpec((Bp, H), lambda i: (0, 0)),                             # avg fwd
            pl.BlockSpec((Bp, H), lambda i: (0, 0)),                             # avg bwd
        ],
        scratch_shapes=[pltpu.VMEM((Bp, H), jnp.float32)] * 6,   # h/c/acc per dir
    )

    y_f, y_b, avg_f, avg_b = pl.pallas_call(
        _make_bilstm_kernel(H, t_chunk),
        out_shape=(jax.ShapeDtypeStruct((T, Bp, H), jnp.bfloat16),
                   jax.ShapeDtypeStruct((T, Bp, H), jnp.bfloat16),
                   jax.ShapeDtypeStruct((Bp, H), jnp.float32),
                   jax.ShapeDtypeStruct((Bp, H), jnp.float32)),
        grid_spec=grid_spec,
        compiler_params=pltpu.CompilerParams(
            # One sequential time axis; h/c/acc carried in VMEM scratch.
            dimension_semantics=("arbitrary",),
            # Conservative scoped limit: safe on v7x (64 MiB physical per TC)
            # and leaves pipelining headroom on v5e/v6e.
            vmem_limit_bytes=32 * 1024 * 1024,
        ),
    )(gx_f, gx_b, mask, mask, inv_len, whh_bf16)
    return y_f, y_b, avg_f, avg_b


def _pick_time_chunk(T, Bp, H, *, target=32, budget_bytes=24 * 1024 * 1024):
    """Largest chunk dividing T whose double-buffered stream fits the budget."""
    tc = min(T, target)
    while T % tc:
        tc -= 1

    def stream_bytes(t):
        gx = 2 * t * Bp * 4 * H * 2        # two bf16 gx chunks
        y = 2 * t * Bp * H * 2             # two bf16 y chunks
        m = 2 * t * Bp * 128 * 4           # two mask chunks (lane-padded)
        return 2 * (gx + y + m)            # double buffered

    while tc > 1 and stream_bytes(tc) > budget_bytes:
        nt = tc - 1
        while T % nt:
            nt -= 1
        tc = nt
    return tc


def birnn_forward(params, x_btd, lens, *, t_chunk=None):
    """Full BiRNNLayer forward: multi-layer bi-LSTM + masked mean pool -> [B, 2H]."""
    B, T, D = x_btd.shape
    H = params[0]['whh'].shape[1]
    Bp = max(8, -(-B // 8) * 8)           # pad batch so (8,128) sublanes are full

    if t_chunk is None:
        t_chunk = _pick_time_chunk(T, Bp, H)
    assert T % t_chunk == 0

    lens = jnp.asarray(lens, jnp.int32)
    lens_p = jnp.zeros((Bp,), jnp.int32).at[:B].set(lens)       # padded rows: len 0
    x_p = jnp.zeros((Bp, T, D), x_btd.dtype).at[:B].set(x_btd)

    t_ids = jnp.arange(T, dtype=jnp.int32)
    mask = (t_ids[:, None] < lens_p[None, :]).astype(jnp.float32)[:, :, None]  # [T,Bp,1]
    inv_len = (1.0 / jnp.maximum(lens_p, 1).astype(jnp.float32)).reshape(Bp, 1)

    # Layer input as a list of feature-slabs; for layers > 0 these are the
    # fwd/bwd output slabs, consumed directly (no [T,B,2H] concat/relayout).
    parts = [jnp.transpose(x_p, (1, 0, 2))]      # time-major [T, Bp, D]
    avg_f = avg_b = None
    for p in params:
        wih = p['wih'].astype(jnp.bfloat16)      # [2, d_in, 4H]
        # Input projection hoisted out of the recurrence: large bf16 GEMMs
        # (M = T*Bp) with f32 accumulation, bias folded, streamed as bf16.
        gx = None
        off = 0
        for part in parts:
            d_i = part.shape[-1]
            g = jnp.einsum('tbd,zdg->ztbg', part.astype(jnp.bfloat16),
                           wih[:, off:off + d_i, :],
                           preferred_element_type=jnp.float32)
            gx = g if gx is None else gx + g
            off += d_i
        gx = (gx + p['b'][:, None]).astype(jnp.bfloat16)         # [2, T, Bp, 4H]

        y_f, y_b, avg_f, avg_b = _bilstm_layer_call(
            gx[0], gx[1], mask, inv_len, p['whh'].astype(jnp.bfloat16),
            t_chunk=t_chunk)
        parts = [y_f, y_b]
        # TODO(synk): inter-layer dropout omitted (PyTorch applies it only in
        # training mode; eval-mode forward is identity).

    # Forward half then backward half, like PyTorch; drop batch padding.
    return jnp.concatenate([avg_f[:B], avg_b[:B]], axis=-1)


def init_params(key, in_dim, hidden_dim, num_layers):
    """Deterministic LSTM-style init (uniform(-1/sqrt(H), 1/sqrt(H))), stacked per dir."""
    params = []
    d = in_dim
    bound = 1.0 / math.sqrt(hidden_dim)
    for _ in range(num_layers):
        key, k1, k2, k3, k4 = jax.random.split(key, 5)
        wih = jax.random.uniform(k1, (2, d, 4 * hidden_dim), jnp.float32, -bound, bound)
        whh = jax.random.uniform(k2, (2, hidden_dim, 4 * hidden_dim), jnp.float32,
                                 -bound, bound)
        b_ih = jax.random.uniform(k3, (2, 1, 4 * hidden_dim), jnp.float32, -bound, bound)
        b_hh = jax.random.uniform(k4, (2, 1, 4 * hidden_dim), jnp.float32, -bound, bound)
        params.append({'wih': wih, 'whh': whh, 'b': b_ih + b_hh})
        d = 2 * hidden_dim
    return params


# -------- pure-JAX f32 reference mirroring packed-sequence semantics --------
def _cell_ref(x_t, h, c, wih, whh, b, H):
    gates = x_t @ wih + h @ whh + b
    i = jax.nn.sigmoid(gates[:, :H])
    f = jax.nn.sigmoid(gates[:, H:2 * H])
    g = jnp.tanh(gates[:, 2 * H:3 * H])
    o = jax.nn.sigmoid(gates[:, 3 * H:])
    c = f * c + i * g
    h = o * jnp.tanh(c)
    return h, c


def birnn_reference(params, x_btd, lens):
    B, T, _ = x_btd.shape
    H = params[0]['whh'].shape[1]
    x = x_btd.astype(jnp.float32)
    for p in params:
        outs = jnp.zeros((B, T, 2 * H), jnp.float32)
        for b in range(B):
            L = int(lens[b])
            h = jnp.zeros((1, H), jnp.float32)
            c = jnp.zeros((1, H), jnp.float32)
            for t in range(L):
                h, c = _cell_ref(x[b:b + 1, t], h, c,
                                 p['wih'][0], p['whh'][0], p['b'][0], H)
                outs = outs.at[b, t, :H].set(h[0])
            h = jnp.zeros((1, H), jnp.float32)
            c = jnp.zeros((1, H), jnp.float32)
            for t in range(L - 1, -1, -1):
                h, c = _cell_ref(x[b:b + 1, t], h, c,
                                 p['wih'][1], p['whh'][1], p['b'][1], H)
                outs = outs.at[b, t, H:].set(h[0])
        x = outs
    avg = jnp.stack([jnp.mean(x[b, :int(lens[b])], axis=0) for b in range(B)], axis=0)
    return avg


if __name__ == "__main__":
    # hidden_dim = 128 keeps gate slices and per-step output stores lane-dense.
    B, T, in_dim, hidden_dim, num_layers = 2, 8, 16, 128, 2

    key = jax.random.PRNGKey(0)
    kx, kp = jax.random.split(key)
    x = jax.random.normal(kx, (B, T, in_dim), dtype=jnp.float32)
    lens = jnp.array([8, 5], dtype=jnp.int32)           # variable sequence lengths
    params = init_params(kp, in_dim, hidden_dim, num_layers)

    out = birnn_forward(params, x, lens, t_chunk=4)     # 2 time chunks -> state carry
    out = jax.block_until_ready(out)
    assert out.shape == (B, 2 * hidden_dim), out.shape

    ref = birnn_reference(params, x, lens)
    max_err = float(jnp.max(jnp.abs(out - ref)))
    # bf16 matmul operands + bf16 gx stream vs. the pure-f32 reference.
    assert max_err < 3e-2, f"mismatch vs reference: {max_err}"

    print("KERNEL_OK")
</pallas_src>

<mosaic_0001>
module attributes {stable_mosaic.version = 11 : i64} {
  func.func @kernel(%arg0: i32, %arg1: memref<4x8x512xbf16, #tpu.memory_space<vmem>>, %arg2: memref<4x8x512xbf16, #tpu.memory_space<vmem>>, %arg3: memref<4x8x1xf32, #tpu.memory_space<vmem>>, %arg4: memref<4x8x1xf32, #tpu.memory_space<vmem>>, %arg5: memref<8x1xf32, #tpu.memory_space<vmem>>, %arg6: memref<2x128x512xbf16, #tpu.memory_space<vmem>>, %arg7: memref<4x8x128xbf16, #tpu.memory_space<vmem>>, %arg8: memref<4x8x128xbf16, #tpu.memory_space<vmem>>, %arg9: memref<8x128xf32, #tpu.memory_space<vmem>>, %arg10: memref<8x128xf32, #tpu.memory_space<vmem>>, %arg11: memref<8x128xf32, #tpu.memory_space<vmem>>, %arg12: memref<8x128xf32, #tpu.memory_space<vmem>>, %arg13: memref<8x128xf32, #tpu.memory_space<vmem>>, %arg14: memref<8x128xf32, #tpu.memory_space<vmem>>, %arg15: memref<8x128xf32, #tpu.memory_space<vmem>>, %arg16: memref<8x128xf32, #tpu.memory_space<vmem>>) attributes {dimension_semantics = [#tpu.dimension_semantics<arbitrary>], iteration_bounds = array<i64: 2>, scalar_prefetch = 0 : i64, scratch_operands = 6 : i64, tpu.core_type = #tpu.core_type<tc>, window_params = [{transform_indices = @transform_0, window_bounds = array<i64: 4, 8, 512>}, {transform_indices = @transform_1, window_bounds = array<i64: 4, 8, 512>}, {transform_indices = @transform_2, window_bounds = array<i64: 4, 8, 1>}, {transform_indices = @transform_3, window_bounds = array<i64: 4, 8, 1>}, {pipeline_mode = #tpu.pipeline_mode<synchronous>, transform_indices = @transform_4, window_bounds = array<i64: 8, 1>}, {pipeline_mode = #tpu.pipeline_mode<synchronous>, transform_indices = @transform_5, window_bounds = array<i64: 2, 128, 512>}, {transform_indices = @transform_6, window_bounds = array<i64: 4, 8, 128>}, {transform_indices = @transform_7, window_bounds = array<i64: 4, 8, 128>}, {pipeline_mode = #tpu.pipeline_mode<synchronous>, transform_indices = @transform_8, window_bounds = array<i64: 8, 128>}, {pipeline_mode = #tpu.pipeline_mode<synchronous>, transform_indices = @transform_9, window_bounds = array<i64: 8, 128>}]} {
    %c0_i32 = arith.constant 0 : i32
    %0 = arith.cmpi eq, %arg0, %c0_i32 : i32
    %1 = arith.extui %0 : i1 to i32
    %c0_i32_0 = arith.constant 0 : i32
    %2 = arith.cmpi ne, %1, %c0_i32_0 : i32
    scf.if %2 {
      %cst_235 = arith.constant 0.000000e+00 : f32
      %470 = vector.broadcast %cst_235 : f32 to vector<8x128xf32>
      %c0_236 = arith.constant 0 : index
      %c0_237 = arith.constant 0 : index
      %471 = vector.load %arg11[%c0_236, %c0_237] : memref<8x128xf32, #tpu.memory_space<vmem>>, vector<8x128xf32>
      tpu.vector_store %arg11[%c0_236, %c0_237], %470 {strides = array<i32>} : memref<8x128xf32, #tpu.memory_space<vmem>>, vector<8x128xf32>,
      %cst_238 = arith.constant 0.000000e+00 : f32
      %472 = vector.broadcast %cst_238 : f32 to vector<8x128xf32>
      %c0_239 = arith.constant 0 : index
      %c0_240 = arith.constant 0 : index
      %473 = vector.load %arg12[%c0_239, %c0_240] : memref<8x128xf32, #tpu.memory_space<vmem>>, vector<8x128xf32>
      tpu.vector_store %arg12[%c0_239, %c0_240], %472 {strides = array<i32>} : memref<8x128xf32, #tpu.memory_space<vmem>>, vector<8x128xf32>,
      %cst_241 = arith.constant 0.000000e+00 : f32
      %474 = vector.broadcast %cst_241 : f32 to vector<8x128xf32>
      %c0_242 = arith.constant 0 : index
      %c0_243 = arith.constant 0 : index
      %475 = vector.load %arg13[%c0_242, %c0_243] : memref<8x128xf32, #tpu.memory_space<vmem>>, vector<8x128xf32>
      tpu.vector_store %arg13[%c0_242, %c0_243], %474 {strides = array<i32>} : memref<8x128xf32, #tpu.memory_space<vmem>>, vector<8x128xf32>,
      %cst_244 = arith.constant 0.000000e+00 : f32
      %476 = vector.broadcast %cst_244 : f32 to vector<8x128xf32>
      %c0_245 = arith.constant 0 : index
      %c0_246 = arith.constant 0 : index
      %477 = vector.load %arg14[%c0_245, %c0_246] : memref<8x128xf32, #tpu.memory_space<vmem>>, vector<8x128xf32>
      tpu.vector_store %arg14[%c0_245, %c0_246], %476 {strides = array<i32>} : memref<8x128xf32, #tpu.memory_space<vmem>>, vector<8x128xf32>,
      %cst_247 = arith.constant 0.000000e+00 : f32
      %478 = vector.broadcast %cst_247 : f32 to vector<8x128xf32>
      %c0_248 = arith.constant 0 : index
      %c0_249 = arith.constant 0 : index
      %479 = vector.load %arg15[%c0_248, %c0_249] : memref<8x128xf32, #tpu.memory_space<vmem>>, vector<8x128xf32>
      tpu.vector_store %arg15[%c0_248, %c0_249], %478 {strides = array<i32>} : memref<8x128xf32, #tpu.memory_space<vmem>>, vector<8x128xf32>,
      %cst_250 = arith.constant 0.000000e+00 : f32
      %480 = vector.broadcast %cst_250 : f32 to vector<8x128xf32>
      %c0_251 = arith.constant 0 : index
      %c0_252 = arith.constant 0 : index
      %481 = vector.load %arg16[%c0_251, %c0_252] : memref<8x128xf32, #tpu.memory_space<vmem>>, vector<8x128xf32>
      tpu.vector_store %arg16[%c0_251, %c0_252], %480 {strides = array<i32>} : memref<8x128xf32, #tpu.memory_space<vmem>>, vector<8x128xf32>,
    } else {
    }
    %c0 = arith.constant 0 : index
    %c0_1 = arith.constant 0 : index
    %c0_2 = arith.constant 0 : index
    %3 = vector.load %arg6[%c0, %c0_1, %c0_2] : memref<2x128x512xbf16, #tpu.memory_space<vmem>>, vector<1x128x512xbf16>
    %4 = vector.shape_cast %3 : vector<1x128x512xbf16> to vector<128x512xbf16>
    %c1 = arith.constant 1 : index
    %c0_3 = arith.constant 0 : index
    %c0_4 = arith.constant 0 : index
    %5 = vector.load %arg6[%c1, %c0_3, %c0_4] : memref<2x128x512xbf16, #tpu.memory_space<vmem>>, vector<1x128x512xbf16>
    %6 = vector.shape_cast %5 : vector<1x128x512xbf16> to vector<128x512xbf16>
    %c0_i32_5 = arith.constant 0 : i32
    %c3_i32 = arith.constant 3 : i32
    %7 = arith.subi %c3_i32, %c0_i32_5 : i32
    %8 = arith.index_cast %c0_i32_5 : i32 to index
    %c0_6 = arith.constant 0 : index
    %c0_7 = arith.constant 0 : index
    %9 = vector.load %arg1[%8, %c0_6, %c0_7] : memref<4x8x512xbf16, #tpu.memory_space<vmem>>, vector<1x8x512xbf16>
    %10 = vector.shape_cast %9 : vector<1x8x512xbf16> to vector<8x512xbf16>
    %11 = arith.index_cast %c0_i32_5 : i32 to index
    %c0_8 = arith.constant 0 : index
    %c0_9 = arith.constant 0 : index
    %12 = vector.load %arg3[%11, %c0_8, %c0_9] : memref<4x8x1xf32, #tpu.memory_space<vmem>>, vector<1x8x1xf32>
    %13 = vector.shape_cast %12 : vector<1x8x1xf32> to vector<8x1xf32>
    %c0_10 = arith.constant 0 : index
    %c0_11 = arith.constant 0 : index
    %14 = vector.load %arg11[%c0_10, %c0_11] : memref<8x128xf32, #tpu.memory_space<vmem>>, vector<8x128xf32>
    %c0_12 = arith.constant 0 : index
    %c0_13 = arith.constant 0 : index
    %15 = vector.load %arg12[%c0_12, %c0_13] : memref<8x128xf32, #tpu.memory_space<vmem>>, vector<8x128xf32>
    %16 = arith.extf %10 : vector<8x512xbf16> to vector<8x512xf32>
    %17 = arith.truncf %14 : vector<8x128xf32> to vector<8x128xbf16>
    %cst = arith.constant dense<0.000000e+00> : vector<8x512xf32>
    %18 = tpu.matmul %17, %4, %cst {dimension_numbers = #tpu.dot_dimension_numbers<[1], [0], [0], [1], [0, 0, 1, 1], [], []>} : vector<8x128xbf16>, vector<128x512xbf16>, vector<8x512xf32> -> vector<8x512xf32>
    %19 = arith.addf %16, %18 : vector<8x512xf32>
    %20 = vector.extract_strided_slice %19 {offsets = [0, 0], sizes = [8, 128], strides = [1, 1]} : vector<8x512xf32> to vector<8x128xf32>
    %cst_14 = arith.constant 5.000000e-01 : f32
    %21 = vector.broadcast %cst_14 : f32 to vector<8x128xf32>
    %22 = arith.mulf %21, %20 : vector<8x128xf32>
    %23 = math.tanh %22 : vector<8x128xf32>
    %cst_15 = arith.constant 5.000000e-01 : f32
    %24 = vector.broadcast %cst_15 : f32 to vector<8x128xf32>
    %25 = arith.mulf %24, %23 : vector<8x128xf32>
    %cst_16 = arith.constant 5.000000e-01 : f32
    %26 = vector.broadcast %cst_16 : f32 to vector<8x128xf32>
    %27 = arith.addf %25, %26 : vector<8x128xf32>
    %28 = vector.extract_strided_slice %19 {offsets = [0, 128], sizes = [8, 128], strides = [1, 1]} : vector<8x512xf32> to vector<8x128xf32>
    %cst_17 = arith.constant 5.000000e-01 : f32
    %29 = vector.broadcast %cst_17 : f32 to vector<8x128xf32>
    %30 = arith.mulf %29, %28 : vector<8x128xf32>
    %31 = math.tanh %30 : vector<8x128xf32>
    %cst_18 = arith.constant 5.000000e-01 : f32
    %32 = vector.broadcast %cst_18 : f32 to vector<8x128xf32>
    %33 = arith.mulf %32, %31 : vector<8x128xf32>
    %cst_19 = arith.constant 5.000000e-01 : f32
    %34 = vector.broadcast %cst_19 : f32 to vector<8x128xf32>
    %35 = arith.addf %33, %34 : vector<8x128xf32>
    %36 = vector.extract_strided_slice %19 {offsets = [0, 256], sizes = [8, 128], strides = [1, 1]} : vector<8x512xf32> to vector<8x128xf32>
    %37 = math.tanh %36 : vector<8x128xf32>
    %38 = vector.extract_strided_slice %19 {offsets = [0, 384], sizes = [8, 128], strides = [1, 1]} : vector<8x512xf32> to vector<8x128xf32>
    %cst_20 = arith.constant 5.000000e-01 : f32
    %39 = vector.broadcast %cst_20 : f32 to vector<8x128xf32>
    %40 = arith.mulf %39, %38 : vector<8x128xf32>
    %41 = math.tanh %40 : vector<8x128xf32>
    %cst_21 = arith.constant 5.000000e-01 : f32
    %42 = vector.broadcast %cst_21 : f32 to vector<8x128xf32>
    %43 = arith.mulf %42, %41 : vector<8x128xf32>
    %cst_22 = arith.constant 5.000000e-01 : f32
    %44 = vector.broadcast %cst_22 : f32 to vector<8x128xf32>
    %45 = arith.addf %43, %44 : vector<8x128xf32>
    %46 = arith.mulf %35, %15 : vector<8x128xf32>
    %47 = arith.mulf %27, %37 : vector<8x128xf32>
    %48 = arith.addf %46, %47 : vector<8x128xf32>
    %49 = math.tanh %48 : vector<8x128xf32>
    %50 = arith.mulf %45, %49 : vector<8x128xf32>
    %51 = vector.broadcast %13 : vector<8x1xf32> to vector<8x128xf32>
    %52 = arith.mulf %50, %51 : vector<8x128xf32>
    %53 = vector.broadcast %13 : vector<8x1xf32> to vector<8x128xf32>
    %54 = arith.mulf %48, %53 : vector<8x128xf32>
    %c0_23 = arith.constant 0 : index
    %c0_24 = arith.constant 0 : index
    %55 = vector.load %arg11[%c0_23, %c0_24] : memref<8x128xf32, #tpu.memory_space<vmem>>, vector<8x128xf32>
    tpu.vector_store %arg11[%c0_23, %c0_24], %52 {strides = array<i32>} : memref<8x128xf32, #tpu.memory_space<vmem>>, vector<8x128xf32>,
    %c0_25 = arith.constant 0 : index
    %c0_26 = arith.constant 0 : index
    %56 = vector.load %arg12[%c0_25, %c0_26] : memref<8x128xf32, #tpu.memory_space<vmem>>, vector<8x128xf32>
    tpu.vector_store %arg12[%c0_25, %c0_26], %54 {strides = array<i32>} : memref<8x128xf32, #tpu.memory_space<vmem>>, vector<8x128xf32>,
    %c0_27 = arith.constant 0 : index
    %c0_28 = arith.constant 0 : index
    %57 = vector.load %arg13[%c0_27, %c0_28] : memref<8x128xf32, #tpu.memory_space<vmem>>, vector<8x128xf32>
    %58 = arith.addf %57, %52 : vector<8x128xf32>
    %c0_29 = arith.constant 0 : index
    %c0_30 = arith.constant 0 : index
    %59 = vector.load %arg13[%c0_29, %c0_30] : memref<8x128xf32, #tpu.memory_space<vmem>>, vector<8x128xf32>
    tpu.vector_store %arg13[%c0_29, %c0_30], %58 {strides = array<i32>} : memref<8x128xf32, #tpu.memory_space<vmem>>, vector<8x128xf32>,
    %60 = arith.truncf %52 : vector<8x128xf32> to vector<8x128xbf16>
    %61 = arith.index_cast %c0_i32_5 : i32 to index
    %c0_31 = arith.constant 0 : index
    %c0_32 = arith.constant 0 : index
    %62 = vector.load %arg7[%61, %c0_31, %c0_32] : memref<4x8x128xbf16, #tpu.memory_space<vmem>>, vector<1x8x128xbf16>
    %63 = vector.shape_cast %62 : vector<1x8x128xbf16> to vector<8x128xbf16>
    %64 = vector.shape_cast %60 : vector<8x128xbf16> to vector<1x8x128xbf16>
    tpu.vector_store %arg7[%61, %c0_31, %c0_32], %64 {strides = array<i32>} : memref<4x8x128xbf16, #tpu.memory_space<vmem>>, vector<1x8x128xbf16>,
    %65 = arith.index_cast %7 : i32 to index
    %c0_33 = arith.constant 0 : index
    %c0_34 = arith.constant 0 : index
    %66 = vector.load %arg2[%65, %c0_33, %c0_34] : memref<4x8x512xbf16, #tpu.memory_space<vmem>>, vector<1x8x512xbf16>
    %67 = vector.shape_cast %66 : vector<1x8x512xbf16> to vector<8x512xbf16>
    %68 = arith.index_cast %7 : i32 to index
    %c0_35 = arith.constant 0 : index
    %c0_36 = arith.constant 0 : index
    %69 = vector.load %arg4[%68, %c0_35, %c0_36] : memref<4x8x1xf32, #tpu.memory_space<vmem>>, vector<1x8x1xf32>
    %70 = vector.shape_cast %69 : vector<1x8x1xf32> to vector<8x1xf32>
    %c0_37 = arith.constant 0 : index
    %c0_38 = arith.constant 0 : index
    %71 = vector.load %arg14[%c0_37, %c0_38] : memref<8x128xf32, #tpu.memory_space<vmem>>, vector<8x128xf32>
    %c0_39 = arith.constant 0 : index
    %c0_40 = arith.constant 0 : index
    %72 = vector.load %arg15[%c0_39, %c0_40] : memref<8x128xf32, #tpu.memory_space<vmem>>, vector<8x128xf32>
    %73 = arith.extf %67 : vector<8x512xbf16> to vector<8x512xf32>
    %74 = arith.truncf %71 : vector<8x128xf32> to vector<8x128xbf16>
    %cst_41 = arith.constant dense<0.000000e+00> : vector<8x512xf32>
    %75 = tpu.matmul %74, %6, %cst_41 {dimension_numbers = #tpu.dot_dimension_numbers<[1], [0], [0], [1], [0, 0, 1, 1], [], []>} : vector<8x128xbf16>, vector<128x512xbf16>, vector<8x512xf32> -> vector<8x512xf32>
    %76 = arith.addf %73, %75 : vector<8x512xf32>
    %77 = vector.extract_strided_slice %76 {offsets = [0, 0], sizes = [8, 128], strides = [1, 1]} : vector<8x512xf32> to vector<8x128xf32>
    %cst_42 = arith.constant 5.000000e-01 : f32
    %78 = vector.broadcast %cst_42 : f32 to vector<8x128xf32>
    %79 = arith.mulf %78, %77 : vector<8x128xf32>
    %80 = math.tanh %79 : vector<8x128xf32>
    %cst_43 = arith.constant 5.000000e-01 : f32
    %81 = vector.broadcast %cst_43 : f32 to vector<8x128xf32>
    %82 = arith.mulf %81, %80 : vector<8x128xf32>
    %cst_44 = arith.constant 5.000000e-01 : f32
    %83 = vector.broadcast %cst_44 : f32 to vector<8x128xf32>
    %84 = arith.addf %82, %83 : vector<8x128xf32>
    %85 = vector.extract_strided_slice %76 {offsets = [0, 128], sizes = [8, 128], strides = [1, 1]} : vector<8x512xf32> to vector<8x128xf32>
    %cst_45 = arith.constant 5.000000e-01 : f32
    %86 = vector.broadcast %cst_45 : f32 to vector<8x128xf32>
    %87 = arith.mulf %86, %85 : vector<8x128xf32>
    %88 = math.tanh %87 : vector<8x128xf32>
    %cst_46 = arith.constant 5.000000e-01 : f32
    %89 = vector.broadcast %cst_46 : f32 to vector<8x128xf32>
    %90 = arith.mulf %89, %88 : vector<8x128xf32>
    %cst_47 = arith.constant 5.000000e-01 : f32
    %91 = vector.broadcast %cst_47 : f32 to vector<8x128xf32>
    %92 = arith.addf %90, %91 : vector<8x128xf32>
    %93 = vector.extract_strided_slice %76 {offsets = [0, 256], sizes = [8, 128], strides = [1, 1]} : vector<8x512xf32> to vector<8x128xf32>
    %94 = math.tanh %93 : vector<8x128xf32>
    %95 = vector.extract_strided_slice %76 {offsets = [0, 384], sizes = [8, 128], strides = [1, 1]} : vector<8x512xf32> to vector<8x128xf32>
    %cst_48 = arith.constant 5.000000e-01 : f32
    %96 = vector.broadcast %cst_48 : f32 to vector<8x128xf32>
    %97 = arith.mulf %96, %95 : vector<8x128xf32>
    %98 = math.tanh %97 : vector<8x128xf32>
    %cst_49 = arith.constant 5.000000e-01 : f32
    %99 = vector.broadcast %cst_49 : f32 to vector<8x128xf32>
    %100 = arith.mulf %99, %98 : vector<8x128xf32>
    %cst_50 = arith.constant 5.000000e-01 : f32
    %101 = vector.broadcast %cst_50 : f32 to vector<8x128xf32>
    %102 = arith.addf %100, %101 : vector<8x128xf32>
    %103 = arith.mulf %92, %72 : vector<8x128xf32>
    %104 = arith.mulf %84, %94 : vector<8x128xf32>
    %105 = arith.addf %103, %104 : vector<8x128xf32>
    %106 = math.tanh %105 : vector<8x128xf32>
    %107 = arith.mulf %102, %106 : vector<8x128xf32>
    %108 = vector.broadcast %70 : vector<8x1xf32> to vector<8x128xf32>
    %109 = arith.mulf %107, %108 : vector<8x128xf32>
    %110 = vector.broadcast %70 : vector<8x1xf32> to vector<8x128xf32>
    %111 = arith.mulf %105, %110 : vector<8x128xf32>
    %c0_51 = arith.constant 0 : index
    %c0_52 = arith.constant 0 : index
    %112 = vector.load %arg14[%c0_51, %c0_52] : memref<8x128xf32, #tpu.memory_space<vmem>>, vector<8x128xf32>
    tpu.vector_store %arg14[%c0_51, %c0_52], %109 {strides = array<i32>} : memref<8x128xf32, #tpu.memory_space<vmem>>, vector<8x128xf32>,
    %c0_53 = arith.constant 0 : index
    %c0_54 = arith.constant 0 : index
    %113 = vector.load %arg15[%c0_53, %c0_54] : memref<8x128xf32, #tpu.memory_space<vmem>>, vector<8x128xf32>
    tpu.vector_store %arg15[%c0_53, %c0_54], %111 {strides = array<i32>} : memref<8x128xf32, #tpu.memory_space<vmem>>, vector<8x128xf32>,
    %c0_55 = arith.constant 0 : index
    %c0_56 = arith.constant 0 : index
    %114 = vector.load %arg16[%c0_55, %c0_56] : memref<8x128xf32, #tpu.memory_space<vmem>>, vector<8x128xf32>
    %115 = arith.addf %114, %109 : vector<8x128xf32>
    %c0_57 = arith.constant 0 : index
    %c0_58 = arith.constant 0 : index
    %116 = vector.load %arg16[%c0_57, %c0_58] : memref<8x128xf32, #tpu.memory_space<vmem>>, vector<8x128xf32>
    tpu.vector_store %arg16[%c0_57, %c0_58], %115 {strides = array<i32>} : memref<8x128xf32, #tpu.memory_space<vmem>>, vector<8x128xf32>,
    %117 = arith.truncf %109 : vector<8x128xf32> to vector<8x128xbf16>
    %118 = arith.index_cast %7 : i32 to index
    %c0_59 = arith.constant 0 : index
    %c0_60 = arith.constant 0 : index
    %119 = vector.load %arg8[%118, %c0_59, %c0_60] : memref<4x8x128xbf16, #tpu.memory_space<vmem>>, vector<1x8x128xbf16>
    %120 = vector.shape_cast %119 : vector<1x8x128xbf16> to vector<8x128xbf16>
    %121 = vector.shape_cast %117 : vector<8x128xbf16> to vector<1x8x128xbf16>
    tpu.vector_store %arg8[%118, %c0_59, %c0_60], %121 {strides = array<i32>} : memref<4x8x128xbf16, #tpu.memory_space<vmem>>, vector<1x8x128xbf16>,
    %c1_i32 = arith.constant 1 : i32
    %c3_i32_61 = arith.constant 3 : i32
    %122 = arith.subi %c3_i32_61, %c1_i32 : i32
    %123 = arith.index_cast %c1_i32 : i32 to index
    %c0_62 = arith.constant 0 : index
    %c0_63 = arith.constant 0 : index
    %124 = vector.load %arg1[%123, %c0_62, %c0_63] : memref<4x8x512xbf16, #tpu.memory_space<vmem>>, vector<1x8x512xbf16>
    %125 = vector.shape_cast %124 : vector<1x8x512xbf16> to vector<8x512xbf16>
    %126 = arith.index_cast %c1_i32 : i32 to index
    %c0_64 = arith.constant 0 : index
    %c0_65 = arith.constant 0 : index
    %127 = vector.load %arg3[%126, %c0_64, %c0_65] : memref<4x8x1xf32, #tpu.memory_space<vmem>>, vector<1x8x1xf32>
    %128 = vector.shape_cast %127 : vector<1x8x1xf32> to vector<8x1xf32>
    %c0_66 = arith.constant 0 : index
    %c0_67 = arith.constant 0 : index
    %129 = vector.load %arg11[%c0_66, %c0_67] : memref<8x128xf32, #tpu.memory_space<vmem>>, vector<8x128xf32>
    %c0_68 = arith.constant 0 : index
    %c0_69 = arith.constant 0 : index
    %130 = vector.load %arg12[%c0_68, %c0_69] : memref<8x128xf32, #tpu.memory_space<vmem>>, vector<8x128xf32>
    %131 = arith.extf %125 : vector<8x512xbf16> to vector<8x512xf32>
    %132 = arith.truncf %129 : vector<8x128xf32> to vector<8x128xbf16>
    %cst_70 = arith.constant dense<0.000000e+00> : vector<8x512xf32>
    %133 = tpu.matmul %132, %4, %cst_70 {dimension_numbers = #tpu.dot_dimension_numbers<[1], [0], [0], [1], [0, 0, 1, 1], [], []>} : vector<8x128xbf16>, vector<128x512xbf16>, vector<8x512xf32> -> vector<8x512xf32>
    %134 = arith.addf %131, %133 : vector<8x512xf32>
    %135 = vector.extract_strided_slice %134 {offsets = [0, 0], sizes = [8, 128], strides = [1, 1]} : vector<8x512xf32> to vector<8x128xf32>
    %cst_71 = arith.constant 5.000000e-01 : f32
    %136 = vector.broadcast %cst_71 : f32 to vector<8x128xf32>
    %137 = arith.mulf %136, %135 : vector<8x128xf32>
    %138 = math.tanh %137 : vector<8x128xf32>
    %cst_72 = arith.constant 5.000000e-01 : f32
    %139 = vector.broadcast %cst_72 : f32 to vector<8x128xf32>
    %140 = arith.mulf %139, %138 : vector<8x128xf32>
    %cst_73 = arith.constant 5.000000e-01 : f32
    %141 = vector.broadcast %cst_73 : f32 to vector<8x128xf32>
    %142 = arith.addf %140, %141 : vector<8x128xf32>
    %143 = vector.extract_strided_slice %134 {offsets = [0, 128], sizes = [8, 128], strides = [1, 1]} : vector<8x512xf32> to vector<8x128xf32>
    %cst_74 = arith.constant 5.000000e-01 : f32
    %144 = vector.broadcast %cst_74 : f32 to vector<8x128xf32>
    %145 = arith.mulf %144, %143 : vector<8x128xf32>
    %146 = math.tanh %145 : vector<8x128xf32>
    %cst_75 = arith.constant 5.000000e-01 : f32
    %147 = vector.broadcast %cst_75 : f32 to vector<8x128xf32>
    %148 = arith.mulf %147, %146 : vector<8x128xf32>
    %cst_76 = arith.constant 5.000000e-01 : f32
    %149 = vector.broadcast %cst_76 : f32 to vector<8x128xf32>
    %150 = arith.addf %148, %149 : vector<8x128xf32>
    %151 = vector.extract_strided_slice %134 {offsets = [0, 256], sizes = [8, 128], strides = [1, 1]} : vector<8x512xf32> to vector<8x128xf32>
    %152 = math.tanh %151 : vector<8x128xf32>
    %153 = vector.extract_strided_slice %134 {offsets = [0, 384], sizes = [8, 128], strides = [1, 1]} : vector<8x512xf32> to vector<8x128xf32>
    %cst_77 = arith.constant 5.000000e-01 : f32
    %154 = vector.broadcast %cst_77 : f32 to vector<8x128xf32>
    %155 = arith.mulf %154, %153 : vector<8x128xf32>
    %156 = math.tanh %155 : vector<8x128xf32>
    %cst_78 = arith.constant 5.000000e-01 : f32
    %157 = vector.broadcast %cst_78 : f32 to vector<8x128xf32>
    %158 = arith.mulf %157, %156 : vector<8x128xf32>
    %cst_79 = arith.constant 5.000000e-01 : f32
    %159 = vector.broadcast %cst_79 : f32 to vector<8x128xf32>
    %160 = arith.addf %158, %159 : vector<8x128xf32>
    %161 = arith.mulf %150, %130 : vector<8x128xf32>
    %162 = arith.mulf %142, %152 : vector<8x128xf32>
    %163 = arith.addf %161, %162 : vector<8x128xf32>
    %164 = math.tanh %163 : vector<8x128xf32>
    %165 = arith.mulf %160, %164 : vector<8x128xf32>
    %166 = vector.broadcast %128 : vector<8x1xf32> to vector<8x128xf32>
    %167 = arith.mulf %165, %166 : vector<8x128xf32>
    %168 = vector.broadcast %128 : vector<8x1xf32> to vector<8x128xf32>
    %169 = arith.mulf %163, %168 : vector<8x128xf32>
    %c0_80 = arith.constant 0 : index
    %c0_81 = arith.constant 0 : index
    %170 = vector.load %arg11[%c0_80, %c0_81] : memref<8x128xf32, #tpu.memory_space<vmem>>, vector<8x128xf32>
    tpu.vector_store %arg11[%c0_80, %c0_81], %167 {strides = array<i32>} : memref<8x128xf32, #tpu.memory_space<vmem>>, vector<8x128xf32>,
    %c0_82 = arith.constant 0 : index
    %c0_83 = arith.constant 0 : index
    %171 = vector.load %arg12[%c0_82, %c0_83] : memref<8x128xf32, #tpu.memory_space<vmem>>, vector<8x128xf32>
    tpu.vector_store %arg12[%c0_82, %c0_83], %169 {strides = array<i32>} : memref<8x128xf32, #tpu.memory_space<vmem>>, vector<8x128xf32>,
    %c0_84 = arith.constant 0 : index
    %c0_85 = arith.constant 0 : index
    %172 = vector.load %arg13[%c0_84, %c0_85] : memref<8x128xf32, #tpu.memory_space<vmem>>, vector<8x128xf32>
    %173 = arith.addf %172, %167 : vector<8x128xf32>
    %c0_86 = arith.constant 0 : index
    %c0_87 = arith.constant 0 : index
    %174 = vector.load %arg13[%c0_86, %c0_87] : memref<8x128xf32, #tpu.memory_space<vmem>>, vector<8x128xf32>
    tpu.vector_store %arg13[%c0_86, %c0_87], %173 {strides = array<i32>} : memref<8x128xf32, #tpu.memory_space<vmem>>, vector<8x128xf32>,
    %175 = arith.truncf %167 : vector<8x128xf32> to vector<8x128xbf16>
    %176 = arith.index_cast %c1_i32 : i32 to index
    %c0_88 = arith.constant 0 : index
    %c0_89 = arith.constant 0 : index
    %177 = vector.load %arg7[%176, %c0_88, %c0_89] : memref<4x8x128xbf16, #tpu.memory_space<vmem>>, vector<1x8x128xbf16>
    %178 = vector.shape_cast %177 : vector<1x8x128xbf16> to vector<8x128xbf16>
    %179 = vector.shape_cast %175 : vector<8x128xbf16> to vector<1x8x128xbf16>
    tpu.vector_store %arg7[%176, %c0_88, %c0_89], %179 {strides = array<i32>} : memref<4x8x128xbf16, #tpu.memory_space<vmem>>, vector<1x8x128xbf16>,
    %180 = arith.index_cast %122 : i32 to index
    %c0_90 = arith.constant 0 : index
    %c0_91 = arith.constant 0 : index
    %181 = vector.load %arg2[%180, %c0_90, %c0_91] : memref<4x8x512xbf16, #tpu.memory_space<vmem>>, vector<1x8x512xbf16>
    %182 = vector.shape_cast %181 : vector<1x8x512xbf16> to vector<8x512xbf16>
    %183 = arith.index_cast %122 : i32 to index
    %c0_92 = arith.constant 0 : index
    %c0_93 = arith.constant 0 : index
    %184 = vector.load %arg4[%183, %c0_92, %c0_93] : memref<4x8x1xf32, #tpu.memory_space<vmem>>, vector<1x8x1xf32>
    %185 = vector.shape_cast %184 : vector<1x8x1xf32> to vector<8x1xf32>
    %c0_94 = arith.constant 0 : index
    %c0_95 = arith.constant 0 : index
    %186 = vector.load %arg14[%c0_94, %c0_95] : memref<8x128xf32, #tpu.memory_space<vmem>>, vector<8x128xf32>
    %c0_96 = arith.constant 0 : index
    %c0_97 = arith.constant 0 : index
    %187 = vector.load %arg15[%c0_96, %c0_97] : memref<8x128xf32, #tpu.memory_space<vmem>>, vector<8x128xf32>
    %188 = arith.extf %182 : vector<8x512xbf16> to vector<8x512xf32>
    %189 = arith.truncf %186 : vector<8x128xf32> to vector<8x128xbf16>
    %cst_98 = arith.constant dense<0.000000e+00> : vector<8x512xf32>
    %190 = tpu.matmul %189, %6, %cst_98 {dimension_numbers = #tpu.dot_dimension_numbers<[1], [0], [0], [1], [0, 0, 1, 1], [], []>} : vector<8x128xbf16>, vector<128x512xbf16>, vector<8x512xf32> -> vector<8x512xf32>
    %191 = arith.addf %188, %190 : vector<8x512xf32>
    %192 = vector.extract_strided_slice %191 {offsets = [0, 0], sizes = [8, 128], strides = [1, 1]} : vector<8x512xf32> to vector<8x128xf32>
    %cst_99 = arith.constant 5.000000e-01 : f32
    %193 = vector.broadcast %cst_99 : f32 to vector<8x128xf32>
    %194 = arith.mulf %193, %192 : vector<8x128xf32>
    %195 = math.tanh %194 : vector<8x128xf32>
    %cst_100 = arith.constant 5.000000e-01 : f32
    %196 = vector.broadcast %cst_100 : f32 to vector<8x128xf32>
    %197 = arith.mulf %196, %195 : vector<8x128xf32>
    %cst_101 = arith.constant 5.000000e-01 : f32
    %198 = vector.broadcast %cst_101 : f32 to vector<8x128xf32>
    %199 = arith.addf %197, %198 : vector<8x128xf32>
    %200 = vector.extract_strided_slice %191 {offsets = [0, 128], sizes = [8, 128], strides = [1, 1]} : vector<8x512xf32> to vector<8x128xf32>
    %cst_102 = arith.constant 5.000000e-01 : f32
    %201 = vector.broadcast %cst_102 : f32 to vector<8x128xf32>
    %202 = arith.mulf %201, %200 : vector<8x128xf32>
    %203 = math.tanh %202 : vector<8x128xf32>
    %cst_103 = arith.constant 5.000000e-01 : f32
    %204 = vector.broadcast %cst_103 : f32 to vector<8x128xf32>
    %205 = arith.mulf %204, %203 : vector<8x128xf32>
    %cst_104 = arith.constant 5.000000e-01 : f32
    %206 = vector.broadcast %cst_104 : f32 to vector<8x128xf32>
    %207 = arith.addf %205, %206 : vector<8x128xf32>
    %208 = vector.extract_strided_slice %191 {offsets = [0, 256], sizes = [8, 128], strides = [1, 1]} : vector<8x512xf32> to vector<8x128xf32>
    %209 = math.tanh %208 : vector<8x128xf32>
    %210 = vector.extract_strided_slice %191 {offsets = [0, 384], sizes = [8, 128], strides = [1, 1]} : vector<8x512xf32> to vector<8x128xf32>
    %cst_105 = arith.constant 5.000000e-01 : f32
    %211 = vector.broadcast %cst_105 : f32 to vector<8x128xf32>
    %212 = arith.mulf %211, %210 : vector<8x128xf32>
    %213 = math.tanh %212 : vector<8x128xf32>
    %cst_106 = arith.constant 5.000000e-01 : f32
    %214 = vector.broadcast %cst_106 : f32 to vector<8x128xf32>
    %215 = arith.mulf %214, %213 : vector<8x128xf32>
    %cst_107 = arith.constant 5.000000e-01 : f32
    %216 = vector.broadcast %cst_107 : f32 to vector<8x128xf32>
    %217 = arith.addf %215, %216 : vector<8x128xf32>
    %218 = arith.mulf %207, %187 : vector<8x128xf32>
    %219 = arith.mulf %199, %209 : vector<8x128xf32>
    %220 = arith.addf %218, %219 : vector<8x128xf32>
    %221 = math.tanh %220 : vector<8x128xf32>
    %222 = arith.mulf %217, %221 : vector<8x128xf32>
    %223 = vector.broadcast %185 : vector<8x1xf32> to vector<8x128xf32>
    %224 = arith.mulf %222, %223 : vector<8x128xf32>
    %225 = vector.broadcast %185 : vector<8x1xf32> to vector<8x128xf32>
    %226 = arith.mulf %220, %225 : vector<8x128xf32>
    %c0_108 = arith.constant 0 : index
    %c0_109 = arith.constant 0 : index
    %227 = vector.load %arg14[%c0_108, %c0_109] : memref<8x128xf32, #tpu.memory_space<vmem>>, vector<8x128xf32>
    tpu.vector_store %arg14[%c0_108, %c0_109], %224 {strides = array<i32>} : memref<8x128xf32, #tpu.memory_space<vmem>>, vector<8x128xf32>,
    %c0_110 = arith.constant 0 : index
    %c0_111 = arith.constant 0 : index
    %228 = vector.load %arg15[%c0_110, %c0_111] : memref<8x128xf32, #tpu.memory_space<vmem>>, vector<8x128xf32>
    tpu.vector_store %arg15[%c0_110, %c0_111], %226 {strides = array<i32>} : memref<8x128xf32, #tpu.memory_space<vmem>>, vector<8x128xf32>,
    %c0_112 = arith.constant 0 : index
    %c0_113 = arith.constant 0 : index
    %229 = vector.load %arg16[%c0_112, %c0_113] : memref<8x128xf32, #tpu.memory_space<vmem>>, vector<8x128xf32>
    %230 = arith.addf %229, %224 : vector<8x128xf32>
    %c0_114 = arith.constant 0 : index
    %c0_115 = arith.constant 0 : index
    %231 = vector.load %arg16[%c0_114, %c0_115] : memref<8x128xf32, #tpu.memory_space<vmem>>, vector<8x128xf32>
    tpu.vector_store %arg16[%c0_114, %c0_115], %230 {strides = array<i32>} : memref<8x128xf32, #tpu.memory_space<vmem>>, vector<8x128xf32>,
    %232 = arith.truncf %224 : vector<8x128xf32> to vector<8x128xbf16>
    %233 = arith.index_cast %122 : i32 to index
    %c0_116 = arith.constant 0 : index
    %c0_117 = arith.constant 0 : index
    %234 = vector.load %arg8[%233, %c0_116, %c0_117] : memref<4x8x128xbf16, #tpu.memory_space<vmem>>, vector<1x8x128xbf16>
    %235 = vector.shape_cast %234 : vector<1x8x128xbf16> to vector<8x128xbf16>
    %236 = vector.shape_cast %232 : vector<8x128xbf16> to vector<1x8x128xbf16>
    tpu.vector_store %arg8[%233, %c0_116, %c0_117], %236 {strides = array<i32>} : memref<4x8x128xbf16, #tpu.memory_space<vmem>>, vector<1x8x128xbf16>,
    %c2_i32 = arith.constant 2 : i32
    %c3_i32_118 = arith.constant 3 : i32
    %237 = arith.subi %c3_i32_118, %c2_i32 : i32
    %238 = arith.index_cast %c2_i32 : i32 to index
    %c0_119 = arith.constant 0 : index
    %c0_120 = arith.constant 0 : index
    %239 = vector.load %arg1[%238, %c0_119, %c0_120] : memref<4x8x512xbf16, #tpu.memory_space<vmem>>, vector<1x8x512xbf16>
    %240 = vector.shape_cast %239 : vector<1x8x512xbf16> to vector<8x512xbf16>
    %241 = arith.index_cast %c2_i32 : i32 to index
    %c0_121 = arith.constant 0 : index
    %c0_122 = arith.constant 0 : index
    %242 = vector.load %arg3[%241, %c0_121, %c0_122] : memref<4x8x1xf32, #tpu.memory_space<vmem>>, vector<1x8x1xf32>
    %243 = vector.shape_cast %242 : vector<1x8x1xf32> to vector<8x1xf32>
    %c0_123 = arith.constant 0 : index
    %c0_124 = arith.constant 0 : index
    %244 = vector.load %arg11[%c0_123, %c0_124] : memref<8x128xf32, #tpu.memory_space<vmem>>, vector<8x128xf32>
    %c0_125 = arith.constant 0 : index
    %c0_126 = arith.constant 0 : index
    %245 = vector.load %arg12[%c0_125, %c0_126] : memref<8x128xf32, #tpu.memory_space<vmem>>, vector<8x128xf32>
    %246 = arith.extf %240 : vector<8x512xbf16> to vector<8x512xf32>
    %247 = arith.truncf %244 : vector<8x128xf32> to vector<8x128xbf16>
    %cst_127 = arith.constant dense<0.000000e+00> : vector<8x512xf32>
    %248 = tpu.matmul %247, %4, %cst_127 {dimension_numbers = #tpu.dot_dimension_numbers<[1], [0], [0], [1], [0, 0, 1, 1], [], []>} : vector<8x128xbf16>, vector<128x512xbf16>, vector<8x512xf32> -> vector<8x512xf32>
    %249 = arith.addf %246, %248 : vector<8x512xf32>
    %250 = vector.extract_strided_slice %249 {offsets = [0, 0], sizes = [8, 128], strides = [1, 1]} : vector<8x512xf32> to vector<8x128xf32>
    %cst_128 = arith.constant 5.000000e-01 : f32
    %251 = vector.broadcast %cst_128 : f32 to vector<8x128xf32>
    %252 = arith.mulf %251, %250 : vector<8x128xf32>
    %253 = math.tanh %252 : vector<8x128xf32>
    %cst_129 = arith.constant 5.000000e-01 : f32
    %254 = vector.broadcast %cst_129 : f32 to vector<8x128xf32>
    %255 = arith.mulf %254, %253 : vector<8x128xf32>
    %cst_130 = arith.constant 5.000000e-01 : f32
    %256 = vector.broadcast %cst_130 : f32 to vector<8x128xf32>
    %257 = arith.addf %255, %256 : vector<8x128xf32>
    %258 = vector.extract_strided_slice %249 {offsets = [0, 128], sizes = [8, 128], strides = [1, 1]} : vector<8x512xf32> to vector<8x128xf32>
    %cst_131 = arith.constant 5.000000e-01 : f32
    %259 = vector.broadcast %cst_131 : f32 to vector<8x128xf32>
    %260 = arith.mulf %259, %258 : vector<8x128xf32>
    %261 = math.tanh %260 : vector<8x128xf32>
    %cst_132 = arith.constant 5.000000e-01 : f32
    %262 = vector.broadcast %cst_132 : f32 to vector<8x128xf32>
    %263 = arith.mulf %262, %261 : vector<8x128xf32>
    %cst_133 = arith.constant 5.000000e-01 : f32
    %264 = vector.broadcast %cst_133 : f32 to vector<8x128xf32>
    %265 = arith.addf %263, %264 : vector<8x128xf32>
    %266 = vector.extract_strided_slice %249 {offsets = [0, 256], sizes = [8, 128], strides = [1, 1]} : vector<8x512xf32> to vector<8x128xf32>
    %267 = math.tanh %266 : vector<8x128xf32>
    %268 = vector.extract_strided_slice %249 {offsets = [0, 384], sizes = [8, 128], strides = [1, 1]} : vector<8x512xf32> to vector<8x128xf32>
    %cst_134 = arith.constant 5.000000e-01 : f32
    %269 = vector.broadcast %cst_134 : f32 to vector<8x128xf32>
    %270 = arith.mulf %269, %268 : vector<8x128xf32>
    %271 = math.tanh %270 : vector<8x128xf32>
    %cst_135 = arith.constant 5.000000e-01 : f32
    %272 = vector.broadcast %cst_135 : f32 to vector<8x128xf32>
    %273 = arith.mulf %272, %271 : vector<8x128xf32>
    %cst_136 = arith.constant 5.000000e-01 : f32
    %274 = vector.broadcast %cst_136 : f32 to vector<8x128xf32>
    %275 = arith.addf %273, %274 : vector<8x128xf32>
    %276 = arith.mulf %265, %245 : vector<8x128xf32>
    %277 = arith.mulf %257, %267 : vector<8x128xf32>
    %278 = arith.addf %276, %277 : vector<8x128xf32>
    %279 = math.tanh %278 : vector<8x128xf32>
    %280 = arith.mulf %275, %279 : vector<8x128xf32>
    %281 = vector.broadcast %243 : vector<8x1xf32> to vector<8x128xf32>
    %282 = arith.mulf %280, %281 : vector<8x128xf32>
    %283 = vector.broadcast %243 : vector<8x1xf32> to vector<8x128xf32>
    %284 = arith.mulf %278, %283 : vector<8x128xf32>
    %c0_137 = arith.constant 0 : index
    %c0_138 = arith.constant 0 : index
    %285 = vector.load %arg11[%c0_137, %c0_138] : memref<8x128xf32, #tpu.memory_space<vmem>>, vector<8x128xf32>
    tpu.vector_store %arg11[%c0_137, %c0_138], %282 {strides = array<i32>} : memref<8x128xf32, #tpu.memory_space<vmem>>, vector<8x128xf32>,
    %c0_139 = arith.constant 0 : index
    %c0_140 = arith.constant 0 : index
    %286 = vector.load %arg12[%c0_139, %c0_140] : memref<8x128xf32, #tpu.memory_space<vmem>>, vector<8x128xf32>
    tpu.vector_store %arg12[%c0_139, %c0_140], %284 {strides = array<i32>} : memref<8x128xf32, #tpu.memory_space<vmem>>, vector<8x128xf32>,
    %c0_141 = arith.constant 0 : index
    %c0_142 = arith.constant 0 : index
    %287 = vector.load %arg13[%c0_141, %c0_142] : memref<8x128xf32, #tpu.memory_space<vmem>>, vector<8x128xf32>
    %288 = arith.addf %287, %282 : vector<8x128xf32>
    %c0_143 = arith.constant 0 : index
    %c0_144 = arith.constant 0 : index
    %289 = vector.load %arg13[%c0_143, %c0_144] : memref<8x128xf32, #tpu.memory_space<vmem>>, vector<8x128xf32>
    tpu.vector_store %arg13[%c0_143, %c0_144], %288 {strides = array<i32>} : memref<8x128xf32, #tpu.memory_space<vmem>>, vector<8x128xf32>,
    %290 = arith.truncf %282 : vector<8x128xf32> to vector<8x128xbf16>
    %291 = arith.index_cast %c2_i32 : i32 to index
    %c0_145 = arith.constant 0 : index
    %c0_146 = arith.constant 0 : index
    %292 = vector.load %arg7[%291, %c0_145, %c0_146] : memref<4x8x128xbf16, #tpu.memory_space<vmem>>, vector<1x8x128xbf16>
    %293 = vector.shape_cast %292 : vector<1x8x128xbf16> to vector<8x128xbf16>
    %294 = vector.shape_cast %290 : vector<8x128xbf16> to vector<1x8x128xbf16>
    tpu.vector_store %arg7[%291, %c0_145, %c0_146], %294 {strides = array<i32>} : memref<4x8x128xbf16, #tpu.memory_space<vmem>>, vector<1x8x128xbf16>,
    %295 = arith.index_cast %237 : i32 to index
    %c0_147 = arith.constant 0 : index
    %c0_148 = arith.constant 0 : index
    %296 = vector.load %arg2[%295, %c0_147, %c0_148] : memref<4x8x512xbf16, #tpu.memory_space<vmem>>, vector<1x8x512xbf16>
    %297 = vector.shape_cast %296 : vector<1x8x512xbf16> to vector<8x512xbf16>
    %298 = arith.index_cast %237 : i32 to index
    %c0_149 = arith.constant 0 : index
    %c0_150 = arith.constant 0 : index
    %299 = vector.load %arg4[%298, %c0_149, %c0_150] : memref<4x8x1xf32, #tpu.memory_space<vmem>>, vector<1x8x1xf32>
    %300 = vector.shape_cast %299 : vector<1x8x1xf32> to vector<8x1xf32>
    %c0_151 = arith.constant 0 : index
    %c0_152 = arith.constant 0 : index
    %301 = vector.load %arg14[%c0_151, %c0_152] : memref<8x128xf32, #tpu.memory_space<vmem>>, vector<8x128xf32>
    %c0_153 = arith.constant 0 : index
    %c0_154 = arith.constant 0 : index
    %302 = vector.load %arg15[%c0_153, %c0_154] : memref<8x128xf32, #tpu.memory_space<vmem>>, vector<8x128xf32>
    %303 = arith.extf %297 : vector<8x512xbf16> to vector<8x512xf32>
    %304 = arith.truncf %301 : vector<8x128xf32> to vector<8x128xbf16>
    %cst_155 = arith.constant dense<0.000000e+00> : vector<8x512xf32>
    %305 = tpu.matmul %304, %6, %cst_155 {dimension_numbers = #tpu.dot_dimension_numbers<[1], [0], [0], [1], [0, 0, 1, 1], [], []>} : vector<8x128xbf16>, vector<128x512xbf16>, vector<8x512xf32> -> vector<8x512xf32>
    %306 = arith.addf %303, %305 : vector<8x512xf32>
    %307 = vector.extract_strided_slice %306 {offsets = [0, 0], sizes = [8, 128], strides = [1, 1]} : vector<8x512xf32> to vector<8x128xf32>
    %cst_156 = arith.constant 5.000000e-01 : f32
    %308 = vector.broadcast %cst_156 : f32 to vector<8x128xf32>
    %309 = arith.mulf %308, %307 : vector<8x128xf32>
    %310 = math.tanh %309 : vector<8x128xf32>
    %cst_157 = arith.constant 5.000000e-01 : f32
    %311 = vector.broadcast %cst_157 : f32 to vector<8x128xf32>
    %312 = arith.mulf %311, %310 : vector<8x128xf32>
    %cst_158 = arith.constant 5.000000e-01 : f32
    %313 = vector.broadcast %cst_158 : f32 to vector<8x128xf32>
    %314 = arith.addf %312, %313 : vector<8x128xf32>
    %315 = vector.extract_strided_slice %306 {offsets = [0, 128], sizes = [8, 128], strides = [1, 1]} : vector<8x512xf32> to vector<8x128xf32>
    %cst_159 = arith.constant 5.000000e-01 : f32
    %316 = vector.broadcast %cst_159 : f32 to vector<8x128xf32>
    %317 = arith.mulf %316, %315 : vector<8x128xf32>
    %318 = math.tanh %317 : vector<8x128xf32>
    %cst_160 = arith.constant 5.000000e-01 : f32
    %319 = vector.broadcast %cst_160 : f32 to vector<8x128xf32>
    %320 = arith.mulf %319, %318 : vector<8x128xf32>
    %cst_161 = arith.constant 5.000000e-01 : f32
    %321 = vector.broadcast %cst_161 : f32 to vector<8x128xf32>
    %322 = arith.addf %320, %321 : vector<8x128xf32>
    %323 = vector.extract_strided_slice %306 {offsets = [0, 256], sizes = [8, 128], strides = [1, 1]} : vector<8x512xf32> to vector<8x128xf32>
    %324 = math.tanh %323 : vector<8x128xf32>
    %325 = vector.extract_strided_slice %306 {offsets = [0, 384], sizes = [8, 128], strides = [1, 1]} : vector<8x512xf32> to vector<8x128xf32>
    %cst_162 = arith.constant 5.000000e-01 : f32
    %326 = vector.broadcast %cst_162 : f32 to vector<8x128xf32>
    %327 = arith.mulf %326, %325 : vector<8x128xf32>
    %328 = math.tanh %327 : vector<8x128xf32>
    %cst_163 = arith.constant 5.000000e-01 : f32
    %329 = vector.broadcast %cst_163 : f32 to vector<8x128xf32>
    %330 = arith.mulf %329, %328 : vector<8x128xf32>
    %cst_164 = arith.constant 5.000000e-01 : f32
    %331 = vector.broadcast %cst_164 : f32 to vector<8x128xf32>
    %332 = arith.addf %330, %331 : vector<8x128xf32>
    %333 = arith.mulf %322, %302 : vector<8x128xf32>
    %334 = arith.mulf %314, %324 : vector<8x128xf32>
    %335 = arith.addf %333, %334 : vector<8x128xf32>
    %336 = math.tanh %335 : vector<8x128xf32>
    %337 = arith.mulf %332, %336 : vector<8x128xf32>
    %338 = vector.broadcast %300 : vector<8x1xf32> to vector<8x128xf32>
    %339 = arith.mulf %337, %338 : vector<8x128xf32>
    %340 = vector.broadcast %300 : vector<8x1xf32> to vector<8x128xf32>
    %341 = arith.mulf %335, %340 : vector<8x128xf32>
    %c0_165 = arith.constant 0 : index
    %c0_166 = arith.constant 0 : index
    %342 = vector.load %arg14[%c0_165, %c0_166] : memref<8x128xf32, #tpu.memory_space<vmem>>, vector<8x128xf32>
    tpu.vector_store %arg14[%c0_165, %c0_166], %339 {strides = array<i32>} : memref<8x128xf32, #tpu.memory_space<vmem>>, vector<8x128xf32>,
    %c0_167 = arith.constant 0 : index
    %c0_168 = arith.constant 0 : index
    %343 = vector.load %arg15[%c0_167, %c0_168] : memref<8x128xf32, #tpu.memory_space<vmem>>, vector<8x128xf32>
    tpu.vector_store %arg15[%c0_167, %c0_168], %341 {strides = array<i32>} : memref<8x128xf32, #tpu.memory_space<vmem>>, vector<8x128xf32>,
    %c0_169 = arith.constant 0 : index
    %c0_170 = arith.constant 0 : index
    %344 = vector.load %arg16[%c0_169, %c0_170] : memref<8x128xf32, #tpu.memory_space<vmem>>, vector<8x128xf32>
    %345 = arith.addf %344, %339 : vector<8x128xf32>
    %c0_171 = arith.constant 0 : index
    %c0_172 = arith.constant 0 : index
    %346 = vector.load %arg16[%c0_171, %c0_172] : memref<8x128xf32, #tpu.memory_space<vmem>>, vector<8x128xf32>
    tpu.vector_store %arg16[%c0_171, %c0_172], %345 {strides = array<i32>} : memref<8x128xf32, #tpu.memory_space<vmem>>, vector<8x128xf32>,
    %347 = arith.truncf %339 : vector<8x128xf32> to vector<8x128xbf16>
    %348 = arith.index_cast %237 : i32 to index
    %c0_173 = arith.constant 0 : index
    %c0_174 = arith.constant 0 : index
    %349 = vector.load %arg8[%348, %c0_173, %c0_174] : memref<4x8x128xbf16, #tpu.memory_space<vmem>>, vector<1x8x128xbf16>
    %350 = vector.shape_cast %349 : vector<1x8x128xbf16> to vector<8x128xbf16>
    %351 = vector.shape_cast %347 : vector<8x128xbf16> to vector<1x8x128xbf16>
    tpu.vector_store %arg8[%348, %c0_173, %c0_174], %351 {strides = array<i32>} : memref<4x8x128xbf16, #tpu.memory_space<vmem>>, vector<1x8x128xbf16>,
    %c3_i32_175 = arith.constant 3 : i32
    %c3_i32_176 = arith.constant 3 : i32
    %352 = arith.subi %c3_i32_176, %c3_i32_175 : i32
    %353 = arith.index_cast %c3_i32_175 : i32 to index
    %c0_177 = arith.constant 0 : index
    %c0_178 = arith.constant 0 : index
    %354 = vector.load %arg1[%353, %c0_177, %c0_178] : memref<4x8x512xbf16, #tpu.memory_space<vmem>>, vector<1x8x512xbf16>
    %355 = vector.shape_cast %354 : vector<1x8x512xbf16> to vector<8x512xbf16>
    %356 = arith.index_cast %c3_i32_175 : i32 to index
    %c0_179 = arith.constant 0 : index
    %c0_180 = arith.constant 0 : index
    %357 = vector.load %arg3[%356, %c0_179, %c0_180] : memref<4x8x1xf32, #tpu.memory_space<vmem>>, vector<1x8x1xf32>
    %358 = vector.shape_cast %357 : vector<1x8x1xf32> to vector<8x1xf32>
    %c0_181 = arith.constant 0 : index
    %c0_182 = arith.constant 0 : index
    %359 = vector.load %arg11[%c0_181, %c0_182] : memref<8x128xf32, #tpu.memory_space<vmem>>, vector<8x128xf32>
    %c0_183 = arith.constant 0 : index
    %c0_184 = arith.constant 0 : index
    %360 = vector.load %arg12[%c0_183, %c0_184] : memref<8x128xf32, #tpu.memory_space<vmem>>, vector<8x128xf32>
    %361 = arith.extf %355 : vector<8x512xbf16> to vector<8x512xf32>
    %362 = arith.truncf %359 : vector<8x128xf32> to vector<8x128xbf16>
    %cst_185 = arith.constant dense<0.000000e+00> : vector<8x512xf32>
    %363 = tpu.matmul %362, %4, %cst_185 {dimension_numbers = #tpu.dot_dimension_numbers<[1], [0], [0], [1], [0, 0, 1, 1], [], []>} : vector<8x128xbf16>, vector<128x512xbf16>, vector<8x512xf32> -> vector<8x512xf32>
    %364 = arith.addf %361, %363 : vector<8x512xf32>
    %365 = vector.extract_strided_slice %364 {offsets = [0, 0], sizes = [8, 128], strides = [1, 1]} : vector<8x512xf32> to vector<8x128xf32>
    %cst_186 = arith.constant 5.000000e-01 : f32
    %366 = vector.broadcast %cst_186 : f32 to vector<8x128xf32>
    %367 = arith.mulf %366, %365 : vector<8x128xf32>
    %368 = math.tanh %367 : vector<8x128xf32>
    %cst_187 = arith.constant 5.000000e-01 : f32
    %369 = vector.broadcast %cst_187 : f32 to vector<8x128xf32>
    %370 = arith.mulf %369, %368 : vector<8x128xf32>
    %cst_188 = arith.constant 5.000000e-01 : f32
    %371 = vector.broadcast %cst_188 : f32 to vector<8x128xf32>
    %372 = arith.addf %370, %371 : vector<8x128xf32>
    %373 = vector.extract_strided_slice %364 {offsets = [0, 128], sizes = [8, 128], strides = [1, 1]} : vector<8x512xf32> to vector<8x128xf32>
    %cst_189 = arith.constant 5.000000e-01 : f32
    %374 = vector.broadcast %cst_189 : f32 to vector<8x128xf32>
    %375 = arith.mulf %374, %373 : vector<8x128xf32>
    %376 = math.tanh %375 : vector<8x128xf32>
    %cst_190 = arith.constant 5.000000e-01 : f32
    %377 = vector.broadcast %cst_190 : f32 to vector<8x128xf32>
    %378 = arith.mulf %377, %376 : vector<8x128xf32>
    %cst_191 = arith.constant 5.000000e-01 : f32
    %379 = vector.broadcast %cst_191 : f32 to vector<8x128xf32>
    %380 = arith.addf %378, %379 : vector<8x128xf32>
    %381 = vector.extract_strided_slice %364 {offsets = [0, 256], sizes = [8, 128], strides = [1, 1]} : vector<8x512xf32> to vector<8x128xf32>
    %382 = math.tanh %381 : vector<8x128xf32>
    %383 = vector.extract_strided_slice %364 {offsets = [0, 384], sizes = [8, 128], strides = [1, 1]} : vector<8x512xf32> to vector<8x128xf32>
    %cst_192 = arith.constant 5.000000e-01 : f32
    %384 = vector.broadcast %cst_192 : f32 to vector<8x128xf32>
    %385 = arith.mulf %384, %383 : vector<8x128xf32>
    %386 = math.tanh %385 : vector<8x128xf32>
    %cst_193 = arith.constant 5.000000e-01 : f32
    %387 = vector.broadcast %cst_193 : f32 to vector<8x128xf32>
    %388 = arith.mulf %387, %386 : vector<8x128xf32>
    %cst_194 = arith.constant 5.000000e-01 : f32
    %389 = vector.broadcast %cst_194 : f32 to vector<8x128xf32>
    %390 = arith.addf %388, %389 : vector<8x128xf32>
    %391 = arith.mulf %380, %360 : vector<8x128xf32>
    %392 = arith.mulf %372, %382 : vector<8x128xf32>
    %393 = arith.addf %391, %392 : vector<8x128xf32>
    %394 = math.tanh %393 : vector<8x128xf32>
    %395 = arith.mulf %390, %394 : vector<8x128xf32>
    %396 = vector.broadcast %358 : vector<8x1xf32> to vector<8x128xf32>
    %397 = arith.mulf %395, %396 : vector<8x128xf32>
    %398 = vector.broadcast %358 : vector<8x1xf32> to vector<8x128xf32>
    %399 = arith.mulf %393, %398 : vector<8x128xf32>
    %c0_195 = arith.constant 0 : index
    %c0_196 = arith.constant 0 : index
    %400 = vector.load %arg11[%c0_195, %c0_196] : memref<8x128xf32, #tpu.memory_space<vmem>>, vector<8x128xf32>
    tpu.vector_store %arg11[%c0_195, %c0_196], %397 {strides = array<i32>} : memref<8x128xf32, #tpu.memory_space<vmem>>, vector<8x128xf32>,
    %c0_197 = arith.constant 0 : index
    %c0_198 = arith.constant 0 : index
    %401 = vector.load %arg12[%c0_197, %c0_198] : memref<8x128xf32, #tpu.memory_space<vmem>>, vector<8x128xf32>
    tpu.vector_store %arg12[%c0_197, %c0_198], %399 {strides = array<i32>} : memref<8x128xf32, #tpu.memory_space<vmem>>, vector<8x128xf32>,
    %c0_199 = arith.constant 0 : index
    %c0_200 = arith.constant 0 : index
    %402 = vector.load %arg13[%c0_199, %c0_200] : memref<8x128xf32, #tpu.memory_space<vmem>>, vector<8x128xf32>
    %403 = arith.addf %402, %397 : vector<8x128xf32>
    %c0_201 = arith.constant 0 : index
    %c0_202 = arith.constant 0 : index
    %404 = vector.load %arg13[%c0_201, %c0_202] : memref<8x128xf32, #tpu.memory_space<vmem>>, vector<8x128xf32>
    tpu.vector_store %arg13[%c0_201, %c0_202], %403 {strides = array<i32>} : memref<8x128xf32, #tpu.memory_space<vmem>>, vector<8x128xf32>,
    %405 = arith.truncf %397 : vector<8x128xf32> to vector<8x128xbf16>
    %406 = arith.index_cast %c3_i32_175 : i32 to index
    %c0_203 = arith.constant 0 : index
    %c0_204 = arith.constant 0 : index
    %407 = vector.load %arg7[%406, %c0_203, %c0_204] : memref<4x8x128xbf16, #tpu.memory_space<vmem>>, vector<1x8x128xbf16>
    %408 = vector.shape_cast %407 : vector<1x8x128xbf16> to vector<8x128xbf16>
    %409 = vector.shape_cast %405 : vector<8x128xbf16> to vector<1x8x128xbf16>
    tpu.vector_store %arg7[%406, %c0_203, %c0_204], %409 {strides = array<i32>} : memref<4x8x128xbf16, #tpu.memory_space<vmem>>, vector<1x8x128xbf16>,
    %410 = arith.index_cast %352 : i32 to index
    %c0_205 = arith.constant 0 : index
    %c0_206 = arith.constant 0 : index
    %411 = vector.load %arg2[%410, %c0_205, %c0_206] : memref<4x8x512xbf16, #tpu.memory_space<vmem>>, vector<1x8x512xbf16>
    %412 = vector.shape_cast %411 : vector<1x8x512xbf16> to vector<8x512xbf16>
    %413 = arith.index_cast %352 : i32 to index
    %c0_207 = arith.constant 0 : index
    %c0_208 = arith.constant 0 : index
    %414 = vector.load %arg4[%413, %c0_207, %c0_208] : memref<4x8x1xf32, #tpu.memory_space<vmem>>, vector<1x8x1xf32>
    %415 = vector.shape_cast %414 : vector<1x8x1xf32> to vector<8x1xf32>
    %c0_209 = arith.constant 0 : index
    %c0_210 = arith.constant 0 : index
    %416 = vector.load %arg14[%c0_209, %c0_210] : memref<8x128xf32, #tpu.memory_space<vmem>>, vector<8x128xf32>
    %c0_211 = arith.constant 0 : index
    %c0_212 = arith.constant 0 : index
    %417 = vector.load %arg15[%c0_211, %c0_212] : memref<8x128xf32, #tpu.memory_space<vmem>>, vector<8x128xf32>
    %418 = arith.extf %412 : vector<8x512xbf16> to vector<8x512xf32>
    %419 = arith.truncf %416 : vector<8x128xf32> to vector<8x128xbf16>
    %cst_213 = arith.constant dense<0.000000e+00> : vector<8x512xf32>
    %420 = tpu.matmul %419, %6, %cst_213 {dimension_numbers = #tpu.dot_dimension_numbers<[1], [0], [0], [1], [0, 0, 1, 1], [], []>} : vector<8x128xbf16>, vector<128x512xbf16>, vector<8x512xf32> -> vector<8x512xf32>
    %421 = arith.addf %418, %420 : vector<8x512xf32>
    %422 = vector.extract_strided_slice %421 {offsets = [0, 0], sizes = [8, 128], strides = [1, 1]} : vector<8x512xf32> to vector<8x128xf32>
    %cst_214 = arith.constant 5.000000e-01 : f32
    %423 = vector.broadcast %cst_214 : f32 to vector<8x128xf32>
    %424 = arith.mulf %423, %422 : vector<8x128xf32>
    %425 = math.tanh %424 : vector<8x128xf32>
    %cst_215 = arith.constant 5.000000e-01 : f32
    %426 = vector.broadcast %cst_215 : f32 to vector<8x128xf32>
    %427 = arith.mulf %426, %425 : vector<8x128xf32>
    %cst_216 = arith.constant 5.000000e-01 : f32
    %428 = vector.broadcast %cst_216 : f32 to vector<8x128xf32>
    %429 = arith.addf %427, %428 : vector<8x128xf32>
    %430 = vector.extract_strided_slice %421 {offsets = [0, 128], sizes = [8, 128], strides = [1, 1]} : vector<8x512xf32> to vector<8x128xf32>
    %cst_217 = arith.constant 5.000000e-01 : f32
    %431 = vector.broadcast %cst_217 : f32 to vector<8x128xf32>
    %432 = arith.mulf %431, %430 : vector<8x128xf32>
    %433 = math.tanh %432 : vector<8x128xf32>
    %cst_218 = arith.constant 5.000000e-01 : f32
    %434 = vector.broadcast %cst_218 : f32 to vector<8x128xf32>
    %435 = arith.mulf %434, %433 : vector<8x128xf32>
    %cst_219 = arith.constant 5.000000e-01 : f32
    %436 = vector.broadcast %cst_219 : f32 to vector<8x128xf32>
    %437 = arith.addf %435, %436 : vector<8x128xf32>
    %438 = vector.extract_strided_slice %421 {offsets = [0, 256], sizes = [8, 128], strides = [1, 1]} : vector<8x512xf32> to vector<8x128xf32>
    %439 = math.tanh %438 : vector<8x128xf32>
    %440 = vector.extract_strided_slice %421 {offsets = [0, 384], sizes = [8, 128], strides = [1, 1]} : vector<8x512xf32> to vector<8x128xf32>
    %cst_220 = arith.constant 5.000000e-01 : f32
    %441 = vector.broadcast %cst_220 : f32 to vector<8x128xf32>
    %442 = arith.mulf %441, %440 : vector<8x128xf32>
    %443 = math.tanh %442 : vector<8x128xf32>
    %cst_221 = arith.constant 5.000000e-01 : f32
    %444 = vector.broadcast %cst_221 : f32 to vector<8x128xf32>
    %445 = arith.mulf %444, %443 : vector<8x128xf32>
    %cst_222 = arith.constant 5.000000e-01 : f32
    %446 = vector.broadcast %cst_222 : f32 to vector<8x128xf32>
    %447 = arith.addf %445, %446 : vector<8x128xf32>
    %448 = arith.mulf %437, %417 : vector<8x128xf32>
    %449 = arith.mulf %429, %439 : vector<8x128xf32>
    %450 = arith.addf %448, %449 : vector<8x128xf32>
    %451 = math.tanh %450 : vector<8x128xf32>
    %452 = arith.mulf %447, %451 : vector<8x128xf32>
    %453 = vector.broadcast %415 : vector<8x1xf32> to vector<8x128xf32>
    %454 = arith.mulf %452, %453 : vector<8x128xf32>
    %455 = vector.broadcast %415 : vector<8x1xf32> to vector<8x128xf32>
    %456 = arith.mulf %450, %455 : vector<8x128xf32>
    %c0_223 = arith.constant 0 : index
    %c0_224 = arith.constant 0 : index
    %457 = vector.load %arg14[%c0_223, %c0_224] : memref<8x128xf32, #tpu.memory_space<vmem>>, vector<8x128xf32>
    tpu.vector_store %arg14[%c0_223, %c0_224], %454 {strides = array<i32>} : memref<8x128xf32, #tpu.memory_space<vmem>>, vector<8x128xf32>,
    %c0_225 = arith.constant 0 : index
    %c0_226 = arith.constant 0 : index
    %458 = vector.load %arg15[%c0_225, %c0_226] : memref<8x128xf32, #tpu.memory_space<vmem>>, vector<8x128xf32>
    tpu.vector_store %arg15[%c0_225, %c0_226], %456 {strides = array<i32>} : memref<8x128xf32, #tpu.memory_space<vmem>>, vector<8x128xf32>,
    %c0_227 = arith.constant 0 : index
    %c0_228 = arith.constant 0 : index
    %459 = vector.load %arg16[%c0_227, %c0_228] : memref<8x128xf32, #tpu.memory_space<vmem>>, vector<8x128xf32>
    %460 = arith.addf %459, %454 : vector<8x128xf32>
    %c0_229 = arith.constant 0 : index
    %c0_230 = arith.constant 0 : index
    %461 = vector.load %arg16[%c0_229, %c0_230] : memref<8x128xf32, #tpu.memory_space<vmem>>, vector<8x128xf32>
    tpu.vector_store %arg16[%c0_229, %c0_230], %460 {strides = array<i32>} : memref<8x128xf32, #tpu.memory_space<vmem>>, vector<8x128xf32>,
    %462 = arith.truncf %454 : vector<8x128xf32> to vector<8x128xbf16>
    %463 = arith.index_cast %352 : i32 to index
    %c0_231 = arith.constant 0 : index
    %c0_232 = arith.constant 0 : index
    %464 = vector.load %arg8[%463, %c0_231, %c0_232] : memref<4x8x128xbf16, #tpu.memory_space<vmem>>, vector<1x8x128xbf16>
    %465 = vector.shape_cast %464 : vector<1x8x128xbf16> to vector<8x128xbf16>
    %466 = vector.shape_cast %462 : vector<8x128xbf16> to vector<1x8x128xbf16>
    tpu.vector_store %arg8[%463, %c0_231, %c0_232], %466 {strides = array<i32>} : memref<4x8x128xbf16, #tpu.memory_space<vmem>>, vector<1x8x128xbf16>,
    %c4_i32 = arith.constant 4 : i32
    %c1_i32_233 = arith.constant 1 : i32
    %467 = arith.cmpi eq, %arg0, %c1_i32_233 : i32
    %468 = arith.extui %467 : i1 to i32
    %c0_i32_234 = arith.constant 0 : i32
    %469 = arith.cmpi ne, %468, %c0_i32_234 : i32
    scf.if %469 {
      %c0_235 = arith.constant 0 : index
      %c0_236 = arith.constant 0 : index
      %470 = vector.load %arg5[%c0_235, %c0_236] : memref<8x1xf32, #tpu.memory_space<vmem>>, vector<8x1xf32>
      %c0_237 = arith.constant 0 : index
      %c0_238 = arith.constant 0 : index
      %471 = vector.load %arg13[%c0_237, %c0_238] : memref<8x128xf32, #tpu.memory_space<vmem>>, vector<8x128xf32>
      %472 = vector.broadcast %470 : vector<8x1xf32> to vector<8x128xf32>
      %473 = arith.mulf %471, %472 : vector<8x128xf32>
      %c0_239 = arith.constant 0 : index
      %c0_240 = arith.constant 0 : index
      %474 = vector.load %arg9[%c0_239, %c0_240] : memref<8x128xf32, #tpu.memory_space<vmem>>, vector<8x128xf32>
      tpu.vector_store %arg9[%c0_239, %c0_240], %473 {strides = array<i32>} : memref<8x128xf32, #tpu.memory_space<vmem>>, vector<8x128xf32>,
      %c0_241 = arith.constant 0 : index
      %c0_242 = arith.constant 0 : index
      %475 = vector.load %arg16[%c0_241, %c0_242] : memref<8x128xf32, #tpu.memory_space<vmem>>, vector<8x128xf32>
      %476 = vector.broadcast %470 : vector<8x1xf32> to vector<8x128xf32>
      %477 = arith.mulf %475, %476 : vector<8x128xf32>
      %c0_243 = arith.constant 0 : index
      %c0_244 = arith.constant 0 : index
      %478 = vector.load %arg10[%c0_243, %c0_244] : memref<8x128xf32, #tpu.memory_space<vmem>>, vector<8x128xf32>
      tpu.vector_store %arg10[%c0_243, %c0_244], %477 {strides = array<i32>} : memref<8x128xf32, #tpu.memory_space<vmem>>, vector<8x128xf32>,
    } else {
    }
    return
  }
  func.func @transform_0(%arg0: i32) -> (i32, i32, i32) {
    %c0_i32 = arith.constant 0 : i32
    %c0_i32_0 = arith.constant 0 : i32
    %c0_i32_1 = arith.constant 0 : i32
    return %arg0, %c0_i32, %c0_i32_0 : i32, i32, i32
  }
  func.func @transform_1(%arg0: i32) -> (i32, i32, i32) {
    %c1_i32 = arith.constant 1 : i32
    %0 = arith.subi %c1_i32, %arg0 : i32
    %c0_i32 = arith.constant 0 : i32
    %c0_i32_0 = arith.constant 0 : i32
    %c0_i32_1 = arith.constant 0 : i32
    return %0, %c0_i32, %c0_i32_0 : i32, i32, i32
  }
  func.func @transform_2(%arg0: i32) -> (i32, i32, i32) {
    %c0_i32 = arith.constant 0 : i32
    %c0_i32_0 = arith.constant 0 : i32
    %c0_i32_1 = arith.constant 0 : i32
    return %arg0, %c0_i32, %c0_i32_0 : i32, i32, i32
  }
  func.func @transform_3(%arg0: i32) -> (i32, i32, i32) {
    %c1_i32 = arith.constant 1 : i32
    %0 = arith.subi %c1_i32, %arg0 : i32
    %c0_i32 = arith.constant 0 : i32
    %c0_i32_0 = arith.constant 0 : i32
    %c0_i32_1 = arith.constant 0 : i32
    return %0, %c0_i32, %c0_i32_0 : i32, i32, i32
  }
  func.func @transform_4(%arg0: i32) -> (i32, i32) {
    %c0_i32 = arith.constant 0 : i32
    %c0_i32_0 = arith.constant 0 : i32
    %c0_i32_1 = arith.constant 0 : i32
    return %c0_i32, %c0_i32_0 : i32, i32
  }
  func.func @transform_5(%arg0: i32) -> (i32, i32, i32) {
    %c0_i32 = arith.constant 0 : i32
    %c0_i32_0 = arith.constant 0 : i32
    %c0_i32_1 = arith.constant 0 : i32
    %c0_i32_2 = arith.constant 0 : i32
    return %c0_i32, %c0_i32_0, %c0_i32_1 : i32, i32, i32
  }
  func.func @transform_6(%arg0: i32) -> (i32, i32, i32) {
    %c0_i32 = arith.constant 0 : i32
    %c0_i32_0 = arith.constant 0 : i32
    %c0_i32_1 = arith.constant 0 : i32
    return %arg0, %c0_i32, %c0_i32_0 : i32, i32, i32
  }
  func.func @transform_7(%arg0: i32) -> (i32, i32, i32) {
    %c1_i32 = arith.constant 1 : i32
    %0 = arith.subi %c1_i32, %arg0 : i32
    %c0_i32 = arith.constant 0 : i32
    %c0_i32_0 = arith.constant 0 : i32
    %c0_i32_1 = arith.constant 0 : i32
    return %0, %c0_i32, %c0_i32_0 : i32, i32, i32
  }
  func.func @transform_8(%arg0: i32) -> (i32, i32) {
    %c0_i32 = arith.constant 0 : i32
    %c0_i32_0 = arith.constant 0 : i32
    %c0_i32_1 = arith.constant 0 : i32
    return %c0_i32, %c0_i32_0 : i32, i32
  }
  func.func @transform_9(%arg0: i32) -> (i32, i32) {
    %c0_i32 = arith.constant 0 : i32
    %c0_i32_0 = arith.constant 0 : i32
    %c0_i32_1 = arith.constant 0 : i32
    return %c0_i32, %c0_i32_0 : i32, i32
  }
}

</mosaic_0001>

<bundles_post_ra>
// kernel: tpu_custom_call.1
= control target key start
LH: loop header
LB: loop body
LE: loop exit
PB: predicated region body
PF: predicated region fallthrough
CT: control target
= control target key end

     0   :  { %s3742_s0 = inlined_call_operand.vmem [shape: bf16[8,8,512], index: 0, kind: input, shape index: {}]   ;;  %s3743_s1 = inlined_call_operand.hbm [shape: bf16[8,8,512], index: 1, kind: input, shape index: {}]   ;;  %s3744_s2 = inlined_call_operand.vmem [shape: f32[8,8,1], index: 2, kind: input, shape index: {}]   ;;  %s3745_s3 = inlined_call_operand.vmem [shape: f32[8,8,1], index: 3, kind: input, shape index: {}]   ;;  %s3746_s4 = inlined_call_operand.vmem [shape: f32[8,1], index: 4, kind: input, shape index: {}]   ;;  %s3747_s5 = inlined_call_operand.hbm [shape: bf16[2,128,512], index: 5, kind: input, shape index: {}]   ;;  %s3748_s6 = inlined_call_operand.hbm [shape: bf16[8,8,128], index: 6, kind: output, shape index: {0}]   ;;  %s3749_s7 = inlined_call_operand.hbm [shape: bf16[8,8,128], index: 7, kind: output, shape index: {1}]   ;;  %s3750_s8 = inlined_call_operand.hbm [shape: f32[8,128], index: 8, kind: output, shape index: {2}]   ;;  %s3751_s9 = inlined_call_operand.hbm [shape: f32[8,128], index: 9, kind: output, shape index: {3}]  }
   0x1   :  { %3813 = sst [smem:[#allocation57_spill]] %s3743_s1 }
   0x2   :  { %3814 = sst [smem:[#allocation58_spill]] %s3747_s5 }
   0x3   :  { %3815 = sst [smem:[#allocation59_spill]] %s3751_s9 }
   0x4   :  { %15 = vsyncpa [#allocation9], 0 }
   0x5   :  { %17 = vsyncpa [#allocation9 + $0x1], 0 }
   0x6   :  { %18 = vsyncpa [#allocation12], 0 }
   0x7   :  { %19 = vsyncpa [#allocation10], 0 }
   0x8   :  { %21 = vsyncpa [#allocation10 + $0x1], 0 }
   0x9   :  { %22 = vsyncpa [#allocation15], 0 }
   0xa   :  { %24 = vsyncpa [#allocation15 + $0x1], 0 }
   0xb   :  { %25 = vsyncpa [#allocation18], 0  ;;  %s2911_s30 = smov 0   ;;  %s2913_s10 = smov 0  }
   0xc   :  { %s2915_s11 = smov 0   ;;  %s2917_s12 = smov 0  }
   0xd   :  { %s2919_s13 = smov 0   ;;  %s2921_s14 = smov 0  }
   0xe   :  { %s2923_s15 = smov 0  }
   0xf LB: > { %3816 = sst [smem:[#allocation25_spill]] %s2822_s30  ;;  %s2945_s16 = sadd.s32 4294967295, %s2846_s15   ;;  %s2846_s15 = sphi %s2923_s15, %s3931_s15   ;;  %s2842_s14 = sphi %s2921_s14, %s3928_s14   ;;  %s2838_s13 = sphi %s2919_s13, %s3927_s13   ;;  %s2834_s12 = sphi %s2917_s12, %s3926_s12   ;;  %s2830_s11 = sphi %s2915_s11, %s3925_s11   ;;  %s2826_s10 = sphi %s2913_s10, %s3930_s10   ;;  %s2822_s30 = sphi %s2911_s30, %s3929_s30  }
  0x10   : > { %3817 = sst [smem:[#allocation26_spill]] %s2830_s11  ;;  %s3752_s17 = sadd.s32 4294967294, %s2846_s15  }
  0x11   : > { %3818 = sst [smem:[#allocation27_spill]] %s2838_s13  ;;  %p79_p0 = scmp.ne.s32.totalorder %s2838_s13, %s2834_s12 }
  0x12   : > { %3819 = sst [smem:[#allocation28_spill]] %s2842_s14  ;;  %p3754_p1 = scmp.eq.s32.totalorder %s2945_s16, 0 }
  0x13   : > { %p198_p2 = scmp.ne.s32.totalorder %s2830_s11, %s2826_s10  ;;  %p3756_p3 = scmp.eq.s32.totalorder %s2945_s16, 1 }
  0x14   : > { %p2955_p4 = por %p3754_p1, %p79_p0  ;;  %p204_p5 = scmp.ne.s32.totalorder %s2826_s10, %s2822_s30 }
  0x15   : > { %p2963_p6 = por %p3756_p3, %p198_p2  ;;  %p205_p7 = scmp.eq.s32.totalorder %s3752_s17, 1 }
  0x16   : > { %s3820_s18 = scalar_select %p2955_p4, 1, 0 }
  0x17   : > { %s3821_s19 = scalar_select %p2963_p6, 1, 0 }
  0x18   : > { %p2144_p8 = scmp.ge.s32.totalorder %s2846_s15, 1  ;;  %p282_p9 = scmp.lt.s32.totalorder %s2846_s15, 3 }
  0x19   : > { %p2971_p10 = por %p205_p7, %p204_p5  ;;  %p2975_p11 = por %p205_p7, %p79_p0 }
  0x1a   : > { %p2979_p12 = pnand %p2144_p8, %p282_p9  ;;  %s2848_s23 = smov [#allocation11]  }
  0x1b   : > { %s3822_s20 = scalar_select %p2971_p10, 1, 0 }
  0x1c   : > { %s3824_s21 = scalar_select %p2975_p11, 1, 0 }
  0x1d   : > { %3823 = sst [smem:[#allocation29_spill]] %s3822_s20  ;;  %p2288_p2 = pneg %p2979_p12 }
  0x1e   : > { %3825 = sst [smem:[#allocation30_spill]] %s3824_s21  ;;  %s297_s24 = sshll.u32 %s2848_s23, 4  ;;  %s298_s24 = int_to_ptr.vmem [resolvable:$true] %s297_s24 }
  0x1f   : > { %s3826_s22 = scalar_select %p2979_p12, 1, 0 }
  0x20   : > { %p2988_p5 = pnand %p2288_p2, %p3754_p1  ;;  %s2994_s26 = sadd.s32 1, %s2846_s15  }
  0x21   : > { %s3828_s5 = sld [smem:[#allocation58_spill]] }
  0x22   : > { %p2604_p8 = pneg %p2988_p5 }
  0x27   : > { %s2602_s29 = scalar_lea.hbm %s3828_s5, 8192 }
  0x28   : > { %p2603_p7 = scmp.ne.s32.totalorder %s3828_s5, %s2602_s29  ;;  %p2609_p2 = scmp.lt.u32.totalorder %s2602_s29, %s3828_s5 }
  0x2a   : > { %p2605_p9 = pnand %p2604_p8, %p2603_p7 }
  0x2c   : > { %p2606_p13 = pneg %p2605_p9 }
  0x2e   : > { %p2611_p1 = pnand %p2609_p2, %p2606_p13 }
  0x30   : > { %2614 = shalt.err (!%p2611_p1)
}
  0x31   : > { %s2615_s20 = scalar_lea.vmem %s298_s24, 8192  ;;  %p2623_p10 = scmp.lt.s32.totalorder %s298_s24, %s298_s24 }
  0x32   : > { %p2616_p0 = scmp.ne.s32.totalorder %s298_s24, %s2615_s20  ;;  %p2624_p6 = scmp.lt.s32.totalorder %s2615_s20, %s2615_s20 }
  0x34   : > { %p2618_p3 = pnand %p2616_p0, %p2604_p8  ;;  %p2625_p4 = por %p2624_p6, %p2623_p10 }
  0x36   : > { %p2619_p11 = pneg %p2618_p3 }
  0x38   : > { %p2626_p12 = pnand %p2625_p4, %p2619_p11 }
  0x3a   : > { %2629 = shalt.err (!%p2626_p12)
}
  0x3b   : > { %s3762_s17 = smov 256   ;;  %s3763_s21 = smov 16  }
  0x3c   : > { %2291 = dma.hbm_to_vmem [thread:$0]  (!%p2988_p5), %s3828_s5, 8192, %s298_s24, [#allocation12], %s3762_s17, %s3762_s17, %s3763_s21  }
  0x3d   : > { %s61_s28 = ssub.s32 1, %s2846_s15  ;;  %s62_s29 = ssub.s32 1, %s2994_s26 }
  0x3e   : > { %s63_s12 = ssub.s32 %s61_s28, %s62_s29  ;;  %s66_s23 = sadd.s32 1, %s2842_s14 }
  0x3f   : > { %p64_p1 = scmp.eq.s32.totalorder %s63_s12, 0  ;;  %p73_p3 = scmp.ne.s32.totalorder %s2842_s14, %s2838_s13 }
  0x40   : > { %p74_p4 = scmp.eq.s32.totalorder %s2846_s15, 0  ;;  %s185_s30 = ssub.s32 %s2846_s15, %s2994_s26 }
  0x41   : > { %s3024_s9 = scalar_select %p64_p1, %s2842_s14, %s66_s23  }
  0x42   : > { %p3026_p6 = por %p74_p4, %p73_p3  ;;  %p186_p10 = scmp.eq.s32.totalorder %s185_s30, 0 }
  0x43   : > { %3829 = sst [smem:[#allocation31_spill]] %s3024_s9  ;;  %s188_s20 = sadd.s32 1, %s2830_s11 }
  0x44   : > { %p3831_p11 = scmp.eq.s32.totalorder %s2945_s16, 1  ;;  %p2304_p13 = scmp.lt.s32.totalorder %s2846_s15, 2 }
  0x45   : > { %s3038_s27 = scalar_select %p186_p10, %s2830_s11, %s188_s20  }
  0x46   : > { %p3033_p12 = por %p3831_p11, %p73_p3  ;;  %s321_s29 = sand.u32 1, %s2842_s14  }
  0x47   : > { %3833 = sst [smem:[#allocation32_spill]] %s3038_s27  ;;  %s2147_s12 = sshll.u32 %s321_s29, 6 }
  0x48   : > { %s2266_s17 = sshll.u32 %s61_s28, 10  ;;  %s3834_s1 = sld [smem:[#allocation57_spill]] }
  0x49   : > { %s325_s30 = scalar_lea.vmem [#allocation8], %s2147_s12  ;;  %p3051_p5 = pnand %p2304_p13, %p3026_p6 }
  0x4a   : > { %s334_s9 = sshll.u32 %s325_s30, 4  ;;  %s3055_s28 = scalar_lea.sflag [#allocation9], %s321_s29  ;;  %s3047_s9 = int_to_ptr.vmem [resolvable:$true] %s334_s9 }
  0x4b   : > { %p2632_p7 = pneg %p3051_p5 }
  0x4e   : > { %s3045_s5 = scalar_lea.hbm %s3834_s1, %s2266_s17  ;;  %s2635_s25 = scalar_lea.hbm %s3834_s1, 2048 }
  0x4f   : > { %s2630_s21 = scalar_lea.hbm %s3045_s5, 1024  ;;  %p2636_p2 = scmp.lt.u32.totalorder %s3045_s5, %s3834_s1 }
  0x50   : > { %p2631_p0 = scmp.ne.s32.totalorder %s3045_s5, %s2630_s21  ;;  %p2637_p1 = scmp.lt.u32.totalorder %s2635_s25, %s2630_s21 }
  0x51   : > { %p2639_p4 = scmp.lt.u32.totalorder %s2630_s21, %s3045_s5 }
  0x52   : > { %p2633_p8 = pnand %p2632_p7, %p2631_p0  ;;  %p2638_p3 = por %p2637_p1, %p2636_p2 }
  0x54   : > { %p2634_p9 = pneg %p2633_p8  ;;  %p2640_p6 = por %p2639_p4, %p2638_p3 }
  0x56   : > { %p2641_p10 = pnand %p2640_p6, %p2634_p9 }
  0x58   : > { %2644 = shalt.err (!%p2641_p10)
}
  0x59   : > { %s2645_s29 = scalar_lea.vmem %s3047_s9, 1024  ;;  %s2851_s17 = smov [#allocation8]  }
  0x5a   : > { %p2646_p11 = scmp.ne.s32.totalorder %s3047_s9, %s2645_s29  ;;  %s2650_s12 = sshll.u32 %s2851_s17, 4  ;;  %s2651_s12 = int_to_ptr.vmem [resolvable:$false] %s2650_s12 }
  0x5b   : > { %s2652_s23 = scalar_lea.vmem %s2651_s12, 2048  ;;  %p2653_p8 = scmp.lt.s32.totalorder %s3047_s9, %s2651_s12 }
  0x5c   : > { %p2648_p13 = pnand %p2646_p11, %p2632_p7  ;;  %p2654_p2 = scmp.lt.s32.totalorder %s2652_s23, %s2645_s29 }
  0x5e   : > { %p2649_p0 = pneg %p2648_p13  ;;  %p2655_p1 = por %p2654_p2, %p2653_p8 }
  0x60   : > { %p2656_p3 = pnand %p2655_p1, %p2649_p0 }
  0x62   : > { %2659 = shalt.err (!%p2656_p3)
}
  0x63   : > { %s3836_s21 = smov 16   ;;  %s3837_s25 = smov 256  }
  0x64   : > { %2295 = dma.hbm_to_vmem [thread:$0]  (!%p3051_p5), %s3045_s5, 1024, %s3047_s9, %s3055_s28, %s3837_s25, %s3837_s25, %s3836_s21  }
  0x65   : > { %p3838_p7 = scmp.ne.s32.totalorder %s3826_s22, 0 }
  0x67   : > { %366 = sbr.rel (%p3838_p7) target bundleno = 1383 (0x567), region = 44 }
  0x6e   : > { %s368_s30 = sand.u32 1, %s2838_s13   ;;  %p3839_p9 = scmp.ne.s32.totalorder %s3820_s18, 0 }
  0x6f   : > { %s2152_s17 = sshll.u32 %s368_s30, 6  ;;  %s369_s29 = scalar_lea.sflag [#allocation9], %s368_s30 }
  0x70   : > { %s3089_s12 = scalar_lea.vmem [#allocation8], %s2152_s17 }
  0x71   : > { %2797 = dma.done.wait (%p3839_p9), %s369_s29, 1024  }
  0x72   : > { %2799 = vsyncadd (%p3839_p9), %s369_s29, 4294966272  ;;  %p3840_p4 = scmp.eq.s32.totalorder %s2945_s16, 0 }
  0x74   : > { %2801 = dma.done.wait (%p3840_p4), [#allocation12], 8192   ;;  %p3841_p5 = pmov %p3840_p4 }
  0x75   : > { %s3765_s5 = sand.u32 1, %s2826_s10   ;;  %s2155_s9 = sshll.u32 %s368_s30, 4 }
  0x76   : > { %2803 = vsyncadd (%p3841_p5), [#allocation12], 4294959104  ;;  %s2154_s22 = sshll.u32 %s3765_s5, 4  ;;  %s2156_s20 = sshll.u32 %s2945_s16, 2 }
  0x77   : > { %p434_p6 = scmp.lt.s32.totalorder %s2156_s20, 7  ;;  %s3767_s28 = ssub.s32 1, %s2945_s16 }
  0x78   : > { %s2161_s18 = sshll.u32 %s3767_s28, 2  ;;  %s3121_s11 = scalar_lea.vmem [#allocation13], %s2154_s22 }
  0x79   : > { %s3933_s20 = smov (!%p434_p6, %s2156_s20), 7  ;;  %p450_p10 = scmp.lt.s32.totalorder %s2161_s18, 7 }
  0x7a   : > { %s2267_s23 = sshll.u32 %s3933_s20, 4  ;;  %s2160_s21 = sshll.u32 %s3933_s20, 3 }
  0x7b   : > { %s3109_s29 = scalar_lea.vmem %s3742_s0, %s2267_s23  ;;  %s3114_s30 = scalar_lea.vmem %s3744_s2, %s2160_s21 }
  0x7c   : > { %s3935_s18 = smov (!%p450_p10, %s2161_s18), 7  ;;  %s3123_s20 = scalar_lea.vmem [#allocation14], %s2155_s9 }
  0x7d   : > { %s2162_s5 = sshll.u32 %s3935_s18, 3  ;;  %p3842_p11 = scmp.ne.s32.totalorder %s2945_s16, 0 }
  0x7e   : > { %s3119_s28 = scalar_lea.vmem %s3745_s3, %s2162_s5  ;;  %v2852_v0 = vmov (!%p3842_p11), 0.0  }
  0x7f   : > { %463 = sbr.rel (%p3842_p11) target bundleno = 134 (0x86), region = 56  ;;  %464 = vst [vmem:[#allocation2] sm:$0xff] (!%p3842_p11), %v2852_v0  ;;  %465 = vst [vmem:[#allocation3] sm:$0xff] (!%p3842_p11), %v2852_v0 }
  0x80   : > { %466 = vst [vmem:[#allocation4] sm:$0xff] (!%p3842_p11), %v2852_v0  ;;  %467 = vst [vmem:[#allocation5] sm:$0xff] (!%p3842_p11), %v2852_v0 }
  0x81   : > { %468 = vst [vmem:[#allocation6] sm:$0xff] (!%p3842_p11), %v2852_v0  ;;  %469 = vst [vmem:[#allocation7] sm:$0xff] (!%p3842_p11), %v2852_v0 }
  0x86 PF: > { %v3127_v1 = vld [vmem:[#allocation11 + $0x4] ss:$16 sps:$4 sm:$0xff]   ;;  %v3129_v2 = vld [vmem:[#allocation11] ss:$16 sps:$4 sm:$0xff]   ;;  %v3769_v3 = vmov 0   ;;  %v2198_v53 = vld [vmem:[%s3119_s28 + $0x18] sm:$0xff] }
  0x87   : > { %737 = vmatprep.mubr.bf16.mxu0 %v3769_v3  ;;  %778 = vmatprep.mubr.bf16.mxu1 %v3769_v3  ;;  %v3134_v4 = vld [vmem:[#allocation11 + $0x24] ss:$16 sps:$4 sm:$0xff]   ;;  %v3138_v5 = vld [vmem:[#allocation11 + $0xc] ss:$16 sps:$4 sm:$0xff]   ;;  %v3140_v6 = vld [vmem:[#allocation11 + $0x20] ss:$16 sps:$4 sm:$0xff]  }
  0x88   : > { %705 = vmatprep.subr.bf16.mxu0 %v3127_v1  ;;  %2377 = vset.pattern.permute.xlu0 %v3769_v3  ;;  %v3142_v7 = vld [vmem:[#allocation11 + $0x8] ss:$16 sps:$4 sm:$0xff]   ;;  %v3146_v8 = vld [vmem:[#allocation11 + $0x44] ss:$16 sps:$4 sm:$0xff]   ;;  %v3149_v9 = vld [vmem:[#allocation11 + $0x2c] ss:$16 sps:$4 sm:$0xff]  }
  0x89   : > { %706 = vmatpush1.bf16.msra.mxu0 %v3129_v2  ;;  %2378 = vset.pattern.permute.xlu1 %v3769_v3  ;;  %v3152_v10 = vld [vmem:[#allocation11 + $0x28] ss:$16 sps:$4 sm:$0xff]   ;;  %v3156_v11 = vld [vmem:[#allocation11 + $0x40] ss:$16 sps:$4 sm:$0xff]   ;;  %v3159_v12 = vld [vmem:[#allocation11 + $0x64] ss:$16 sps:$4 sm:$0xff]  }
  0x8a   : > { %707 = vmatprep.subr.bf16.mxu0 %v3134_v4  ;;  %746 = vmatprep.subr.bf16.mxu1 %v3138_v5  ;;  %v3161_v13 = vld [vmem:[#allocation11 + $0x4c] ss:$16 sps:$4 sm:$0xff]   ;;  %v3164_v14 = vld [vmem:[#allocation11 + $0x48] ss:$16 sps:$4 sm:$0xff]   ;;  %v3168_v15 = vld [vmem:[#allocation11 + $0x60] ss:$16 sps:$4 sm:$0xff]  }
  0x8b   : > { %747 = vmatpush1.bf16.msra.mxu1 %v3142_v7  ;;  %3843 = vst [vmem:[#allocation33_spill] sm:$0xff] %v3168_v15  ;;  %v3170_v16 = vld [vmem:[#allocation11 + $0x6c] ss:$16 sps:$4 sm:$0xff]   ;;  %v3173_v17 = vld [vmem:[#allocation11 + $0x84] ss:$16 sps:$4 sm:$0xff]   ;;  %p2252_p13 = scmp.ne.s32.totalorder %s2945_s16, 1 }
  0x8c   : > { %748 = vmatprep.subr.bf16.mxu1 %v3149_v9  ;;  %3844 = vst [vmem:[#allocation34_spill] sm:$0xff] %v3173_v17  ;;  %v3176_v18 = vld [vmem:[#allocation11 + $0x80] ss:$16 sps:$4 sm:$0xff]   ;;  %v3178_v19 = vld [vmem:[#allocation11 + $0x68] ss:$16 sps:$4 sm:$0xff]  }
  0x8d   : > { %708 = vmatpush1.bf16.msra.mxu0 %v3140_v6  ;;  %3845 = vst [vmem:[#allocation35_spill] sm:$0xff] %v3176_v18  ;;  %3846 = vst [vmem:[#allocation36_spill] sm:$0xff] %v3178_v19  ;;  %v3182_v20 = vld [vmem:[#allocation11 + $0x8c] ss:$16 sps:$4 sm:$0xff]   ;;  %v3185_v21 = vld [vmem:[#allocation11 + $0xa4] ss:$16 sps:$4 sm:$0xff]  }
  0x8e   : > { %709 = vmatprep.subr.bf16.mxu0 %v3146_v8  ;;  %3847 = vst [vmem:[#allocation37_spill] sm:$0xff] %v3182_v20  ;;  %3848 = vst [vmem:[#allocation38_spill] sm:$0xff] %v3185_v21  ;;  %v3188_v22 = vld [vmem:[#allocation11 + $0x88] ss:$16 sps:$4 sm:$0xff]   ;;  %v3192_v23 = vld [vmem:[#allocation11 + $0xa0] ss:$16 sps:$4 sm:$0xff]  }
  0x8f   : > { %749 = vmatpush1.bf16.msra.mxu1 %v3152_v10  ;;  %3849 = vst [vmem:[#allocation39_spill] sm:$0xff] %v3188_v22  ;;  %3850 = vst [vmem:[#allocation40_spill] sm:$0xff] %v3192_v23  ;;  %v3194_v24 = vld [vmem:[#allocation11 + $0xac] ss:$16 sps:$4 sm:$0xff]   ;;  %v3197_v25 = vld [vmem:[#allocation11 + $0xc4] ss:$16 sps:$4 sm:$0xff]  }
  0x90   : > { %750 = vmatprep.subr.bf16.mxu1 %v3161_v13  ;;  %3851 = vst [vmem:[#allocation41_spill] sm:$0xff] %v3194_v24  ;;  %3852 = vst [vmem:[#allocation42_spill] sm:$0xff] %v3197_v25  ;;  %v3200_v26 = vld [vmem:[#allocation11 + $0xc0] ss:$16 sps:$4 sm:$0xff]   ;;  %v3202_v27 = vld [vmem:[#allocation11 + $0xa8] ss:$16 sps:$4 sm:$0xff]  }
  0x91   : > { %710 = vmatpush1.bf16.msra.mxu0 %v3156_v11  ;;  %3853 = vst [vmem:[#allocation43_spill] sm:$0xff] %v3200_v26  ;;  %3854 = vst [vmem:[#allocation44_spill] sm:$0xff] %v3202_v27  ;;  %v3206_v28 = vld [vmem:[#allocation11 + $0xcc] ss:$16 sps:$4 sm:$0xff]   ;;  %v3209_v29 = vld [vmem:[#allocation11 + $0xe4] ss:$16 sps:$4 sm:$0xff]  }
  0x92   : > { %711 = vmatprep.subr.bf16.mxu0 %v3159_v12  ;;  %3855 = vst [vmem:[#allocation45_spill] sm:$0xff] %v3206_v28  ;;  %3856 = vst [vmem:[#allocation46_spill] sm:$0xff] %v3209_v29  ;;  %v3211_v30 = vld [vmem:[#allocation11 + $0xe0] ss:$16 sps:$4 sm:$0xff]   ;;  %v3214_v31 = vld [vmem:[#allocation11 + $0xc8] ss:$16 sps:$4 sm:$0xff]  }
  0x93   : > { %751 = vmatpush1.bf16.msra.mxu1 %v3164_v14  ;;  %3857 = vst [vmem:[#allocation47_spill] sm:$0xff] %v3211_v30  ;;  %3858 = vst [vmem:[#allocation48_spill] sm:$0xff] %v3214_v31  ;;  %v538_v32 = vld [vmem:[#allocation2] sm:$0xff]  ;;  %v3218_v33 = vld [vmem:[#allocation11 + $0xec] ss:$16 sps:$4 sm:$0xff]  }
  0x94   : > { %752 = vmatprep.subr.bf16.mxu1 %v3170_v16  ;;  %3859 = vst [vmem:[#allocation49_spill] sm:$0xff] %v3218_v33  ;;  %v3221_v34 = vld [vmem:[#allocation11 + $0x104] ss:$16 sps:$4 sm:$0xff]   ;;  %v544_v35 = vpack.c.bf16 %v538_v32, %v538_v32  ;;  %v3224_v36 = vld [vmem:[#allocation11 + $0xe8] ss:$16 sps:$4 sm:$0xff]  }
  0x95   : > { %712 = vmatpush1.bf16.msra.mxu0 %v3168_v15  ;;  %3860 = vst [vmem:[#allocation50_spill] sm:$0xff] %v3221_v34  ;;  %3861 = vst [vmem:[#allocation51_spill] sm:$0xff] %v3224_v36  ;;  %v3226_v37 = vld [vmem:[#allocation11 + $0x100] ss:$16 sps:$4 sm:$0xff]   ;;  %v3230_v38 = vld [vmem:[#allocation11 + $0x10c] ss:$16 sps:$4 sm:$0xff]  }
  0x96   : > { %713 = vmatprep.subr.bf16.mxu0 %v3173_v17  ;;  %3862 = vst [vmem:[#allocation52_spill] sm:$0xff] %v3230_v38  ;;  %v3233_v39 = vld [vmem:[#allocation11 + $0x124] ss:$16 sps:$4 sm:$0xff]   ;;  %v3236_v40 = vld [vmem:[#allocation11 + $0x108] ss:$16 sps:$4 sm:$0xff]  }
  0x97   : > { %753 = vmatpush1.bf16.msra.mxu1 %v3178_v19  ;;  %v3240_v41 = vld [vmem:[#allocation11 + $0x120] ss:$16 sps:$4 sm:$0xff]   ;;  %v3242_v42 = vld [vmem:[#allocation11 + $0x12c] ss:$16 sps:$4 sm:$0xff]   ;;  %v3245_v43 = vld [vmem:[#allocation11 + $0x144] ss:$16 sps:$4 sm:$0xff]  }
  0x98   : > { %754 = vmatprep.subr.bf16.mxu1 %v3182_v20  ;;  %v3249_v44 = vld [vmem:[#allocation11 + $0x140] ss:$16 sps:$4 sm:$0xff]   ;;  %v3251_v45 = vld [vmem:[#allocation11 + $0x128] ss:$16 sps:$4 sm:$0xff]   ;;  %v3256_v46 = vld [vmem:[#allocation11 + $0x14c] ss:$16 sps:$4 sm:$0xff]  }
  0x99   : > { %714 = vmatpush1.bf16.msra.mxu0 %v3176_v18  ;;  %v3259_v47 = vld [vmem:[#allocation11 + $0x164] ss:$16 sps:$4 sm:$0xff]   ;;  %v3262_v48 = vld [vmem:[#allocation11 + $0x148] ss:$16 sps:$4 sm:$0xff]   ;;  %v3266_v49 = vld [vmem:[#allocation11 + $0x160] ss:$16 sps:$4 sm:$0xff]  }
  0x9a   : > { %715 = vmatprep.subr.bf16.mxu0 %v3185_v21  ;;  %v3268_v50 = vld [vmem:[#allocation11 + $0x16c] ss:$16 sps:$4 sm:$0xff]   ;;  %v537_v51 = vld [vmem:[%s3114_s30] sm:$0xff]  ;;  %v3276_v54 = vld [vmem:[#allocation11 + $0x168] ss:$16 sps:$4 sm:$0xff]  }
  0x9b   : > { %755 = vmatpush1.bf16.msra.mxu1 %v3188_v22  ;;  %v3272_v52 = vld [vmem:[#allocation11 + $0x184] ss:$16 sps:$4 sm:$0xff]   ;;  %811 = vperm.xlu0 %2377, %v537_v51   ;;  %v3280_v55 = vld [vmem:[#allocation11 + $0x180] ss:$16 sps:$4 sm:$0xff]   ;;  %v3282_v56 = vld [vmem:[#allocation11 + $0x18c] ss:$16 sps:$4 sm:$0xff]  }
  0x9c   : > { %756 = vmatprep.subr.bf16.mxu1 %v3194_v24  ;;  %v3285_v57 = vld [vmem:[#allocation11 + $0x1a4] ss:$16 sps:$4 sm:$0xff]   ;;  %v3289_v59 = vld [vmem:[#allocation11 + $0x188] ss:$16 sps:$4 sm:$0xff]   ;;  %v3293_v60 = vld [vmem:[#allocation11 + $0x1a0] ss:$16 sps:$4 sm:$0xff]  }
  0x9d   : > { %716 = vmatpush1.bf16.msra.mxu0 %v3192_v23  ;;  %v2242_v58 = vld [vmem:[%s3114_s30 + $0x10] sm:$0xff]  ;;  %3863 = vst [vmem:[#allocation53_spill] sm:$0xff] %v3293_v60  ;;  %v3295_v61 = vld [vmem:[#allocation11 + $0x1ac] ss:$16 sps:$4 sm:$0xff]   ;;  %v3302_v0 = vld [vmem:[#allocation11 + $0x1a8] ss:$16 sps:$4 sm:$0xff]  }
  0x9e   : > { %717 = vmatprep.subr.bf16.mxu0 %v3197_v25  ;;  %3864 = vst [vmem:[#allocation54_spill] sm:$0xff] %v3295_v61  ;;  %v3298_v62 = vld [vmem:[#allocation11 + $0x1c4] ss:$16 sps:$4 sm:$0xff]   ;;  %v2250_v63 = vld [vmem:[%s3114_s30 + $0x18] sm:$0xff]  ;;  %v3306_v32 = vld [vmem:[#allocation11 + $0x1c0] ss:$16 sps:$4 sm:$0xff]  }
  0x9f   : > { %757 = vmatpush1.bf16.msra.mxu1 %v3202_v27  ;;  %1101 = vperm.xlu0 %2377, %v2198_v53   ;;  %3865 = vst [vmem:[#allocation55_spill] sm:$0xff] %v3298_v62  ;;  %v3311_v51 = vld [vmem:[#allocation11 + $0x1e4] ss:$16 sps:$4 sm:$0xff]   ;;  %v3314_v53 = vld [vmem:[#allocation11 + $0x1c8] ss:$16 sps:$4 sm:$0xff]  }
  0xa0   : > { %758 = vmatprep.subr.bf16.mxu1 %v3206_v28 }
  0xa1   : > { %718 = vmatpush1.bf16.msra.mxu0 %v3200_v26 }
  0xa2   : > { %719 = vmatprep.subr.bf16.mxu0 %v3209_v29 }
  0xa3   : > { %759 = vmatpush1.bf16.msra.mxu1 %v3214_v31  ;;  %1494 = vperm.xlu0 %2377, %v2242_v58   ;;  %v3318_v58 = vld [vmem:[#allocation11 + $0x1e0] ss:$16 sps:$4 sm:$0xff]  }
  0xa4   : > { %760 = vmatprep.subr.bf16.mxu1 %v3218_v33 }
  0xa5   : > { %720 = vmatpush1.bf16.msra.mxu0 %v3211_v30 }
  0xa6   : > { %995 = vmatprep.subr.bf16.mxu0 %v3221_v34 }
  0xa7   : > { %761 = vmatpush1.bf16.msra.mxu1 %v3224_v36  ;;  %1756 = vperm.xlu0 %2377, %v2250_v63   ;;  %v3866_v63 = vmov 0  }
  0xa8   : > { %738 = vmatmul.mubr.bf16.vlgmr.msra.gmra.mrb[0].mxu0 %v544_v35  ;;  %1036 = vmatprep.subr.bf16.mxu1 %v3230_v38 }
  0xa9   : > { %996 = vmatpush1.bf16.msra.mxu0 %v3226_v37  ;;  %1027 = vmatprep.mubr.bf16.mxu0 %v3769_v3 }
  0xaa   : > { %997 = vmatprep.subr.bf16.mxu0 %v3233_v39  ;;  %779 = vmatmul.mubr.bf16.vlgmr.msra.gmra.mrb[0].mxu1 %v544_v35  ;;  %v3308_v35 = vld [vmem:[#allocation11 + $0x1cc] ss:$16 sps:$4 sm:$0xff]  }
  0xab   : > { %1037 = vmatpush1.bf16.msra.mxu1 %v3236_v40  ;;  %1068 = vmatprep.mubr.bf16.mxu1 %v3769_v3  ;;  %v828_v3 = vld [vmem:[#allocation5] sm:$0xff] }
  0xac   : > { %1038 = vmatprep.subr.bf16.mxu1 %v3242_v42 }
  0xad   : > { %998 = vmatpush1.bf16.msra.mxu0 %v3240_v41 }
  0xae   : > { %999 = vmatprep.subr.bf16.mxu0 %v3245_v43 }
  0xaf   : > { %1039 = vmatpush1.bf16.msra.mxu1 %v3251_v45 }
  0xb0   : > { %1040 = vmatprep.subr.bf16.mxu1 %v3256_v46 }
  0xb1   : > { %1000 = vmatpush1.bf16.msra.mxu0 %v3249_v44 }
  0xb2   : > { %1001 = vmatprep.subr.bf16.mxu0 %v3259_v47 }
  0xb3   : > { %1041 = vmatpush1.bf16.msra.mxu1 %v3262_v48 }
  0xb4   : > { %1042 = vmatprep.subr.bf16.mxu1 %v3268_v50 }
  0xb5   : > { %1002 = vmatpush1.bf16.msra.mxu0 %v3266_v49 }
  0xb6   : > { %1003 = vmatprep.subr.bf16.mxu0 %v3272_v52 }
  0xb7   : > { %1043 = vmatpush1.bf16.msra.mxu1 %v3276_v54 }
  0xb8   : > { %1044 = vmatprep.subr.bf16.mxu1 %v3282_v56 }
  0xb9   : > { %1004 = vmatpush1.bf16.msra.mxu0 %v3280_v55 }
  0xba   : > { %1005 = vmatprep.subr.bf16.mxu0 %v3285_v57 }
  0xbb   : > { %1045 = vmatpush1.bf16.msra.mxu1 %v3289_v59 }
  0xbc   : > { %1046 = vmatprep.subr.bf16.mxu1 %v3295_v61  ;;  %v3324_v61 = vld [vmem:[#allocation11 + $0x1e8] ss:$16 sps:$4 sm:$0xff]  }
  0xbd   : > { %1006 = vmatpush1.bf16.msra.mxu0 %v3293_v60  ;;  %v3320_v60 = vld [vmem:[#allocation11 + $0x1ec] ss:$16 sps:$4 sm:$0xff]  }
  0xbe   : > { %1007 = vmatprep.subr.bf16.mxu0 %v3298_v62  ;;  %v834_v62 = vpack.c.bf16 %v828_v3, %v828_v3  ;;  %v2234_v3 = vld [vmem:[%s3114_s30 + $0x8] sm:$0xff] }
  0xbf   : > { %1047 = vmatpush1.bf16.msra.mxu1 %v3302_v0  ;;  %1232 = vperm.xlu1 %2378, %v2234_v3  }
  0xc0   : > { %1048 = vmatprep.subr.bf16.mxu1 %v3308_v35 }
  0xc1   : > { %1008 = vmatpush1.bf16.msra.mxu0 %v3306_v32 }
  0xc2   : > { %1009 = vmatprep.subr.bf16.mxu0 %v3311_v51 }
  0xc3   : > { %1049 = vmatpush1.bf16.msra.mxu1 %v3314_v53 }
  0xc4   : > { %1050 = vmatprep.subr.bf16.mxu1 %v3320_v60 }
  0xc5   : > { %1010 = vmatpush1.bf16.msra.mxu0 %v3318_v58 }
  0xc6   : > { %1126 = vmatprep.subr.bf16.mxu0 %v3127_v1 }
  0xc7   : > { %1051 = vmatpush1.bf16.msra.mxu1 %v3324_v61 }
  0xc8   : > { %1028 = vmatmul.mubr.bf16.vlgmr.msra.gmra.mrb[4].mxu0 %v834_v62  ;;  %1167 = vmatprep.subr.bf16.mxu1 %v3138_v5 }
  0xc9   : > { %1127 = vmatpush1.bf16.msra.mxu0 %v3129_v2  ;;  %1158 = vmatprep.mubr.bf16.mxu0 %v3866_v63 }
  0xca   : > { %1128 = vmatprep.subr.bf16.mxu0 %v3134_v4  ;;  %1069 = vmatmul.mubr.bf16.vlgmr.msra.gmra.mrb[4].mxu1 %v834_v62  ;;  %v2238_v62 = vld [vmem:[%s3119_s28 + $0x10] sm:$0xff] }
  0xcb   : > { %1168 = vmatpush1.bf16.msra.mxu1 %v3142_v7  ;;  %1199 = vmatprep.mubr.bf16.mxu1 %v3866_v63 }
  0xcc   : > { %1169 = vmatprep.subr.bf16.mxu1 %v3149_v9  ;;  %1363 = vperm.xlu1 %2378, %v2238_v62  }
  0xcd   : > { %1129 = vmatpush1.bf16.msra.mxu0 %v3140_v6 }
  0xce   : > { %1130 = vmatprep.subr.bf16.mxu0 %v3146_v8 }
  0xcf   : > { %1170 = vmatpush1.bf16.msra.mxu1 %v3152_v10 }
  0xd0   : > { %1171 = vmatprep.subr.bf16.mxu1 %v3161_v13 }
  0xd1   : > { %1131 = vmatpush1.bf16.msra.mxu0 %v3156_v11 }
  0xd2   : > { %1132 = vmatprep.subr.bf16.mxu0 %v3159_v12 }
  0xd3   : > { %1172 = vmatpush1.bf16.msra.mxu1 %v3164_v14 }
  0xd4   : > { %1173 = vmatprep.subr.bf16.mxu1 %v3170_v16 }
  0xd5   : > { %1133 = vmatpush1.bf16.msra.mxu0 %v3168_v15 }
  0xd6   : > { %1134 = vmatprep.subr.bf16.mxu0 %v3173_v17 }
  0xd7   : > { %1174 = vmatpush1.bf16.msra.mxu1 %v3178_v19 }
  0xd8   : > { %1175 = vmatprep.subr.bf16.mxu1 %v3182_v20 }
  0xd9   : > { %1135 = vmatpush1.bf16.msra.mxu0 %v3176_v18 }
  0xda   : > { %1136 = vmatprep.subr.bf16.mxu0 %v3185_v21 }
  0xdb   : > { %1176 = vmatpush1.bf16.msra.mxu1 %v3188_v22 }
  0xdc   : > { %1177 = vmatprep.subr.bf16.mxu1 %v3194_v24 }
  0xdd   : > { %1137 = vmatpush1.bf16.msra.mxu0 %v3192_v23 }
  0xde   : > { %1138 = vmatprep.subr.bf16.mxu0 %v3197_v25  ;;  %v536_v25 = vld [vmem:[%s3109_s29 + $0x8] sm:$0xff] }
  0xdf   : > { %1178 = vmatpush1.bf16.msra.mxu1 %v3202_v27 }
  0xe0   : > { %1179 = vmatprep.subr.bf16.mxu1 %v3206_v28 }
  0xe1   : > { %1139 = vmatpush1.bf16.msra.mxu0 %v3200_v26  ;;  %v2246_v26 = vld [vmem:[%s3119_s28 + $0x8] sm:$0xff] }
  0xe2   : > { %1140 = vmatprep.subr.bf16.mxu0 %v3209_v29  ;;  %1625 = vperm.xlu1 %2378, %v2246_v26   ;;  %v1771_v29 = vld [vmem:[%s3119_s28] sm:$0xff]  ;;  %v543_v26 = vunpack.c.h.bf16 %v536_v25 }
  0xe3   : > { %1180 = vmatpush1.bf16.msra.mxu1 %v3214_v31  ;;  %v535_v31 = vld [vmem:[%s3109_s29] sm:$0xff] }
  0xe4   : > { %1181 = vmatprep.subr.bf16.mxu1 %v3218_v33  ;;  %v540_v28 = vunpack.c.l.bf16 %v535_v31  ;;  %v541_v33 = vunpack.c.h.bf16 %v535_v31 }
  0xe5   : > { %1141 = vmatpush1.bf16.msra.mxu0 %v3211_v30  ;;  %v542_v30 = vunpack.c.l.bf16 %v536_v25 }
  0xe6   : > { %1257 = vmatprep.subr.bf16.mxu0 %v3221_v34  ;;  %1885 = vperm.xlu1 %2378, %v1771_v29  }
  0xe7   : > { %1182 = vmatpush1.bf16.msra.mxu1 %v3224_v36 }
  0xe8   : > { %1298 = vmatprep.subr.bf16.mxu1 %v3230_v38 }
 0x11a   : > { %v3376_v15 = vpop.permute.xlu0 %811 }
 0x17b   : > { %v739_v27 = vpop.f32.mrb[0].mxu0 }
 0x17c   : > { %v787_v23 = vadd.f32 %v739_v27, %v540_v28  ;;  %v741_v34 = vpop.f32.mrb[1].mxu0 }
 0x17d   : > { %v788_v24 = vadd.f32 %v741_v34, %v541_v33  ;;  %v743_v36 = vpop.f32.mrb[2].mxu0  ;;  %v780_v22 = vpop.f32.mrb[0].mxu1 }
 0x17e   : > { %v791_v21 = vmul.f32 0.5, %v787_v23  ;;  %v744_v38 = vpop.f32.mrb[3].mxu0  ;;  %v789_v18 = vadd.f32 %v780_v22, %v542_v30  ;;  %v782_v62 = vpop.f32.mrb[1].mxu1 }
 0x17f   : > { %v795_v3 = vmul.f32 0.5, %v788_v24  ;;  %v784_v20 = vpop.f32.mrb[2].mxu1  ;;  %v790_v31 = vadd.f32 %v782_v62, %v543_v26  ;;  %v539_v24 = vld [vmem:[#allocation3] sm:$0xff] }
 0x180   : > { %2475 = vtanh.f32 %v791_v21  ;;  %v785_v29 = vpop.f32.mrb[3].mxu1  ;;  %v2197_v38 = vld [vmem:[%s3089_s12 + $0x38] sm:$0xff] }
 0x181   : > { %2477 = vtanh.f32 %v795_v3  ;;  %v800_v17 = vmul.f32 0.5, %v790_v31 }
 0x182   : > { %2479 = vtanh.f32 %v789_v18  ;;  %v2196_v18 = vld [vmem:[%s3089_s12 + $0x30] sm:$0xff] }
 0x183   : > { %2481 = vtanh.f32 %v800_v17  ;;  %v830_v36 = vunpack.c.l.bf16 %v2196_v18  ;;  %v831_v62 = vunpack.c.h.bf16 %v2196_v18  ;;  %v833_v18 = vunpack.c.h.bf16 %v2197_v38 }
 0x18a   : > { %v2476_v19 = vpop.eup %2475 }
 0x18b   : > { %v2478_v27 = vpop.eup %2477  ;;  %v793_v28 = vmul.f32 0.5, %v2476_v19  ;;  %v832_v19 = vunpack.c.l.bf16 %v2197_v38 }
 0x18c   : > { %v2480_v33 = vpop.eup %2479  ;;  %v797_v23 = vmul.f32 0.5, %v2478_v27 }
 0x18d   : > { %v794_v34 = vadd.f32 0.5, %v793_v28  ;;  %v2482_v20 = vpop.eup %2481 }
 0x18e   : > { %v798_v22 = vadd.f32 0.5, %v797_v23  ;;  %v802_v3 = vmul.f32 0.5, %v2482_v20 }
 0x18f   : > { %v805_v30 = vmul.f32 %v2480_v33, %v794_v34 }
 0x190   : > { %v804_v21 = vmul.f32 %v798_v22, %v539_v24  ;;  %v803_v17 = vadd.f32 0.5, %v802_v3 }
 0x192   : > { %v3371_v25 = vadd.f32 %v805_v30, %v804_v21 }
 0x194   : > { %3867 = vst [vmem:[#allocation56_spill] sm:$0xff] %v3371_v25  ;;  %2483 = vtanh.f32 %v3371_v25 }
 0x19b   : > { %v1029_v26 = vpop.f32.mrb[4].mxu0 }
 0x19c   : > { %v1077_v29 = vadd.f32 %v1029_v26, %v830_v36  ;;  %v1031_v31 = vpop.f32.mrb[5].mxu0 }
 0x19d   : > { %v1078_v27 = vadd.f32 %v1031_v31, %v831_v62  ;;  %v1033_v28 = vpop.f32.mrb[6].mxu0  ;;  %v1070_v24 = vpop.f32.mrb[4].mxu1 }
 0x19e   : > { %v2484_v23 = vpop.eup %2483  ;;  %v1081_v33 = vmul.f32 0.5, %v1077_v29  ;;  %v1034_v34 = vpop.f32.mrb[7].mxu0  ;;  %v1079_v21 = vadd.f32 %v1070_v24, %v832_v19  ;;  %v829_v28 = vld [vmem:[#allocation6] sm:$0xff] }
 0x19f   : > { %v808_v22 = vmul.f32 %v2484_v23, %v803_v17  ;;  %v1085_v30 = vmul.f32 0.5, %v1078_v27  ;;  %v1072_v25 = vpop.f32.mrb[5].mxu1 }
 0x1a0   : > { %2485 = vtanh.f32 %v1081_v33  ;;  %v1074_v20 = vpop.f32.mrb[6].mxu1  ;;  %v1080_v26 = vadd.f32 %v1072_v25, %v833_v18  ;;  %v3869_v18 = vld [vmem:[#allocation53_spill] sm:$0xff] }
 0x1a1   : > { %v3379_v36 = vmul.f32 %v3376_v15, %v808_v22  ;;  %2487 = vtanh.f32 %v1085_v30  ;;  %v1075_v3 = vpop.f32.mrb[7].mxu1  ;;  %v3868_v30 = vld [vmem:[#allocation54_spill] sm:$0xff]  ;;  %v3870_v20 = vld [vmem:[#allocation55_spill] sm:$0xff] }
 0x1a2   : > { %2489 = vtanh.f32 %v1079_v21  ;;  %v1090_v38 = vmul.f32 0.5, %v1080_v26 }
 0x1a3   : > { %v821_v62 = vpack.c.bf16 %v3379_v36, %v3379_v36 }
 0x1a4   : > { %2491 = vtanh.f32 %v1090_v38  ;;  %v3417_v38 = vpop.permute.xlu0 %1101 }
 0x1a5   : > { %822 = vst [vmem:[%s3121_s11] sm:$0xf] %v821_v62  ;;  %1159 = vmatmul.mubr.bf16.vlgmr.msra.gmra.mrb[8].mxu0 %v821_v62  ;;  %1200 = vmatmul.mubr.bf16.vlgmr.msra.gmra.mrb[8].mxu1 %v821_v62 }
 0x1a6   : > { %1258 = vmatpush1.bf16.msra.mxu0 %v3226_v37  ;;  %1299 = vmatpush1.bf16.msra.mxu1 %v3236_v40 }
 0x1a7   : > { %1259 = vmatprep.subr.bf16.mxu0 %v3233_v39  ;;  %1300 = vmatprep.subr.bf16.mxu1 %v3242_v42 }
 0x1a8   : > { %1289 = vmatprep.mubr.bf16.mxu0 %v3866_v63  ;;  %1330 = vmatprep.mubr.bf16.mxu1 %v3866_v63 }
 0x1aa   : > { %v2486_v19 = vpop.eup %2485  ;;  %1260 = vmatpush1.bf16.msra.mxu0 %v3240_v41  ;;  %1301 = vmatpush1.bf16.msra.mxu1 %v3251_v45 }
 0x1ab   : > { %v2488_v25 = vpop.eup %2487  ;;  %v1083_v29 = vmul.f32 0.5, %v2486_v19  ;;  %1261 = vmatprep.subr.bf16.mxu0 %v3245_v43  ;;  %1302 = vmatprep.subr.bf16.mxu1 %v3256_v46 }
 0x1ac   : > { %v2490_v31 = vpop.eup %2489  ;;  %v1087_v17 = vmul.f32 0.5, %v2488_v25 }
 0x1ad   : > { %v1084_v27 = vadd.f32 0.5, %v1083_v29  ;;  %v3885_v29 = vld [vmem:[#allocation46_spill] sm:$0xff] }
 0x1ae   : > { %v1088_v23 = vadd.f32 0.5, %v1087_v17  ;;  %1262 = vmatpush1.bf16.msra.mxu0 %v3249_v44  ;;  %1303 = vmatpush1.bf16.msra.mxu1 %v3262_v48  ;;  %v2492_v22 = vpop.eup %2491  ;;  %v3887_v17 = vld [vmem:[#allocation47_spill] sm:$0xff] }
 0x1af   : > { %v1095_v33 = vmul.f32 %v2490_v31, %v1084_v27  ;;  %1263 = vmatprep.subr.bf16.mxu0 %v3259_v47  ;;  %1304 = vmatprep.subr.bf16.mxu1 %v3268_v50  ;;  %v1092_v21 = vmul.f32 0.5, %v2492_v22  ;;  %v3886_v31 = vld [vmem:[#allocation49_spill] sm:$0xff]  ;;  %v3888_v27 = vld [vmem:[#allocation51_spill] sm:$0xff]  ;;  %v2233_v22 = vld [vmem:[%s3109_s29 + $0x18] sm:$0xff] }
 0x1b0   : > { %v1094_v34 = vmul.f32 %v1088_v23, %v829_v28  ;;  %v3889_v28 = vld [vmem:[#allocation50_spill] sm:$0xff]  ;;  %v3890_v23 = vld [vmem:[#allocation52_spill] sm:$0xff] }
 0x1b1   : > { %v1093_v3 = vadd.f32 0.5, %v1092_v21 }
 0x1b2   : > { %v3398_v24 = vadd.f32 %v1095_v33, %v1094_v34  ;;  %1264 = vmatpush1.bf16.msra.mxu0 %v3266_v49  ;;  %1305 = vmatpush1.bf16.msra.mxu1 %v3276_v54  ;;  %v2232_v33 = vld [vmem:[%s3109_s29 + $0x10] sm:$0xff] }
 0x1b3   : > { %1265 = vmatprep.subr.bf16.mxu0 %v3272_v52  ;;  %1306 = vmatprep.subr.bf16.mxu1 %v3282_v56  ;;  %v1121_v34 = vunpack.c.l.bf16 %v2232_v33  ;;  %v1122_v21 = vunpack.c.h.bf16 %v2232_v33 }
 0x1b4   : > { %2493 = vtanh.f32 %v3398_v24 }
 0x1b6   : > { %1266 = vmatpush1.bf16.msra.mxu0 %v3280_v55  ;;  %1307 = vmatpush1.bf16.msra.mxu1 %v3289_v59 }
 0x1b7   : > { %1267 = vmatprep.subr.bf16.mxu0 %v3285_v57  ;;  %1308 = vmatprep.subr.bf16.mxu1 %v3868_v30 }
 0x1ba   : > { %1268 = vmatpush1.bf16.msra.mxu0 %v3869_v18  ;;  %1309 = vmatpush1.bf16.msra.mxu1 %v3302_v0 }
 0x1bb   : > { %1269 = vmatprep.subr.bf16.mxu0 %v3870_v20  ;;  %1310 = vmatprep.subr.bf16.mxu1 %v3308_v35 }
 0x1be   : > { %v2494_v62 = vpop.eup %2493  ;;  %1270 = vmatpush1.bf16.msra.mxu0 %v3306_v32  ;;  %1311 = vmatpush1.bf16.msra.mxu1 %v3314_v53 }
 0x1bf   : > { %v1098_v26 = vmul.f32 %v2494_v62, %v1093_v3  ;;  %1271 = vmatprep.subr.bf16.mxu0 %v3311_v51  ;;  %1312 = vmatprep.subr.bf16.mxu1 %v3320_v60 }
 0x1c1   : > { %v3420_v19 = vmul.f32 %v3417_v38, %v1098_v26 }
 0x1c2   : > { %1272 = vmatpush1.bf16.msra.mxu0 %v3318_v58  ;;  %1313 = vmatpush1.bf16.msra.mxu1 %v3324_v61 }
 0x1c3   : > { %v1111_v25 = vpack.c.bf16 %v3420_v19, %v3420_v19  ;;  %1388 = vmatprep.subr.bf16.mxu0 %v3127_v1  ;;  %1429 = vmatprep.subr.bf16.mxu1 %v3138_v5  ;;  %v3871_v1 = vld [vmem:[#allocation33_spill] sm:$0xff] }
 0x1c4   : > { %v3874_v5 = vld [vmem:[#allocation37_spill] sm:$0xff] }
 0x1c5   : > { %2231 = vst [vmem:[%s3123_s20 + $0xc] sm:$0xf] %v1111_v25  ;;  %1290 = vmatmul.mubr.bf16.vlgmr.msra.gmra.mrb[12].mxu0 %v1111_v25  ;;  %1331 = vmatmul.mubr.bf16.vlgmr.msra.gmra.mrb[12].mxu1 %v1111_v25  ;;  %v1123_v25 = vunpack.c.l.bf16 %v2233_v22 }
 0x1c6   : > { %1389 = vmatpush1.bf16.msra.mxu0 %v3129_v2  ;;  %1430 = vmatpush1.bf16.msra.mxu1 %v3142_v7  ;;  %v3872_v2 = vld [vmem:[#allocation36_spill] sm:$0xff]  ;;  %v3876_v7 = vld [vmem:[#allocation39_spill] sm:$0xff] }
 0x1c7   : > { %1390 = vmatprep.subr.bf16.mxu0 %v3134_v4  ;;  %1431 = vmatprep.subr.bf16.mxu1 %v3149_v9  ;;  %v3873_v4 = vld [vmem:[#allocation34_spill] sm:$0xff]  ;;  %v3878_v9 = vld [vmem:[#allocation41_spill] sm:$0xff] }
 0x1c8   : > { %1420 = vmatprep.mubr.bf16.mxu0 %v3866_v63  ;;  %1461 = vmatprep.mubr.bf16.mxu1 %v3866_v63 }
 0x1ca   : > { %1391 = vmatpush1.bf16.msra.mxu0 %v3140_v6  ;;  %1432 = vmatpush1.bf16.msra.mxu1 %v3152_v10  ;;  %v3875_v6 = vld [vmem:[#allocation35_spill] sm:$0xff]  ;;  %v3879_v10 = vld [vmem:[#allocation40_spill] sm:$0xff] }
 0x1cb   : > { %1392 = vmatprep.subr.bf16.mxu0 %v3146_v8  ;;  %1433 = vmatprep.subr.bf16.mxu1 %v3161_v13  ;;  %v3877_v8 = vld [vmem:[#allocation38_spill] sm:$0xff]  ;;  %v3882_v13 = vld [vmem:[#allocation45_spill] sm:$0xff] }
 0x1ce   : > { %1393 = vmatpush1.bf16.msra.mxu0 %v3156_v11  ;;  %1434 = vmatpush1.bf16.msra.mxu1 %v3164_v14  ;;  %v3880_v11 = vld [vmem:[#allocation44_spill] sm:$0xff]  ;;  %v3883_v14 = vld [vmem:[#allocation43_spill] sm:$0xff] }
 0x1cf   : > { %1394 = vmatprep.subr.bf16.mxu0 %v3159_v12  ;;  %1435 = vmatprep.subr.bf16.mxu1 %v3170_v16  ;;  %v3881_v12 = vld [vmem:[#allocation42_spill] sm:$0xff]  ;;  %v3884_v16 = vld [vmem:[#allocation48_spill] sm:$0xff] }
 0x1d2   : > { %1395 = vmatpush1.bf16.msra.mxu0 %v3871_v1  ;;  %1436 = vmatpush1.bf16.msra.mxu1 %v3872_v2 }
 0x1d3   : > { %1396 = vmatprep.subr.bf16.mxu0 %v3873_v4  ;;  %1437 = vmatprep.subr.bf16.mxu1 %v3874_v5 }
 0x1d6   : > { %1397 = vmatpush1.bf16.msra.mxu0 %v3875_v6  ;;  %1438 = vmatpush1.bf16.msra.mxu1 %v3876_v7 }
 0x1d7   : > { %1398 = vmatprep.subr.bf16.mxu0 %v3877_v8  ;;  %1439 = vmatprep.subr.bf16.mxu1 %v3878_v9 }
 0x1da   : > { %1399 = vmatpush1.bf16.msra.mxu0 %v3879_v10  ;;  %1440 = vmatpush1.bf16.msra.mxu1 %v3880_v11 }
 0x1db   : > { %1400 = vmatprep.subr.bf16.mxu0 %v3881_v12  ;;  %1441 = vmatprep.subr.bf16.mxu1 %v3882_v13 }
 0x1de   : > { %1401 = vmatpush1.bf16.msra.mxu0 %v3883_v14  ;;  %1442 = vmatpush1.bf16.msra.mxu1 %v3884_v16 }
 0x1df   : > { %1402 = vmatprep.subr.bf16.mxu0 %v3885_v29  ;;  %1443 = vmatprep.subr.bf16.mxu1 %v3886_v31 }
 0x1e2   : > { %1403 = vmatpush1.bf16.msra.mxu0 %v3887_v17  ;;  %1444 = vmatpush1.bf16.msra.mxu1 %v3888_v27 }
 0x1e3   : > { %1519 = vmatprep.subr.bf16.mxu0 %v3889_v28  ;;  %1560 = vmatprep.subr.bf16.mxu1 %v3890_v23  ;;  %v1124_v23 = vunpack.c.h.bf16 %v2233_v22 }
 0x278   : > { %v1160_v3 = vpop.f32.mrb[8].mxu0  ;;  %v1201_v62 = vpop.f32.mrb[8].mxu1 }
 0x279   : > { %v1208_v26 = vadd.f32 %v1160_v3, %v1121_v34  ;;  %v1162_v1 = vpop.f32.mrb[9].mxu0  ;;  %v1203_v2 = vpop.f32.mrb[9].mxu1  ;;  %v1210_v28 = vadd.f32 %v1201_v62, %v1123_v25 }
 0x27a   : > { %v1209_v4 = vadd.f32 %v1162_v1, %v1122_v21  ;;  %v1164_v5 = vpop.f32.mrb[10].mxu0  ;;  %v1205_v6 = vpop.f32.mrb[10].mxu1  ;;  %v1211_v33 = vadd.f32 %v1203_v2, %v1124_v23  ;;  %v2237_v2 = vld [vmem:[%s3089_s12 + $0x28] sm:$0xff] }
 0x27b   : > { %v1212_v8 = vmul.f32 0.5, %v1208_v26  ;;  %v1165_v17 = vpop.f32.mrb[11].mxu0  ;;  %v1206_v27 = vpop.f32.mrb[11].mxu1  ;;  %v3891_v26 = vld [vmem:[#allocation56_spill] sm:$0xff] }
 0x27c   : > { %v1216_v31 = vmul.f32 0.5, %v1209_v4  ;;  %v1221_v29 = vmul.f32 0.5, %v1211_v33  ;;  %v815_v17 = vmul.f32 %v3376_v15, %v3891_v26  ;;  %v818_v26 = vld [vmem:[#allocation4] sm:$0xff] }
 0x27d   : > { %2495 = vtanh.f32 %v1212_v8  ;;  %v1254_v8 = vunpack.c.l.bf16 %v2237_v2 }
 0x27e   : > { %2497 = vtanh.f32 %v1216_v31  ;;  %v2236_v31 = vld [vmem:[%s3089_s12 + $0x20] sm:$0xff] }
 0x27f   : > { %2499 = vtanh.f32 %v1210_v28  ;;  %v1252_v23 = vunpack.c.l.bf16 %v2236_v31 }
 0x280   : > { %2501 = vtanh.f32 %v1221_v29 }
 0x287   : > { %v2496_v16 = vpop.eup %2495 }
 0x288   : > { %v2498_v34 = vpop.eup %2497  ;;  %v1214_v3 = vmul.f32 0.5, %v2496_v16  ;;  %v1253_v16 = vunpack.c.h.bf16 %v2236_v31 }
 0x289   : > { %v1218_v14 = vmul.f32 0.5, %v2498_v34  ;;  %v2500_v1 = vpop.eup %2499 }
 0x28a   : > { %v1215_v21 = vadd.f32 0.5, %v1214_v3  ;;  %v2502_v28 = vpop.eup %2501 }
 0x28b   : > { %v1219_v27 = vadd.f32 0.5, %v1218_v14  ;;  %v1223_v25 = vmul.f32 0.5, %v2502_v28 }
 0x28c   : > { %v1226_v4 = vmul.f32 %v2500_v1, %v1215_v21 }
 0x28d   : > { %v1225_v62 = vmul.f32 %v1219_v27, %v815_v17  ;;  %v1224_v15 = vadd.f32 0.5, %v1223_v25 }
 0x28f   : > { %v3467_v22 = vadd.f32 %v1226_v4, %v1225_v62 }
 0x291   : > { %3892 = vst [vmem:[#allocation54_spill] sm:$0xff] %v3467_v22  ;;  %2503 = vtanh.f32 %v3467_v22  ;;  %v3472_v22 = vpop.permute.xlu1 %1232 }
 0x298   : > { %v1291_v5 = vpop.f32.mrb[12].mxu0  ;;  %v1332_v29 = vpop.f32.mrb[12].mxu1 }
 0x299   : > { %v1339_v6 = vadd.f32 %v1291_v5, %v1252_v23  ;;  %v1293_v33 = vpop.f32.mrb[13].mxu0  ;;  %v1334_v34 = vpop.f32.mrb[13].mxu1  ;;  %v1341_v31 = vadd.f32 %v1332_v29, %v1254_v8  ;;  %v1255_v23 = vunpack.c.h.bf16 %v2237_v2  ;;  %v819_v5 = vadd.f32 %v818_v26, %v3379_v36  ;;  %v2571_v26 = vld [vmem:[#allocation11 + $0x84] ss:$16 sps:$4 sm:$0xff]  }
 0x29a   : > { %v1340_v14 = vadd.f32 %v1293_v33, %v1253_v16  ;;  %v1295_v3 = vpop.f32.mrb[14].mxu0  ;;  %v1336_v21 = vpop.f32.mrb[14].mxu1 }
 0x29b   : > { %v2504_v1 = vpop.eup %2503  ;;  %v1343_v17 = vmul.f32 0.5, %v1339_v6  ;;  %v1296_v27 = vpop.f32.mrb[15].mxu0  ;;  %v1342_v6 = vadd.f32 %v1334_v34, %v1255_v23  ;;  %v2568_v3 = vld [vmem:[#allocation11 + $0x6c] ss:$16 sps:$4 sm:$0xff]   ;;  %v2569_v21 = vld [vmem:[#allocation11 + $0x60] ss:$16 sps:$4 sm:$0xff]  }
 0x29c   : > { %v1337_v4 = vpop.f32.mrb[15].mxu1  ;;  %v1229_v62 = vmul.f32 %v2504_v1, %v1224_v15  ;;  %v1347_v28 = vmul.f32 0.5, %v1340_v14  ;;  %v2566_v15 = vld [vmem:[#allocation11 + $0x48] ss:$16 sps:$4 sm:$0xff]   ;;  %v2567_v14 = vld [vmem:[#allocation11 + $0x64] ss:$16 sps:$4 sm:$0xff]  }
 0x29d   : > { %2505 = vtanh.f32 %v1343_v17  ;;  %v1352_v36 = vmul.f32 0.5, %v1342_v6  ;;  %v2570_v1 = vld [vmem:[#allocation11 + $0x68] ss:$16 sps:$4 sm:$0xff]   ;;  %v2572_v17 = vld [vmem:[#allocation11 + $0x8c] ss:$16 sps:$4 sm:$0xff]   ;;  %v3897_v23 = vld [vmem:[#allocation47_spill] sm:$0xff] }
 0x29e   : > { %v1235_v25 = vmul.f32 %v3472_v22, %v1229_v62  ;;  %2507 = vtanh.f32 %v1347_v28  ;;  %v2573_v27 = vld [vmem:[#allocation11 + $0x80] ss:$16 sps:$4 sm:$0xff]   ;;  %v2574_v4 = vld [vmem:[#allocation11 + $0xa4] ss:$16 sps:$4 sm:$0xff]   ;;  %v3894_v28 = vld [vmem:[#allocation48_spill] sm:$0xff] }
 0x29f   : > { %2509 = vtanh.f32 %v1341_v31  ;;  %v3893_v62 = vld [vmem:[#allocation43_spill] sm:$0xff]  ;;  %v3895_v31 = vld [vmem:[#allocation46_spill] sm:$0xff] }
 0x2a0   : > { %v3476_v16 = vadd.f32 %v1235_v25, %v819_v5  ;;  %v1242_v33 = vpack.c.bf16 %v1235_v25, %v1235_v25  ;;  %2511 = vtanh.f32 %v1352_v36  ;;  %v3898_v5 = vld [vmem:[#allocation51_spill] sm:$0xff]  ;;  %v2241_v25 = vld [vmem:[%s3109_s29 + $0x28] sm:$0xff] }
 0x2a2   : > { %2235 = vst [vmem:[%s3121_s11 + $0x4] sm:$0xf] %v1242_v33  ;;  %1421 = vmatmul.mubr.bf16.vlgmr.msra.gmra.mrb[16].mxu0 %v1242_v33  ;;  %1462 = vmatmul.mubr.bf16.vlgmr.msra.gmra.mrb[16].mxu1 %v1242_v33 }
 0x2a3   : > { %1520 = vmatpush1.bf16.msra.mxu0 %v3226_v37  ;;  %1561 = vmatpush1.bf16.msra.mxu1 %v3236_v40 }
 0x2a4   : > { %1521 = vmatprep.subr.bf16.mxu0 %v3233_v39  ;;  %1562 = vmatprep.subr.bf16.mxu1 %v3242_v42  ;;  %v1105_v42 = vmul.f32 %v3417_v38, %v3398_v24  ;;  %v2559_v24 = vld [vmem:[#allocation11 + $0x24] ss:$16 sps:$4 sm:$0xff]   ;;  %v2564_v38 = vld [vmem:[#allocation11 + $0x4c] ss:$16 sps:$4 sm:$0xff]  }
 0x2a5   : > { %1551 = vmatprep.mubr.bf16.mxu0 %v3866_v63  ;;  %1592 = vmatprep.mubr.bf16.mxu1 %v3866_v63 }
 0x2a7   : > { %v2506_v2 = vpop.eup %2505  ;;  %1522 = vmatpush1.bf16.msra.mxu0 %v3240_v41  ;;  %1563 = vmatpush1.bf16.msra.mxu1 %v3251_v45 }
 0x2a8   : > { %v2508_v29 = vpop.eup %2507  ;;  %v1345_v8 = vmul.f32 0.5, %v2506_v2  ;;  %1523 = vmatprep.subr.bf16.mxu0 %v3245_v43  ;;  %1564 = vmatprep.subr.bf16.mxu1 %v3256_v46  ;;  %v1385_v2 = vunpack.c.l.bf16 %v2241_v25 }
 0x2a9   : > { %v1349_v37 = vmul.f32 0.5, %v2508_v29  ;;  %v2510_v40 = vpop.eup %2509 }
 0x2aa   : > { %v1346_v39 = vadd.f32 0.5, %v1345_v8 }
 0x2ab   : > { %v1350_v34 = vadd.f32 0.5, %v1349_v37  ;;  %1524 = vmatpush1.bf16.msra.mxu0 %v3249_v44  ;;  %1565 = vmatpush1.bf16.msra.mxu1 %v3262_v48  ;;  %v2512_v44 = vpop.eup %2511 }
 0x2ac   : > { %v1357_v41 = vmul.f32 %v2510_v40, %v1346_v39  ;;  %1525 = vmatprep.subr.bf16.mxu0 %v3259_v47  ;;  %1566 = vmatprep.subr.bf16.mxu1 %v3268_v50  ;;  %v1354_v46 = vmul.f32 0.5, %v2512_v44 }
 0x2ad   : > { %v1356_v43 = vmul.f32 %v1350_v34, %v1105_v42 }
 0x2ae   : > { %v1355_v47 = vadd.f32 0.5, %v1354_v46  ;;  %v1386_v46 = vunpack.c.h.bf16 %v2241_v25 }
 0x2af   : > { %v3495_v45 = vadd.f32 %v1357_v41, %v1356_v43  ;;  %1526 = vmatpush1.bf16.msra.mxu0 %v3266_v49  ;;  %1567 = vmatpush1.bf16.msra.mxu1 %v3276_v54  ;;  %v1108_v49 = vld [vmem:[#allocation7] sm:$0xff] }
 0x2b0   : > { %1527 = vmatprep.subr.bf16.mxu0 %v3272_v52  ;;  %1568 = vmatprep.subr.bf16.mxu1 %v3282_v56  ;;  %v3514_v52 = vpop.permute.xlu1 %1363  ;;  %v1109_v54 = vadd.f32 %v1108_v49, %v3420_v19  ;;  %v2565_v19 = vld [vmem:[#allocation11 + $0x40] ss:$16 sps:$4 sm:$0xff]  }
 0x2b1   : > { %2513 = vtanh.f32 %v3495_v45 }
 0x2b3   : > { %1528 = vmatpush1.bf16.msra.mxu0 %v3280_v55  ;;  %1569 = vmatpush1.bf16.msra.mxu1 %v3289_v59  ;;  %v2555_v59 = vld [vmem:[#allocation11 + $0x4] ss:$16 sps:$4 sm:$0xff]  }
 0x2b4   : > { %1529 = vmatprep.subr.bf16.mxu0 %v3285_v57  ;;  %1570 = vmatprep.subr.bf16.mxu1 %v3868_v30  ;;  %v2560_v30 = vld [vmem:[#allocation11 + $0x2c] ss:$16 sps:$4 sm:$0xff]  }
 0x2b7   : > { %1530 = vmatpush1.bf16.msra.mxu0 %v3869_v18  ;;  %1571 = vmatpush1.bf16.msra.mxu1 %v3302_v0  ;;  %v2556_v0 = vld [vmem:[#allocation11 + $0xc] ss:$16 sps:$4 sm:$0xff]   ;;  %v2562_v18 = vld [vmem:[#allocation11 + $0x28] ss:$16 sps:$4 sm:$0xff]  }
 0x2b8   : > { %1531 = vmatprep.subr.bf16.mxu0 %v3870_v20  ;;  %1572 = vmatprep.subr.bf16.mxu1 %v3308_v35  ;;  %v2563_v20 = vld [vmem:[#allocation11 + $0x44] ss:$16 sps:$4 sm:$0xff]  }
 0x2bb   : > { %v2514_v48 = vpop.eup %2513  ;;  %1532 = vmatpush1.bf16.msra.mxu0 %v3306_v32  ;;  %1573 = vmatpush1.bf16.msra.mxu1 %v3314_v53  ;;  %v2557_v32 = vld [vmem:[#allocation11] ss:$16 sps:$4 sm:$0xff]  }
 0x2bc   : > { %v1360_v50 = vmul.f32 %v2514_v48, %v1355_v47  ;;  %1533 = vmatprep.subr.bf16.mxu0 %v3311_v51  ;;  %1574 = vmatprep.subr.bf16.mxu1 %v3320_v60  ;;  %v2558_v51 = vld [vmem:[#allocation11 + $0x8] ss:$16 sps:$4 sm:$0xff]  }
 0x2be   : > { %v1366_v55 = vmul.f32 %v3514_v52, %v1360_v50 }
 0x2bf   : > { %1534 = vmatpush1.bf16.msra.mxu0 %v3318_v58  ;;  %1575 = vmatpush1.bf16.msra.mxu1 %v3324_v61  ;;  %v2561_v58 = vld [vmem:[#allocation11 + $0x20] ss:$16 sps:$4 sm:$0xff]  }
 0x2c0   : > { %v3520_v56 = vadd.f32 %v1366_v55, %v1109_v54  ;;  %v1373_v57 = vpack.c.bf16 %v1366_v55, %v1366_v55  ;;  %1650 = vmatprep.subr.bf16.mxu0 %v2555_v59  ;;  %1691 = vmatprep.subr.bf16.mxu1 %v2556_v0  ;;  %v3901_v0 = vld [vmem:[#allocation54_spill] sm:$0xff] }
 0x2c2   : > { %2239 = vst [vmem:[%s3123_s20 + $0x8] sm:$0xf] %v1373_v57  ;;  %1552 = vmatmul.mubr.bf16.vlgmr.msra.gmra.mrb[20].mxu0 %v1373_v57  ;;  %1593 = vmatmul.mubr.bf16.vlgmr.msra.gmra.mrb[20].mxu1 %v1373_v57 }
 0x2c3   : > { %1651 = vmatpush1.bf16.msra.mxu0 %v2557_v32  ;;  %1692 = vmatpush1.bf16.msra.mxu1 %v2558_v51  ;;  %v1236_v32 = vmul.f32 %v3472_v22, %v3901_v0 }
 0x2c4   : > { %1652 = vmatprep.subr.bf16.mxu0 %v2559_v24  ;;  %1693 = vmatprep.subr.bf16.mxu1 %v2560_v30 }
 0x2c5   : > { %1682 = vmatprep.mubr.bf16.mxu0 %v3866_v63  ;;  %1723 = vmatprep.mubr.bf16.mxu1 %v3866_v63 }
 0x2c7   : > { %1653 = vmatpush1.bf16.msra.mxu0 %v2561_v58  ;;  %1694 = vmatpush1.bf16.msra.mxu1 %v2562_v18  ;;  %v2244_v18 = vld [vmem:[%s3089_s12 + $0x10] sm:$0xff] }
 0x2c8   : > { %1654 = vmatprep.subr.bf16.mxu0 %v2563_v20  ;;  %1695 = vmatprep.subr.bf16.mxu1 %v2564_v38  ;;  %v1514_v38 = vunpack.c.l.bf16 %v2244_v18 }
 0x2cb   : > { %1655 = vmatpush1.bf16.msra.mxu0 %v2565_v19  ;;  %1696 = vmatpush1.bf16.msra.mxu1 %v2566_v15  ;;  %v2245_v15 = vld [vmem:[%s3089_s12 + $0x18] sm:$0xff] }
 0x2cc   : > { %1656 = vmatprep.subr.bf16.mxu0 %v2567_v14  ;;  %1697 = vmatprep.subr.bf16.mxu1 %v2568_v3  ;;  %v1515_v14 = vunpack.c.h.bf16 %v2244_v18  ;;  %v1517_v25 = vunpack.c.h.bf16 %v2245_v15  ;;  %v2591_v18 = vld [vmem:[#allocation11 + $0x180] ss:$16 sps:$4 sm:$0xff]  }
 0x2cf   : > { %1657 = vmatpush1.bf16.msra.mxu0 %v2569_v21  ;;  %1698 = vmatpush1.bf16.msra.mxu1 %v2570_v1 }
 0x2d0   : > { %1658 = vmatprep.subr.bf16.mxu0 %v2571_v26  ;;  %1699 = vmatprep.subr.bf16.mxu1 %v2572_v17  ;;  %v1516_v26 = vunpack.c.l.bf16 %v2245_v15 }
 0x2d3   : > { %1659 = vmatpush1.bf16.msra.mxu0 %v2573_v27  ;;  %1700 = vmatpush1.bf16.msra.mxu1 %v3876_v7  ;;  %v3896_v7 = vld [vmem:[#allocation49_spill] sm:$0xff] }
 0x2d4   : > { %1660 = vmatprep.subr.bf16.mxu0 %v2574_v4  ;;  %1701 = vmatprep.subr.bf16.mxu1 %v3878_v9  ;;  %v3899_v9 = vld [vmem:[#allocation50_spill] sm:$0xff] }
 0x2d7   : > { %1661 = vmatpush1.bf16.msra.mxu0 %v3879_v10  ;;  %1702 = vmatpush1.bf16.msra.mxu1 %v3880_v11  ;;  %v3900_v10 = vld [vmem:[#allocation52_spill] sm:$0xff]  ;;  %v2240_v11 = vld [vmem:[%s3109_s29 + $0x20] sm:$0xff] }
 0x2d8   : > { %1662 = vmatprep.subr.bf16.mxu0 %v3881_v12  ;;  %1703 = vmatprep.subr.bf16.mxu1 %v3882_v13  ;;  %v1383_v12 = vunpack.c.l.bf16 %v2240_v11  ;;  %v1384_v13 = vunpack.c.h.bf16 %v2240_v11  ;;  %v3548_v11 = vpop.permute.xlu0 %1494 }
 0x2db   : > { %1663 = vmatpush1.bf16.msra.mxu0 %v3893_v62  ;;  %1704 = vmatpush1.bf16.msra.mxu1 %v3894_v28 }
 0x2dc   : > { %1664 = vmatprep.subr.bf16.mxu0 %v3895_v31  ;;  %1705 = vmatprep.subr.bf16.mxu1 %v3896_v7 }
 0x2df   : > { %1665 = vmatpush1.bf16.msra.mxu0 %v3897_v23  ;;  %1706 = vmatpush1.bf16.msra.mxu1 %v3898_v5 }
 0x2e0   : > { %1779 = vmatprep.subr.bf16.mxu0 %v3899_v9  ;;  %1820 = vmatprep.subr.bf16.mxu1 %v3900_v10 }
 0x375   : > { %v1422_v33 = vpop.f32.mrb[16].mxu0  ;;  %v1463_v6 = vpop.f32.mrb[16].mxu1 }
 0x376   : > { %v1470_v36 = vadd.f32 %v1422_v33, %v1383_v12  ;;  %v1424_v29 = vpop.f32.mrb[17].mxu0  ;;  %v1465_v8 = vpop.f32.mrb[17].mxu1  ;;  %v1472_v44 = vadd.f32 %v1463_v6, %v1385_v2  ;;  %v2575_v2 = vld [vmem:[#allocation11 + $0x100] ss:$16 sps:$4 sm:$0xff]  }
 0x377   : > { %v1471_v37 = vadd.f32 %v1424_v29, %v1384_v13  ;;  %v1426_v39 = vpop.f32.mrb[18].mxu0  ;;  %v1467_v40 = vpop.f32.mrb[18].mxu1  ;;  %v1473_v47 = vadd.f32 %v1465_v8, %v1386_v46  ;;  %v2576_v29 = vld [vmem:[#allocation11 + $0x108] ss:$16 sps:$4 sm:$0xff]   ;;  %v2577_v8 = vld [vmem:[#allocation11 + $0x124] ss:$16 sps:$4 sm:$0xff]  }
 0x378   : > { %v1474_v42 = vmul.f32 0.5, %v1470_v36  ;;  %v1427_v34 = vpop.f32.mrb[19].mxu0  ;;  %v1468_v41 = vpop.f32.mrb[19].mxu1  ;;  %v2579_v40 = vld [vmem:[#allocation11 + $0x120] ss:$16 sps:$4 sm:$0xff]  }
 0x379   : > { %v1478_v43 = vmul.f32 0.5, %v1471_v37  ;;  %v1483_v48 = vmul.f32 0.5, %v1473_v47  ;;  %v2578_v37 = vld [vmem:[#allocation11 + $0x12c] ss:$16 sps:$4 sm:$0xff]  }
 0x37a   : > { %2515 = vtanh.f32 %v1474_v42  ;;  %v2580_v42 = vld [vmem:[#allocation11 + $0x128] ss:$16 sps:$4 sm:$0xff]  }
 0x37b   : > { %2517 = vtanh.f32 %v1478_v43  ;;  %v2581_v43 = vld [vmem:[#allocation11 + $0x144] ss:$16 sps:$4 sm:$0xff]  }
 0x37c   : > { %2519 = vtanh.f32 %v1472_v44  ;;  %v2582_v44 = vld [vmem:[#allocation11 + $0x14c] ss:$16 sps:$4 sm:$0xff]  }
 0x37d   : > { %2521 = vtanh.f32 %v1483_v48 }
 0x384   : > { %v2516_v49 = vpop.eup %2515 }
 0x385   : > { %v2518_v50 = vpop.eup %2517  ;;  %v1476_v54 = vmul.f32 0.5, %v2516_v49  ;;  %v1367_v49 = vmul.f32 %v3514_v52, %v3495_v45  ;;  %v2590_v45 = vld [vmem:[#allocation11 + $0x18c] ss:$16 sps:$4 sm:$0xff]  }
 0x386   : > { %v1480_v55 = vmul.f32 0.5, %v2518_v50  ;;  %v2520_v59 = vpop.eup %2519 }
 0x387   : > { %v1477_v57 = vadd.f32 0.5, %v1476_v54  ;;  %v2522_v20 = vpop.eup %2521  ;;  %v2584_v54 = vld [vmem:[#allocation11 + $0x148] ss:$16 sps:$4 sm:$0xff]  }
 0x388   : > { %v1481_v51 = vadd.f32 0.5, %v1480_v55  ;;  %v1485_v19 = vmul.f32 0.5, %v2522_v20  ;;  %v2592_v20 = vld [vmem:[#allocation11 + $0x188] ss:$16 sps:$4 sm:$0xff]  }
 0x389   : > { %v1488_v24 = vmul.f32 %v2520_v59, %v1477_v57  ;;  %v2585_v57 = vld [vmem:[#allocation11 + $0x164] ss:$16 sps:$4 sm:$0xff]   ;;  %v2586_v59 = vld [vmem:[#allocation11 + $0x16c] ss:$16 sps:$4 sm:$0xff]  }
 0x38a   : > { %v1487_v30 = vmul.f32 %v1481_v51, %v1236_v32  ;;  %v1486_v22 = vadd.f32 0.5, %v1485_v19  ;;  %v2587_v51 = vld [vmem:[#allocation11 + $0x160] ss:$16 sps:$4 sm:$0xff]   ;;  %v2594_v19 = vld [vmem:[#allocation11 + $0x1ac] ss:$16 sps:$4 sm:$0xff]  }
 0x38c   : > { %v3543_v58 = vadd.f32 %v1488_v24, %v1487_v30  ;;  %v2588_v24 = vld [vmem:[#allocation11 + $0x168] ss:$16 sps:$4 sm:$0xff]   ;;  %v2589_v30 = vld [vmem:[#allocation11 + $0x184] ss:$16 sps:$4 sm:$0xff]  }
 0x38e   : > { %2523 = vtanh.f32 %v3543_v58 }
 0x395   : > { %v1553_v3 = vpop.f32.mrb[20].mxu0  ;;  %v1594_v21 = vpop.f32.mrb[20].mxu1 }
 0x396   : > { %v1601_v1 = vadd.f32 %v1553_v3, %v1514_v38  ;;  %v1555_v17 = vpop.f32.mrb[21].mxu0  ;;  %v1596_v27 = vpop.f32.mrb[21].mxu1  ;;  %v1603_v12 = vadd.f32 %v1594_v21, %v1516_v26  ;;  %v2593_v38 = vld [vmem:[#allocation11 + $0x1a4] ss:$16 sps:$4 sm:$0xff]   ;;  %v2596_v3 = vld [vmem:[#allocation11 + $0x1a8] ss:$16 sps:$4 sm:$0xff]  }
 0x397   : > { %v1602_v4 = vadd.f32 %v1555_v17, %v1515_v14  ;;  %v1557_v62 = vpop.f32.mrb[22].mxu0  ;;  %v1598_v28 = vpop.f32.mrb[22].mxu1  ;;  %v1604_v36 = vadd.f32 %v1596_v27, %v1517_v25  ;;  %v2595_v14 = vld [vmem:[#allocation11 + $0x1a0] ss:$16 sps:$4 sm:$0xff]   ;;  %v2597_v21 = vld [vmem:[#allocation11 + $0x1c4] ss:$16 sps:$4 sm:$0xff]  }
 0x398   : > { %v2524_v31 = vpop.eup %2523  ;;  %v1605_v7 = vmul.f32 0.5, %v1601_v1  ;;  %v1558_v23 = vpop.f32.mrb[23].mxu0  ;;  %v2598_v17 = vld [vmem:[#allocation11 + $0x1c0] ss:$16 sps:$4 sm:$0xff]  }
 0x399   : > { %v1599_v5 = vpop.f32.mrb[23].mxu1  ;;  %v1491_v9 = vmul.f32 %v2524_v31, %v1486_v22  ;;  %v1609_v10 = vmul.f32 0.5, %v1602_v4  ;;  %v1614_v39 = vmul.f32 0.5, %v1604_v36  ;;  %v2599_v22 = vld [vmem:[#allocation11 + $0x1e4] ss:$16 sps:$4 sm:$0xff]   ;;  %v3565_v4 = vpop.permute.xlu1 %1625  ;;  %v2249_v23 = vld [vmem:[%s3109_s29 + $0x38] sm:$0xff] }
 0x39a   : > { %2525 = vtanh.f32 %v1605_v7  ;;  %v2600_v28 = vld [vmem:[#allocation11 + $0x1e0] ss:$16 sps:$4 sm:$0xff]  }
 0x39b   : > { %v1497_v13 = vmul.f32 %v3548_v11, %v1491_v9  ;;  %2527 = vtanh.f32 %v1609_v10 }
 0x39c   : > { %2529 = vtanh.f32 %v1603_v12  ;;  %v1647_v12 = vunpack.c.l.bf16 %v2249_v23 }
 0x39d   : > { %v3552_v33 = vadd.f32 %v1497_v13, %v3476_v16  ;;  %v1504_v6 = vpack.c.bf16 %v1497_v13, %v1497_v13  ;;  %2531 = vtanh.f32 %v1614_v39  ;;  %v1648_v39 = vunpack.c.h.bf16 %v2249_v23 }
 0x39f   : > { %2243 = vst [vmem:[%s3121_s11 + $0x8] sm:$0xf] %v1504_v6  ;;  %1683 = vmatmul.mubr.bf16.vlgmr.msra.gmra.mrb[24].mxu0 %v1504_v6  ;;  %1724 = vmatmul.mubr.bf16.vlgmr.msra.gmra.mrb[24].mxu1 %v1504_v6 }
 0x3a0   : > { %1780 = vmatpush1.bf16.msra.mxu0 %v2575_v2  ;;  %1821 = vmatpush1.bf16.msra.mxu1 %v2576_v29 }
 0x3a1   : > { %1781 = vmatprep.subr.bf16.mxu0 %v2577_v8  ;;  %1822 = vmatprep.subr.bf16.mxu1 %v2578_v37 }
 0x3a2   : > { %1811 = vmatprep.mubr.bf16.mxu0 %v3866_v63  ;;  %1852 = vmatprep.mubr.bf16.mxu1 %v3866_v63  ;;  %v2583_v63 = vld [vmem:[#allocation11 + $0x140] ss:$16 sps:$4 sm:$0xff]  }
 0x3a4   : > { %v2526_v16 = vpop.eup %2525  ;;  %1782 = vmatpush1.bf16.msra.mxu0 %v2579_v40  ;;  %1823 = vmatpush1.bf16.msra.mxu1 %v2580_v42 }
 0x3a5   : > { %v2528_v34 = vpop.eup %2527  ;;  %v1607_v41 = vmul.f32 0.5, %v2526_v16  ;;  %1783 = vmatprep.subr.bf16.mxu0 %v2581_v43  ;;  %1824 = vmatprep.subr.bf16.mxu1 %v2582_v44 }
 0x3a6   : > { %v1611_v46 = vmul.f32 0.5, %v2528_v34  ;;  %v2530_v48 = vpop.eup %2529 }
 0x3a7   : > { %v1608_v47 = vadd.f32 0.5, %v1607_v41  ;;  %v2532_v52 = vpop.eup %2531 }
 0x3a8   : > { %v1612_v50 = vadd.f32 0.5, %v1611_v46  ;;  %1784 = vmatpush1.bf16.msra.mxu0 %v2583_v63  ;;  %1825 = vmatpush1.bf16.msra.mxu1 %v2584_v54  ;;  %v1616_v15 = vmul.f32 0.5, %v2532_v52  ;;  %v1757_v54 = vpop.permute.xlu0 %1756 }
 0x3a9   : > { %v1619_v55 = vmul.f32 %v2530_v48, %v1608_v47  ;;  %1785 = vmatprep.subr.bf16.mxu0 %v2585_v57  ;;  %1826 = vmatprep.subr.bf16.mxu1 %v2586_v59  ;;  %v1498_v47 = vmul.f32 %v3548_v11, %v3543_v58  ;;  %v1769_v57 = vld [vmem:[%s3089_s12] sm:$0xff] }
 0x3aa   : > { %v1618_v0 = vmul.f32 %v1612_v50, %v1367_v49  ;;  %v1617_v1 = vadd.f32 0.5, %v1616_v15 }
 0x3ac   : > { %v3559_v32 = vadd.f32 %v1619_v55, %v1618_v0  ;;  %1786 = vmatpush1.bf16.msra.mxu0 %v2587_v51  ;;  %1827 = vmatpush1.bf16.msra.mxu1 %v2588_v24  ;;  %v1774_v0 = vunpack.c.l.bf16 %v1769_v57  ;;  %v1770_v24 = vld [vmem:[%s3089_s12 + $0x8] sm:$0xff] }
 0x3ad   : > { %1787 = vmatprep.subr.bf16.mxu0 %v2589_v30  ;;  %1828 = vmatprep.subr.bf16.mxu1 %v2590_v45  ;;  %v1775_v30 = vunpack.c.h.bf16 %v1769_v57 }
 0x3ae   : > { %2533 = vtanh.f32 %v3559_v32 }
 0x3b0   : > { %1788 = vmatpush1.bf16.msra.mxu0 %v2591_v18  ;;  %1829 = vmatpush1.bf16.msra.mxu1 %v2592_v20  ;;  %v1776_v20 = vunpack.c.l.bf16 %v1770_v24 }
 0x3b1   : > { %1789 = vmatprep.subr.bf16.mxu0 %v2593_v38  ;;  %1830 = vmatprep.subr.bf16.mxu1 %v2594_v19 }
 0x3b4   : > { %1790 = vmatpush1.bf16.msra.mxu0 %v2595_v14  ;;  %1831 = vmatpush1.bf16.msra.mxu1 %v2596_v3 }
 0x3b5   : > { %1791 = vmatprep.subr.bf16.mxu0 %v2597_v21  ;;  %1832 = vmatprep.subr.bf16.mxu1 %v3308_v35 }
 0x3b8   : > { %v2534_v26 = vpop.eup %2533  ;;  %1792 = vmatpush1.bf16.msra.mxu0 %v2598_v17  ;;  %1833 = vmatpush1.bf16.msra.mxu1 %v3314_v53  ;;  %v2248_v53 = vld [vmem:[%s3109_s29 + $0x30] sm:$0xff] }
 0x3b9   : > { %v1622_v27 = vmul.f32 %v2534_v26, %v1617_v1  ;;  %1793 = vmatprep.subr.bf16.mxu0 %v2599_v22  ;;  %1834 = vmatprep.subr.bf16.mxu1 %v3320_v60  ;;  %v1645_v7 = vunpack.c.l.bf16 %v2248_v53  ;;  %v1646_v5 = vunpack.c.h.bf16 %v2248_v53 }
 0x3bb   : > { %v1628_v62 = vmul.f32 %v3565_v4, %v1622_v27 }
 0x3bc   : > { %1794 = vmatpush1.bf16.msra.mxu0 %v2600_v28  ;;  %1835 = vmatpush1.bf16.msra.mxu1 %v3324_v61 }
 0x3bd   : > { %v3570_v35 = vadd.f32 %v1628_v62, %v3520_v56  ;;  %v1635_v31 = vpack.c.bf16 %v1628_v62, %v1628_v62  ;;  %v1777_v62 = vunpack.c.h.bf16 %v1770_v24 }
 0x3bf   : > { %2247 = vst [vmem:[%s3123_s20 + $0x4] sm:$0xf] %v1635_v31  ;;  %1812 = vmatmul.mubr.bf16.vlgmr.msra.gmra.mrb[28].mxu0 %v1635_v31  ;;  %1853 = vmatmul.mubr.bf16.vlgmr.msra.gmra.mrb[28].mxu1 %v1635_v31 }
 0x472   : > { %v1684_v60 = vpop.f32.mrb[24].mxu0  ;;  %v1725_v9 = vpop.f32.mrb[24].mxu1 }
 0x473   : > { %v1732_v10 = vadd.f32 %v1684_v60, %v1645_v7  ;;  %v1686_v25 = vpop.f32.mrb[25].mxu0  ;;  %v1727_v13 = vpop.f32.mrb[25].mxu1  ;;  %v1734_v37 = vadd.f32 %v1725_v9, %v1647_v12 }
 0x474   : > { %v1733_v6 = vadd.f32 %v1686_v25, %v1646_v5  ;;  %v1688_v36 = vpop.f32.mrb[26].mxu0  ;;  %v1729_v61 = vpop.f32.mrb[26].mxu1  ;;  %v1735_v16 = vadd.f32 %v1727_v13, %v1648_v39  ;;  %v1629_v13 = vmul.f32 %v3565_v4, %v3559_v32  ;;  %v1901_v32 = vld [vmem:[%s3746_s4] sm:$0xff] (!%p2252_p13)  ;;  %v2854_v4 = vmov (!%p2252_p13), 0  }
 0x475   : > { %v1736_v2 = vmul.f32 0.5, %v1732_v10  ;;  %v1689_v56 = vpop.f32.mrb[27].mxu0  ;;  %v1730_v29 = vpop.f32.mrb[27].mxu1  ;;  %2601 = vset.pattern.permute.xlu0 (!%p2252_p13), %v2854_v4 }
 0x476   : > { %v1740_v8 = vmul.f32 0.5, %v1733_v6  ;;  %v1745_v40 = vmul.f32 0.5, %v1735_v16  ;;  %1905 = vperm.xlu0 (!%p2252_p13), %2601, %v1901_v32  }
 0x477   : > { %2535 = vtanh.f32 %v1736_v2  ;;  %v1886_v2 = vpop.permute.xlu1 %1885 }
 0x478   : > { %2537 = vtanh.f32 %v1740_v8 }
 0x479   : > { %2539 = vtanh.f32 %v1734_v37 }
 0x47a   : > { %2541 = vtanh.f32 %v1745_v40 }
 0x481   : > { %v2536_v42 = vpop.eup %2535 }
 0x482   : > { %v2538_v34 = vpop.eup %2537  ;;  %v1738_v41 = vmul.f32 0.5, %v2536_v42 }
 0x483   : > { %v1742_v43 = vmul.f32 0.5, %v2538_v34  ;;  %v2540_v46 = vpop.eup %2539 }
 0x484   : > { %v1739_v44 = vadd.f32 0.5, %v1738_v41  ;;  %v2542_v59 = vpop.eup %2541 }
 0x485   : > { %v1743_v48 = vadd.f32 0.5, %v1742_v43  ;;  %v1747_v51 = vmul.f32 0.5, %v2542_v59 }
 0x486   : > { %v1750_v49 = vmul.f32 %v2540_v46, %v1739_v44 }
 0x487   : > { %v1749_v50 = vmul.f32 %v1743_v48, %v1498_v47  ;;  %v1748_v11 = vadd.f32 0.5, %v1747_v51 }
 0x489   : > { %v1751_v63 = vadd.f32 %v1750_v49, %v1749_v50 }
 0x48b   : > { %2543 = vtanh.f32 %v1751_v63  ;;  %v1760_v55 = vmul.f32 %v1757_v54, %v1751_v63 }
 0x48d   : > { %1762 = vst [vmem:[#allocation3] sm:$0xff] %v1760_v55 }
 0x492   : > { %v1813_v45 = vpop.f32.mrb[28].mxu0  ;;  %v1854_v52 = vpop.f32.mrb[28].mxu1 }
 0x493   : > { %v1861_v18 = vadd.f32 %v1813_v45, %v1774_v0  ;;  %v1815_v38 = vpop.f32.mrb[29].mxu0  ;;  %v1856_v58 = vpop.f32.mrb[29].mxu1  ;;  %v1863_v22 = vadd.f32 %v1854_v52, %v1776_v20 }
 0x494   : > { %v1862_v19 = vadd.f32 %v1815_v38, %v1775_v30  ;;  %v1817_v15 = vpop.f32.mrb[30].mxu0  ;;  %v1858_v14 = vpop.f32.mrb[30].mxu1  ;;  %v1864_v7 = vadd.f32 %v1856_v58, %v1777_v62 }
 0x495   : > { %v2544_v3 = vpop.eup %2543  ;;  %v1865_v21 = vmul.f32 0.5, %v1861_v18  ;;  %v1818_v1 = vpop.f32.mrb[31].mxu0 }
 0x496   : > { %v1859_v26 = vpop.f32.mrb[31].mxu1  ;;  %v1753_v17 = vmul.f32 %v2544_v3, %v1748_v11  ;;  %v1869_v27 = vmul.f32 0.5, %v1862_v19  ;;  %v1874_v23 = vmul.f32 0.5, %v1864_v7 }
 0x497   : > { %2545 = vtanh.f32 %v1865_v21 }
 0x498   : > { %v1759_v28 = vmul.f32 %v1757_v54, %v1753_v17  ;;  %2547 = vtanh.f32 %v1869_v27 }
 0x499   : > { %2549 = vtanh.f32 %v1863_v22 }
 0x49a   : > { %1761 = vst [vmem:[#allocation2] sm:$0xff] %v1759_v28  ;;  %v1764_v31 = vadd.f32 %v1759_v28, %v3552_v33  ;;  %v1766_v53 = vpack.c.bf16 %v1759_v28, %v1759_v28  ;;  %2551 = vtanh.f32 %v1874_v23 }
 0x49c   : > { %1765 = vst [vmem:[#allocation4] sm:$0xff] %v1764_v31  ;;  %2251 = vst [vmem:[%s3121_s11 + $0xc] sm:$0xf] %v1766_v53 }
 0x4a1   : > { %v2546_v5 = vpop.eup %2545 }
 0x4a2   : > { %v2548_v60 = vpop.eup %2547  ;;  %v1867_v9 = vmul.f32 0.5, %v2546_v5 }
 0x4a3   : > { %v1871_v10 = vmul.f32 0.5, %v2548_v60  ;;  %v2550_v25 = vpop.eup %2549  ;;  %v1902_v41 = vld [vmem:[#allocation4] sm:$0xff] (!%p2252_p13) }
 0x4a4   : > { %v1868_v12 = vadd.f32 0.5, %v1867_v9  ;;  %v2552_v29 = vpop.eup %2551 }
 0x4a5   : > { %v1872_v6 = vadd.f32 0.5, %v1871_v10  ;;  %v1876_v8 = vmul.f32 0.5, %v2552_v29 }
 0x4a6   : > { %v1879_v36 = vmul.f32 %v2550_v25, %v1868_v12 }
 0x4a7   : > { %v1878_v61 = vmul.f32 %v1872_v6, %v1629_v13  ;;  %v1877_v37 = vadd.f32 0.5, %v1876_v8 }
 0x4a9   : > { %v1880_v33 = vadd.f32 %v1879_v36, %v1878_v61 }
 0x4ab   : > { %2553 = vtanh.f32 %v1880_v33  ;;  %v1889_v56 = vmul.f32 %v1886_v2, %v1880_v33 }
 0x4ad   : > { %1891 = vst [vmem:[#allocation6] sm:$0xff] %v1889_v56 }
 0x4b5   : > { %v2554_v39 = vpop.eup %2553 }
 0x4b6   : > { %v1882_v16 = vmul.f32 %v2554_v39, %v1877_v37  ;;  %1900 = sbr.rel (%p2252_p13) target bundleno = 1273 (0x4f9), region = 60 }
 0x4b8   : > { %v1888_v40 = vmul.f32 %v1886_v2, %v1882_v16 }
 0x4ba   : > { %1890 = vst [vmem:[#allocation5] sm:$0xff] %v1888_v40  ;;  %v1893_v42 = vadd.f32 %v1888_v40, %v3570_v35  ;;  %v1895_v34 = vpack.c.bf16 %v1888_v40, %v1888_v40 }
 0x4bc   : > { %1894 = vst [vmem:[#allocation7] sm:$0xff] %v1893_v42  ;;  %1896 = vst [vmem:[%s3123_s20] sm:$0xf] %v1895_v34 }
 0x4c3   : > { %v1910_v43 = vld [vmem:[#allocation7] sm:$0xff] }
 0x4f5   : > { %v1906_v44 = vpop.permute.xlu0 %1905 }
 0x4f6   : > { %v1908_v46 = vmul.f32 %v1906_v44, %v1902_v41  ;;  %v1911_v47 = vmul.f32 %v1910_v43, %v1906_v44 }
 0x4f8   : > { %1909 = vst [vmem:[#allocation16] sm:$0xff] %v1908_v46  ;;  %1912 = vst [vmem:[#allocation17] sm:$0xff] %v1911_v47 }
 0x4f9 PF: > { %s1918_s14 = sand.u32 1, %s2945_s16   ;;  %s3902_s27 = ssub.s32 1, %s2945_s16 }
 0x4fa   : > { %s2269_s12 = sshll.u32 %s3902_s27, 8  ;;  %s1949_s5 = sshll.u32 %s3123_s20, 4  ;;  %s3598_s5 = int_to_ptr.vmem [resolvable:$true] %s1949_s5 }
 0x4fb   : > { %s3596_s28 = scalar_lea.hbm %s3749_s7, %s2269_s12  ;;  %s3600_s18 = scalar_lea.sflag [#allocation15], %s1918_s14 }
 0x4fc   : > { %s2660_s23 = scalar_lea.vmem %s3598_s5, 256  ;;  %s2855_s21 = smov [#allocation14]  }
 0x4fd   : > { %p2661_p0 = scmp.ne.s32.totalorder %s3598_s5, %s2660_s23  ;;  %s2664_s25 = sshll.u32 %s2855_s21, 4  ;;  %s2665_s25 = int_to_ptr.vmem [resolvable:$false] %s2664_s25 }
 0x4fe   : > { %s2666_s17 = scalar_lea.vmem %s2665_s25, 512  ;;  %p2667_p1 = scmp.lt.s32.totalorder %s3598_s5, %s2665_s25 }
 0x4ff   : > { %p2662_p8 = pnand %p2661_p0, %p3033_p12  ;;  %p2668_p3 = scmp.lt.s32.totalorder %s2666_s17, %s2660_s23 }
 0x501   : > { %p2663_p2 = pneg %p2662_p8  ;;  %p2669_p7 = por %p2668_p3, %p2667_p1 }
 0x503   : > { %p2670_p9 = pnand %p2669_p7, %p2663_p2 }
 0x505   : > { %2673 = shalt.err (!%p2670_p9)
}
 0x506   : > { %s2674_s29 = scalar_lea.hbm %s3596_s28, 256  ;;  %s2678_s1 = scalar_lea.hbm %s3749_s7, 512 }
 0x507   : > { %p2675_p4 = scmp.ne.s32.totalorder %s3596_s28, %s2674_s29  ;;  %p2679_p10 = scmp.lt.u32.totalorder %s3596_s28, %s3749_s7 }
 0x508   : > { %p2680_p11 = scmp.lt.u32.totalorder %s2678_s1, %s2674_s29  ;;  %p2682_p0 = scmp.lt.u32.totalorder %s2674_s29, %s3596_s28 }
 0x509   : > { %p2676_p5 = pnand %p2675_p4, %p3033_p12 }
 0x50a   : > { %p2681_p13 = por %p2680_p11, %p2679_p10 }
 0x50b   : > { %p2677_p6 = pneg %p2676_p5 }
 0x50c   : > { %p2683_p8 = por %p2682_p0, %p2681_p13 }
 0x50e   : > { %p2684_p2 = pnand %p2683_p8, %p2677_p6 }
 0x510   : > { %2687 = shalt.err (!%p2684_p2)
}
 0x511   : > { %s2856_s27 = smov 64   ;;  %s2857_s12 = smov 4  }
 0x512   : > { %2277 = dma.vmem_to_hbm [thread:$0]  (%p3033_p12), %s3598_s5, 256, %s3596_s28, %s3600_s18, %s2856_s27, %s2856_s27, %s2857_s12  }
 0x513   : > { %s2268_s9 = sshll.u32 %s2945_s16, 8  ;;  %s1932_s25 = sshll.u32 %s3121_s11, 4  ;;  %s3634_s25 = int_to_ptr.vmem [resolvable:$true] %s1932_s25 }
 0x514   : > { %s3631_s21 = scalar_lea.hbm %s3748_s6, %s2268_s9  ;;  %s3903_s17 = sand.u32 1, %s2826_s10  }
 0x515   : > { %s3638_s29 = scalar_lea.sflag [#allocation10], %s3903_s17  ;;  %s2688_s24 = scalar_lea.vmem %s3634_s25, 256 }
 0x516   : > { %p2689_p1 = scmp.ne.s32.totalorder %s3634_s25, %s2688_s24  ;;  %p3904_p3 = scmp.ne.s32.totalorder %s3821_s19, 0 }
 0x517   : > { %s2858_s5 = smov [#allocation13]  }
 0x518   : > { %p2690_p7 = pnand %p2689_p1, %p3904_p3  ;;  %s2692_s28 = sshll.u32 %s2858_s5, 4  ;;  %s2693_s28 = int_to_ptr.vmem [resolvable:$false] %s2692_s28 }
 0x519   : > { %s2694_s18 = scalar_lea.vmem %s2693_s28, 512  ;;  %p2695_p9 = scmp.lt.s32.totalorder %s3634_s25, %s2693_s28 }
 0x51a   : > { %p2691_p12 = pneg %p2690_p7  ;;  %p2696_p4 = scmp.lt.s32.totalorder %s2694_s18, %s2688_s24 }
 0x51c   : > { %p2697_p5 = por %p2696_p4, %p2695_p9 }
 0x51e   : > { %p2698_p6 = pnand %p2697_p5, %p2691_p12 }
 0x520   : > { %2701 = shalt.err (!%p2698_p6)
}
 0x521   : > { %s2702_s11 = scalar_lea.hbm %s3631_s21, 256  ;;  %s2706_s1 = scalar_lea.hbm %s3748_s6, 512 }
 0x522   : > { %p2703_p10 = scmp.ne.s32.totalorder %s3631_s21, %s2702_s11  ;;  %p2707_p0 = scmp.lt.u32.totalorder %s3631_s21, %s3748_s6 }
 0x523   : > { %p2708_p8 = scmp.lt.u32.totalorder %s2706_s1, %s2702_s11  ;;  %p2710_p1 = scmp.lt.u32.totalorder %s2702_s11, %s3631_s21 }
 0x524   : > { %p2704_p11 = pnand %p2703_p10, %p3904_p3 }
 0x525   : > { %p2709_p2 = por %p2708_p8, %p2707_p0 }
 0x526   : > { %p2705_p13 = pneg %p2704_p11 }
 0x527   : > { %p2711_p7 = por %p2710_p1, %p2709_p2 }
 0x529   : > { %p2712_p12 = pnand %p2711_p7, %p2705_p13 }
 0x52b   : > { %2715 = shalt.err (!%p2712_p12)
}
 0x52c   : > { %2276 = dma.vmem_to_hbm [thread:$0]  (%p3904_p3), %s3634_s25, 256, %s3631_s21, %s3638_s29, %s2856_s27, %s2856_s27, %s2857_s12  }
 0x52d   : > { %s2859_s9 = smov [#allocation16]   ;;  %s2860_s23 = smov [#allocation17]  }
 0x52e   : > { %s1963_s22 = sshll.u32 %s2859_s9, 4  ;;  %s1974_s17 = sshll.u32 %s2860_s23, 4  ;;  %s1964_s22 = int_to_ptr.vmem [resolvable:$true] %s1963_s22  ;;  %s1975_s17 = int_to_ptr.vmem [resolvable:$true] %s1974_s17 }
 0x52f   : > { %s2716_s24 = scalar_lea.vmem %s1964_s22, 128  ;;  %p3905_p4 = scmp.eq.s32.totalorder %s2945_s16, 1 }
 0x530   : > { %p2717_p9 = scmp.ne.s32.totalorder %s1964_s22, %s2716_s24  ;;  %p2723_p10 = scmp.lt.s32.totalorder %s1964_s22, %s1964_s22 }
 0x531   : > { %p2724_p11 = scmp.lt.s32.totalorder %s2716_s24, %s2716_s24 }
 0x532   : > { %p2718_p5 = pnand %p2717_p9, %p3905_p4 }
 0x533   : > { %p2725_p13 = por %p2724_p11, %p2723_p10 }
 0x534   : > { %p2719_p6 = pneg %p2718_p5 }
 0x536   : > { %p2726_p0 = pnand %p2725_p13, %p2719_p6 }
 0x538   : > { %2729 = shalt.err (!%p2726_p0)
}
 0x539   : > { %s2730_s27 = scalar_lea.hbm %s3750_s8, 128  ;;  %p3906_p8 = pmov %p3905_p4 }
 0x53a   : > { %p2731_p3 = scmp.ne.s32.totalorder %s3750_s8, %s2730_s27  ;;  %p2736_p7 = scmp.lt.u32.totalorder %s2730_s27, %s3750_s8 }
 0x53c   : > { %p2732_p2 = pnand %p2731_p3, %p3906_p8 }
 0x53e   : > { %p2733_p1 = pneg %p2732_p2 }
 0x540   : > { %p2738_p12 = pnand %p2736_p7, %p2733_p1 }
 0x542   : > { %2741 = shalt.err (!%p2738_p12)
}
 0x543   : > { %p3907_p9 = pmov %p3905_p4  ;;  %s2742_s11 = scalar_lea.vmem %s1975_s17, 128 }
 0x544   : > { %p2743_p4 = scmp.ne.s32.totalorder %s1975_s17, %s2742_s11  ;;  %p3908_p5 = pmov %p3906_p8 }
 0x545   : > { %2279 = dma.vmem_to_hbm [thread:$0]  (%p3907_p9), %s1964_s22, 128, %s3750_s8, [#allocation15]  }
 0x546   : > { %p2744_p6 = pnand %p2743_p4, %p3908_p5  ;;  %p2749_p11 = scmp.lt.s32.totalorder %s1975_s17, %s1975_s17 }
 0x547   : > { %p2750_p13 = scmp.lt.s32.totalorder %s2742_s11, %s2742_s11 }
 0x548   : > { %p2745_p10 = pneg %p2744_p6 }
 0x549   : > { %p2751_p0 = por %p2750_p13, %p2749_p11 }
 0x54b   : > { %p2752_p3 = pnand %p2751_p0, %p2745_p10 }
 0x54d   : > { %2755 = shalt.err (!%p2752_p3)
}
 0x54e   : > { %s3909_s1 = sld [smem:[#allocation59_spill]]  ;;  %p3910_p2 = pmov %p3908_p5 }
 0x554   : > { %s2756_s13 = scalar_lea.hbm %s3909_s1, 128 }
 0x555   : > { %p2757_p8 = scmp.ne.s32.totalorder %s3909_s1, %s2756_s13  ;;  %p2762_p12 = scmp.lt.u32.totalorder %s2756_s13, %s3909_s1 }
 0x557   : > { %p2758_p1 = pnand %p2757_p8, %p3910_p2 }
 0x559   : > { %p2759_p7 = pneg %p2758_p1 }
 0x55b   : > { %p2764_p9 = pnand %p2762_p12, %p2759_p7 }
 0x55d   : > { %2767 = shalt.err (!%p2764_p9)
}
 0x55e   : > { %p3911_p4 = pmov %p3910_p2  ;;  %p3912_p5 = pmov %p3910_p2 }
 0x560   : > { %2281 = dma.vmem_to_hbm [thread:$0]  (%p3911_p4), %s1975_s17, 128, %s3909_s1, [#allocation18]  }
 0x561   : > { %2805 = dma.done.wait (%p3912_p5), [#allocation15], 128   ;;  %p3913_p6 = pmov %p3910_p2 }
 0x562   : > { %p3914_p10 = pmov %p3910_p2 }
 0x563   : > { %2807 = vsyncadd (%p3913_p6), [#allocation15], 4294967168 }
 0x564   : > { %2809 = dma.done.wait (%p3914_p10), [#allocation18], 128   ;;  %p3915_p11 = pmov %p3910_p2 }
 0x566   : > { %2811 = vsyncadd (%p3915_p11), [#allocation18], 4294967168 }
 0x567 PF: > { %s3916_s5 = sld [smem:[#allocation25_spill]]  ;;  %s3917_s27 = sld [smem:[#allocation29_spill]] }
 0x568   : > { %p3919_p0 = scmp.ge.s32.totalorder %s2846_s15, 2 }
 0x56d   : > { %s1994_s12 = sand.u32 1, %s3916_s5   ;;  %p3918_p13 = scmp.ne.s32.totalorder %s3917_s27, 0 }
 0x56e   : > { %s1995_s17 = scalar_lea.sflag [#allocation10], %s1994_s12 }
 0x56f   : > { %p2297_p3 = pnand %p3919_p0, %p3918_p13 }
 0x571   : > { %2813 = dma.done.wait (!%p2297_p3), %s1995_s17, 256  }
 0x572   : > { %2815 = vsyncadd (!%p2297_p3), %s1995_s17, 4294967040  ;;  %s3920_s21 = sadd.s32 4294967294, %s2846_s15   ;;  %s3921_s25 = sld [smem:[#allocation30_spill]] }
 0x573   : > { %s2003_s29 = sand.u32 1, %s3920_s21   ;;  %p3923_p2 = pmov %p3919_p0 }
 0x574   : > { %s2004_s16 = scalar_lea.sflag [#allocation15], %s2003_s29 }
 0x578   : > { %p3922_p8 = scmp.ne.s32.totalorder %s3921_s25, 0 }
 0x57a   : > { %p2300_p1 = pnand %p3923_p2, %p3922_p8 }
 0x57c   : > { %2817 = dma.done.wait (!%p2300_p1), %s2004_s16, 256  }
 0x57d   : > { %2819 = vsyncadd (!%p2300_p1), %s2004_s16, 4294967040  ;;  %s3924_s28 = sld [smem:[#allocation26_spill]]  ;;  %s3925_s11 = sld [smem:[#allocation32_spill]] }
 0x57e   : > { %s3926_s12 = sld [smem:[#allocation27_spill]]  ;;  %s3927_s13 = sld [smem:[#allocation28_spill]] }
 0x57f   : > { %s3928_s14 = sld [smem:[#allocation31_spill]]  ;;  %p28_p7 = scmp.ge.s32.totalorder %s2994_s26, 4  }
 0x580   : > { %s3929_s30 = smov %s2826_s10  ;;  %s3931_s15 = smov %s2994_s26 }
 0x581   :  { %30 = sbr.rel (!%p28_p7) target bundleno = 15 (0xf), region = 162 }
 0x583   : > { %s3930_s10 = smov %s3924_s28 }
 0x588   :  { %2009 = vsyncpa [#allocation9], 1 }
 0x589   :  { %2011 = vsyncpa [#allocation9 + $0x1], 1 }
 0x58a   :  { %2012 = vsyncpa [#allocation12], 1 }
 0x58b   :  { %2013 = vsyncpa [#allocation10], 1 }
 0x58c   :  { %2015 = vsyncpa [#allocation10 + $0x1], 1 }
 0x58d   :  { %2016 = vsyncpa [#allocation15], 1 }
 0x58e   :  { %2018 = vsyncpa [#allocation15 + $0x1], 1 }
 0x58f   :  { %2019 = vsyncpa [#allocation18], 1 }

</bundles_post_ra>
